<compile_context>
chip_gen: v5e
topology: v5e:2x2
jax: 0.10.0
libtpu: 0.0.40
codegen_flags: <defaults>
</compile_context>

<pallas_src>
import functools

import numpy as np
import jax
import jax.numpy as jnp
from jax.experimental import pallas as pl
from jax.experimental.pallas import tpu as pltpu

G, K = 5, 3
GK = G + K                                   # 8 basis functions per input
R = 4.0 * G * G / ((K + 1) * (K + 1))        # 6.25 ; R^2 folded into weights
WIDTHS = [28 * 28, 128, 32, 10]
N_CLASSES = WIDTHS[-1]

# Lane-padded sizes (multiples of 128).
IPAD1, IPAD2, IPAD3 = 896, 128, 128          # 784->896, 128, 32->128
IPADS = (IPAD1, IPAD2, IPAD3)
OPAD = 128                                   # 128, 32->128, 10->128


def _round_up(n, m):
    return ((n + m - 1) // m) * m


def _device_kind():
    try:
        return jax.devices()[0].device_kind.lower()
    except Exception:
        return ""


def _basis_to_slab(x, plo_ref, phi_ref, slab_ref, ipad, compute_dtype):
    """ReLU-KAN basis of x (TB, ipad) -> bf16 slab (TB, GK*ipad) in VMEM.

    R^2 is folded into the packed weights, so the basis here is just
    (relu(x - lo) * relu(hi - x))^2.  On v6e/v7x the whole chain runs in
    packed bf16; on v5e it stays f32 and only the store casts.
    """
    xc = x.astype(compute_dtype)
    for j in range(GK):                       # static unroll, GK = 8
        lo = plo_ref[j].astype(compute_dtype)   # scalar (SMEM)
        hi = phi_ref[j].astype(compute_dtype)
        u = jnp.maximum(xc - lo, 0.0) * jnp.maximum(hi - xc, 0.0)
        t = u * u
        slab_ref[:, j * ipad:(j + 1) * ipad] = t.astype(slab_ref.dtype)


def _fused_kernel(x_ref,
                  plo1_ref, phi1_ref, w1_ref, b1_ref,
                  plo2_ref, phi2_ref, w2_ref, b2_ref,
                  plo3_ref, phi3_ref, w3_ref, b3_ref,
                  o_ref,
                  slab1_ref, slab2_ref, *, compute_dtype):
    def layer(x, plo_ref, phi_ref, slab_ref, w_ref, b_ref, ipad):
        _basis_to_slab(x, plo_ref, phi_ref, slab_ref, ipad, compute_dtype)
        # One long-K bf16 matmul per layer (K = GK * ipad), f32 accumulation.
        acc = jnp.dot(slab_ref[...], w_ref[...],
                      preferred_element_type=jnp.float32)
        return acc + b_ref[...]               # (TB, OPAD) f32

    x = x_ref[...]                                                     # (TB, 896)
    h1 = layer(x,  plo1_ref, phi1_ref, slab1_ref, w1_ref, b1_ref, IPAD1)
    h2 = layer(h1, plo2_ref, phi2_ref, slab2_ref, w2_ref, b2_ref, IPAD2)
    # TODO(synk): layer 3 has only 32 real input columns; an i-major 256-wide
    # slab would cut its VPU/MXU work ~4x (few % of total, low priority).
    logits = layer(h2, plo3_ref, phi3_ref, slab2_ref, w3_ref, b3_ref, IPAD3)

    # Masked softmax over the 10 real classes (padded lanes -> prob 0).
    col = jax.lax.broadcasted_iota(jnp.int32, logits.shape, 1)
    z = jnp.where(col < N_CLASSES, logits, -1e30)
    m = jnp.max(z, axis=-1, keepdims=True)
    e = jnp.exp(z - m)
    s = jnp.sum(e, axis=-1, keepdims=True)
    o_ref[...] = (e * pl.reciprocal(s, approx=True)).astype(o_ref.dtype)


def _fused_call(x_pad, params, tb, compute_dtype):
    """x_pad: (B_pad, 896) f32 with B_pad % tb == 0."""
    b_pad = x_pad.shape[0]
    in_specs = [pl.BlockSpec((tb, IPAD1), lambda i: (i, 0))]
    args = [x_pad]
    for p in params:
        in_specs += [
            pl.BlockSpec(memory_space=pltpu.MemorySpace.SMEM),   # plo (GK,)
            pl.BlockSpec(memory_space=pltpu.MemorySpace.SMEM),   # phi (GK,)
            pl.BlockSpec(p["w_pad"].shape, lambda i: (0, 0)),    # weight, VMEM-resident
            pl.BlockSpec(p["b_pad"].shape, lambda i: (0, 0)),    # bias
        ]
        args += [p["plo"], p["phi"], p["w_pad"], p["b_pad"]]
    kernel = functools.partial(_fused_kernel, compute_dtype=compute_dtype)
    return pl.pallas_call(
        kernel,
        out_shape=jax.ShapeDtypeStruct((b_pad, OPAD), jnp.float32),
        grid=(b_pad // tb,),
        in_specs=in_specs,
        out_specs=pl.BlockSpec((tb, OPAD), lambda i: (i, 0)),
        scratch_shapes=[
            pltpu.VMEM((tb, GK * IPAD1), jnp.bfloat16),   # layer-1 basis slab
            pltpu.VMEM((tb, GK * IPAD2), jnp.bfloat16),   # reused by layers 2 & 3
        ],
        compiler_params=pltpu.CompilerParams(
            dimension_semantics=("parallel",)),
    )(*args)


def init_params(key):
    """Deterministic synthetic parameters (shapes per ReLUKANLayer.__init__)."""
    params = []
    for li in range(len(WIDTHS) - 1):
        I, O = WIDTHS[li], WIDTHS[li + 1]
        ipad = IPADS[li]
        # Phase tables: upstream init makes identical rows -> keep as (GK,).
        plo = np.arange(-K, G, dtype=np.float32) / G           # (GK,)
        phi = plo + (K + 1) / G
        # Conv2d(1, O, (GK, I)) weight/bias, torch layout (O, 1, GK, I), (O,).
        key, kw, kb = jax.random.split(key, 3)
        bound = 1.0 / np.sqrt(GK * I)                          # fan_in = 1*GK*I
        w_torch = jax.random.uniform(kw, (O, 1, GK, I), jnp.float32, -bound, bound)
        b_torch = jax.random.uniform(kb, (O,), jnp.float32, -bound, bound)
        # Replicate the raw reshape pairing: flat m = i*GK + j pairs
        # t[b, i, j] with W.reshape(O, GK*I)[o, m]  =>  (GK, I, O) repack.
        w_kernel = jnp.transpose(jnp.reshape(w_torch, (O, I, GK)), (2, 1, 0))
        # Fold R^2 (from t = (u*R)^2) into the packed weights so the kernel's
        # basis math drops the `* R`.  Applied to real rows only, BEFORE the
        # zero-padding, so padded rows stay exactly zero.
        w_scaled = w_kernel * np.float32(R * R)
        # Zero-pad I -> ipad, O -> OPAD, flatten to (GK*ipad, OPAD), bf16.
        w_full = jnp.zeros((GK, ipad, OPAD), jnp.float32).at[:, :I, :O].set(w_scaled)
        w_pad = jnp.reshape(w_full, (GK * ipad, OPAD)).astype(jnp.bfloat16)
        b_pad = jnp.zeros((1, OPAD), jnp.float32).at[0, :O].set(b_torch)
        params.append(dict(
            plo=jnp.asarray(plo), phi=jnp.asarray(phi),
            w_pad=w_pad, b_pad=b_pad,
            w_ref=w_kernel, b_ref=jnp.reshape(b_torch, (1, O)),   # f32 reference copies
        ))
    return params, key


def _pick_batch_tile(batch, kind):
    """Batch tile: multiple of 16 (bf16 sublane pack); 256 on v6e/v7x, 128 on v5e.

    On v7x, cap the tile so the grid has >= 2 steps whenever the batch allows,
    letting dimension_semantics=("parallel",) shard over both TensorCores.
    """
    newer = ("v6" in kind) or ("v7" in kind)
    max_tile = 256 if newer else 128
    tb = min(max_tile, _round_up(max(batch, 1), 16))
    if ("v7" in kind) and batch > 16:
        tb = min(tb, _round_up((batch + 1) // 2, 16))
    return tb


def relukan_mnist_forward(x_nchw, params):
    kind = _device_kind()
    # bf16 basis math on v6e/v7x (packed-bf16 VPU path); f32 elsewhere (v5e).
    compute_dtype = jnp.bfloat16 if (("v6" in kind) or ("v7" in kind)) else jnp.float32
    B = x_nchw.shape[0]
    x = jnp.reshape(x_nchw, (B, -1)).astype(jnp.float32)           # (B, 784) row-major
    tb = _pick_batch_tile(B, kind)
    b_pad = _round_up(B, tb)
    x = jnp.pad(x, ((0, b_pad - B), (0, IPAD1 - x.shape[1])))      # (B_pad, 896)
    out = _fused_call(x, params, tb, compute_dtype)                # (B_pad, 128)
    return out[:B, :N_CLASSES]                                     # (B, 10)


def relukan_mnist_reference(x_nchw, params):
    """Pure-JAX f32 reference with identical math, for a sanity check."""
    x = jnp.reshape(x_nchw, (x_nchw.shape[0], -1)).astype(jnp.float32)
    n = len(params)
    for li, p in enumerate(params):
        plo = p["plo"][None, :, None]                              # (1, GK, 1)
        phi = p["phi"][None, :, None]
        t = (jnp.maximum(x[:, None, :] - plo, 0.0)
             * jnp.maximum(phi - x[:, None, :], 0.0) * R)
        t = t * t                                                  # (B, GK, I)
        x = jnp.einsum("bji,jio->bo", t, p["w_ref"]) + p["b_ref"]
        if li == n - 1:
            x = jax.nn.softmax(x, axis=-1)
    return x


if __name__ == "__main__":
    key = jax.random.PRNGKey(0)
    params, key = init_params(key)
    key, kx = jax.random.split(key)
    x = jax.random.uniform(kx, (8, 1, 28, 28), dtype=jnp.float32)  # MNIST-like NCHW

    out = jax.block_until_ready(relukan_mnist_forward(x, params))
    ref = jax.block_until_ready(relukan_mnist_reference(x, params))

    assert out.shape == (8, 10), out.shape
    assert bool(jnp.all(jnp.isfinite(out)))
    np.testing.assert_allclose(np.asarray(out), np.asarray(ref), atol=2e-2, rtol=2e-2)
    np.testing.assert_allclose(np.asarray(out).sum(-1), 1.0, atol=3e-3)
    print("KERNEL_OK")
</pallas_src>

<mosaic_0001>
module attributes {stable_mosaic.version = 11 : i64} {
  func.func @_fused_kernel(%arg0: i32, %arg1: memref<16x896xf32, #tpu.memory_space<vmem>>, %arg2: memref<8xf32, #tpu.memory_space<smem>>, %arg3: memref<8xf32, #tpu.memory_space<smem>>, %arg4: memref<7168x128xbf16, #tpu.memory_space<vmem>>, %arg5: memref<1x128xf32, #tpu.memory_space<vmem>>, %arg6: memref<8xf32, #tpu.memory_space<smem>>, %arg7: memref<8xf32, #tpu.memory_space<smem>>, %arg8: memref<1024x128xbf16, #tpu.memory_space<vmem>>, %arg9: memref<1x128xf32, #tpu.memory_space<vmem>>, %arg10: memref<8xf32, #tpu.memory_space<smem>>, %arg11: memref<8xf32, #tpu.memory_space<smem>>, %arg12: memref<1024x128xbf16, #tpu.memory_space<vmem>>, %arg13: memref<1x128xf32, #tpu.memory_space<vmem>>, %arg14: memref<16x128xf32, #tpu.memory_space<vmem>>, %arg15: memref<16x7168xbf16, #tpu.memory_space<vmem>>, %arg16: memref<16x1024xbf16, #tpu.memory_space<vmem>>) attributes {dimension_semantics = [#tpu.dimension_semantics<parallel>], iteration_bounds = array<i64: 1>, scalar_prefetch = 0 : i64, scratch_operands = 2 : i64, tpu.core_type = #tpu.core_type<tc>, window_params = [{transform_indices = @transform_0, window_bounds = array<i64: 16, 896>}, {transform_indices = @transform_1, window_bounds = array<i64: 8>}, {transform_indices = @transform_2, window_bounds = array<i64: 8>}, {pipeline_mode = #tpu.pipeline_mode<synchronous>, transform_indices = @transform_3, window_bounds = array<i64: 7168, 128>}, {pipeline_mode = #tpu.pipeline_mode<synchronous>, transform_indices = @transform_4, window_bounds = array<i64: 1, 128>}, {transform_indices = @transform_5, window_bounds = array<i64: 8>}, {transform_indices = @transform_6, window_bounds = array<i64: 8>}, {pipeline_mode = #tpu.pipeline_mode<synchronous>, transform_indices = @transform_7, window_bounds = array<i64: 1024, 128>}, {pipeline_mode = #tpu.pipeline_mode<synchronous>, transform_indices = @transform_8, window_bounds = array<i64: 1, 128>}, {transform_indices = @transform_9, window_bounds = array<i64: 8>}, {transform_indices = @transform_10, window_bounds = array<i64: 8>}, {pipeline_mode = #tpu.pipeline_mode<synchronous>, transform_indices = @transform_11, window_bounds = array<i64: 1024, 128>}, {pipeline_mode = #tpu.pipeline_mode<synchronous>, transform_indices = @transform_12, window_bounds = array<i64: 1, 128>}, {transform_indices = @transform_13, window_bounds = array<i64: 16, 128>}]} {
    %c0 = arith.constant 0 : index
    %c0_0 = arith.constant 0 : index
    %0 = vector.load %arg1[%c0, %c0_0] : memref<16x896xf32, #tpu.memory_space<vmem>>, vector<16x896xf32>
    %c0_1 = arith.constant 0 : index
    %1 = memref.load %arg2[%c0_1] : memref<8xf32, #tpu.memory_space<smem>>
    %c0_2 = arith.constant 0 : index
    %2 = memref.load %arg3[%c0_2] : memref<8xf32, #tpu.memory_space<smem>>
    %3 = vector.broadcast %1 : f32 to vector<16x896xf32>
    %4 = arith.subf %0, %3 : vector<16x896xf32>
    %cst = arith.constant 0.000000e+00 : f32
    %5 = vector.broadcast %cst : f32 to vector<16x896xf32>
    %6 = arith.maximumf %4, %5 : vector<16x896xf32>
    %7 = vector.broadcast %2 : f32 to vector<16x896xf32>
    %8 = arith.subf %7, %0 : vector<16x896xf32>
    %cst_3 = arith.constant 0.000000e+00 : f32
    %9 = vector.broadcast %cst_3 : f32 to vector<16x896xf32>
    %10 = arith.maximumf %8, %9 : vector<16x896xf32>
    %11 = arith.mulf %6, %10 : vector<16x896xf32>
    %12 = arith.mulf %11, %11 : vector<16x896xf32>
    %13 = arith.truncf %12 : vector<16x896xf32> to vector<16x896xbf16>
    %c0_4 = arith.constant 0 : index
    %c0_5 = arith.constant 0 : index
    %14 = vector.load %arg15[%c0_4, %c0_5] : memref<16x7168xbf16, #tpu.memory_space<vmem>>, vector<16x896xbf16>
    tpu.vector_store %arg15[%c0_4, %c0_5], %13 {strides = array<i32>} : memref<16x7168xbf16, #tpu.memory_space<vmem>>, vector<16x896xbf16>,
    %c1 = arith.constant 1 : index
    %15 = memref.load %arg2[%c1] : memref<8xf32, #tpu.memory_space<smem>>
    %c1_6 = arith.constant 1 : index
    %16 = memref.load %arg3[%c1_6] : memref<8xf32, #tpu.memory_space<smem>>
    %17 = vector.broadcast %15 : f32 to vector<16x896xf32>
    %18 = arith.subf %0, %17 : vector<16x896xf32>
    %cst_7 = arith.constant 0.000000e+00 : f32
    %19 = vector.broadcast %cst_7 : f32 to vector<16x896xf32>
    %20 = arith.maximumf %18, %19 : vector<16x896xf32>
    %21 = vector.broadcast %16 : f32 to vector<16x896xf32>
    %22 = arith.subf %21, %0 : vector<16x896xf32>
    %cst_8 = arith.constant 0.000000e+00 : f32
    %23 = vector.broadcast %cst_8 : f32 to vector<16x896xf32>
    %24 = arith.maximumf %22, %23 : vector<16x896xf32>
    %25 = arith.mulf %20, %24 : vector<16x896xf32>
    %26 = arith.mulf %25, %25 : vector<16x896xf32>
    %27 = arith.truncf %26 : vector<16x896xf32> to vector<16x896xbf16>
    %c0_9 = arith.constant 0 : index
    %c896 = arith.constant 896 : index
    %28 = vector.load %arg15[%c0_9, %c896] : memref<16x7168xbf16, #tpu.memory_space<vmem>>, vector<16x896xbf16>
    tpu.vector_store %arg15[%c0_9, %c896], %27 {strides = array<i32>} : memref<16x7168xbf16, #tpu.memory_space<vmem>>, vector<16x896xbf16>,
    %c2 = arith.constant 2 : index
    %29 = memref.load %arg2[%c2] : memref<8xf32, #tpu.memory_space<smem>>
    %c2_10 = arith.constant 2 : index
    %30 = memref.load %arg3[%c2_10] : memref<8xf32, #tpu.memory_space<smem>>
    %31 = vector.broadcast %29 : f32 to vector<16x896xf32>
    %32 = arith.subf %0, %31 : vector<16x896xf32>
    %cst_11 = arith.constant 0.000000e+00 : f32
    %33 = vector.broadcast %cst_11 : f32 to vector<16x896xf32>
    %34 = arith.maximumf %32, %33 : vector<16x896xf32>
    %35 = vector.broadcast %30 : f32 to vector<16x896xf32>
    %36 = arith.subf %35, %0 : vector<16x896xf32>
    %cst_12 = arith.constant 0.000000e+00 : f32
    %37 = vector.broadcast %cst_12 : f32 to vector<16x896xf32>
    %38 = arith.maximumf %36, %37 : vector<16x896xf32>
    %39 = arith.mulf %34, %38 : vector<16x896xf32>
    %40 = arith.mulf %39, %39 : vector<16x896xf32>
    %41 = arith.truncf %40 : vector<16x896xf32> to vector<16x896xbf16>
    %c0_13 = arith.constant 0 : index
    %c1792 = arith.constant 1792 : index
    %42 = vector.load %arg15[%c0_13, %c1792] : memref<16x7168xbf16, #tpu.memory_space<vmem>>, vector<16x896xbf16>
    tpu.vector_store %arg15[%c0_13, %c1792], %41 {strides = array<i32>} : memref<16x7168xbf16, #tpu.memory_space<vmem>>, vector<16x896xbf16>,
    %c3 = arith.constant 3 : index
    %43 = memref.load %arg2[%c3] : memref<8xf32, #tpu.memory_space<smem>>
    %c3_14 = arith.constant 3 : index
    %44 = memref.load %arg3[%c3_14] : memref<8xf32, #tpu.memory_space<smem>>
    %45 = vector.broadcast %43 : f32 to vector<16x896xf32>
    %46 = arith.subf %0, %45 : vector<16x896xf32>
    %cst_15 = arith.constant 0.000000e+00 : f32
    %47 = vector.broadcast %cst_15 : f32 to vector<16x896xf32>
    %48 = arith.maximumf %46, %47 : vector<16x896xf32>
    %49 = vector.broadcast %44 : f32 to vector<16x896xf32>
    %50 = arith.subf %49, %0 : vector<16x896xf32>
    %cst_16 = arith.constant 0.000000e+00 : f32
    %51 = vector.broadcast %cst_16 : f32 to vector<16x896xf32>
    %52 = arith.maximumf %50, %51 : vector<16x896xf32>
    %53 = arith.mulf %48, %52 : vector<16x896xf32>
    %54 = arith.mulf %53, %53 : vector<16x896xf32>
    %55 = arith.truncf %54 : vector<16x896xf32> to vector<16x896xbf16>
    %c0_17 = arith.constant 0 : index
    %c2688 = arith.constant 2688 : index
    %56 = vector.load %arg15[%c0_17, %c2688] : memref<16x7168xbf16, #tpu.memory_space<vmem>>, vector<16x896xbf16>
    tpu.vector_store %arg15[%c0_17, %c2688], %55 {strides = array<i32>} : memref<16x7168xbf16, #tpu.memory_space<vmem>>, vector<16x896xbf16>,
    %c4 = arith.constant 4 : index
    %57 = memref.load %arg2[%c4] : memref<8xf32, #tpu.memory_space<smem>>
    %c4_18 = arith.constant 4 : index
    %58 = memref.load %arg3[%c4_18] : memref<8xf32, #tpu.memory_space<smem>>
    %59 = vector.broadcast %57 : f32 to vector<16x896xf32>
    %60 = arith.subf %0, %59 : vector<16x896xf32>
    %cst_19 = arith.constant 0.000000e+00 : f32
    %61 = vector.broadcast %cst_19 : f32 to vector<16x896xf32>
    %62 = arith.maximumf %60, %61 : vector<16x896xf32>
    %63 = vector.broadcast %58 : f32 to vector<16x896xf32>
    %64 = arith.subf %63, %0 : vector<16x896xf32>
    %cst_20 = arith.constant 0.000000e+00 : f32
    %65 = vector.broadcast %cst_20 : f32 to vector<16x896xf32>
    %66 = arith.maximumf %64, %65 : vector<16x896xf32>
    %67 = arith.mulf %62, %66 : vector<16x896xf32>
    %68 = arith.mulf %67, %67 : vector<16x896xf32>
    %69 = arith.truncf %68 : vector<16x896xf32> to vector<16x896xbf16>
    %c0_21 = arith.constant 0 : index
    %c3584 = arith.constant 3584 : index
    %70 = vector.load %arg15[%c0_21, %c3584] : memref<16x7168xbf16, #tpu.memory_space<vmem>>, vector<16x896xbf16>
    tpu.vector_store %arg15[%c0_21, %c3584], %69 {strides = array<i32>} : memref<16x7168xbf16, #tpu.memory_space<vmem>>, vector<16x896xbf16>,
    %c5 = arith.constant 5 : index
    %71 = memref.load %arg2[%c5] : memref<8xf32, #tpu.memory_space<smem>>
    %c5_22 = arith.constant 5 : index
    %72 = memref.load %arg3[%c5_22] : memref<8xf32, #tpu.memory_space<smem>>
    %73 = vector.broadcast %71 : f32 to vector<16x896xf32>
    %74 = arith.subf %0, %73 : vector<16x896xf32>
    %cst_23 = arith.constant 0.000000e+00 : f32
    %75 = vector.broadcast %cst_23 : f32 to vector<16x896xf32>
    %76 = arith.maximumf %74, %75 : vector<16x896xf32>
    %77 = vector.broadcast %72 : f32 to vector<16x896xf32>
    %78 = arith.subf %77, %0 : vector<16x896xf32>
    %cst_24 = arith.constant 0.000000e+00 : f32
    %79 = vector.broadcast %cst_24 : f32 to vector<16x896xf32>
    %80 = arith.maximumf %78, %79 : vector<16x896xf32>
    %81 = arith.mulf %76, %80 : vector<16x896xf32>
    %82 = arith.mulf %81, %81 : vector<16x896xf32>
    %83 = arith.truncf %82 : vector<16x896xf32> to vector<16x896xbf16>
    %c0_25 = arith.constant 0 : index
    %c4480 = arith.constant 4480 : index
    %84 = vector.load %arg15[%c0_25, %c4480] : memref<16x7168xbf16, #tpu.memory_space<vmem>>, vector<16x896xbf16>
    tpu.vector_store %arg15[%c0_25, %c4480], %83 {strides = array<i32>} : memref<16x7168xbf16, #tpu.memory_space<vmem>>, vector<16x896xbf16>,
    %c6 = arith.constant 6 : index
    %85 = memref.load %arg2[%c6] : memref<8xf32, #tpu.memory_space<smem>>
    %c6_26 = arith.constant 6 : index
    %86 = memref.load %arg3[%c6_26] : memref<8xf32, #tpu.memory_space<smem>>
    %87 = vector.broadcast %85 : f32 to vector<16x896xf32>
    %88 = arith.subf %0, %87 : vector<16x896xf32>
    %cst_27 = arith.constant 0.000000e+00 : f32
    %89 = vector.broadcast %cst_27 : f32 to vector<16x896xf32>
    %90 = arith.maximumf %88, %89 : vector<16x896xf32>
    %91 = vector.broadcast %86 : f32 to vector<16x896xf32>
    %92 = arith.subf %91, %0 : vector<16x896xf32>
    %cst_28 = arith.constant 0.000000e+00 : f32
    %93 = vector.broadcast %cst_28 : f32 to vector<16x896xf32>
    %94 = arith.maximumf %92, %93 : vector<16x896xf32>
    %95 = arith.mulf %90, %94 : vector<16x896xf32>
    %96 = arith.mulf %95, %95 : vector<16x896xf32>
    %97 = arith.truncf %96 : vector<16x896xf32> to vector<16x896xbf16>
    %c0_29 = arith.constant 0 : index
    %c5376 = arith.constant 5376 : index
    %98 = vector.load %arg15[%c0_29, %c5376] : memref<16x7168xbf16, #tpu.memory_space<vmem>>, vector<16x896xbf16>
    tpu.vector_store %arg15[%c0_29, %c5376], %97 {strides = array<i32>} : memref<16x7168xbf16, #tpu.memory_space<vmem>>, vector<16x896xbf16>,
    %c7 = arith.constant 7 : index
    %99 = memref.load %arg2[%c7] : memref<8xf32, #tpu.memory_space<smem>>
    %c7_30 = arith.constant 7 : index
    %100 = memref.load %arg3[%c7_30] : memref<8xf32, #tpu.memory_space<smem>>
    %101 = vector.broadcast %99 : f32 to vector<16x896xf32>
    %102 = arith.subf %0, %101 : vector<16x896xf32>
    %cst_31 = arith.constant 0.000000e+00 : f32
    %103 = vector.broadcast %cst_31 : f32 to vector<16x896xf32>
    %104 = arith.maximumf %102, %103 : vector<16x896xf32>
    %105 = vector.broadcast %100 : f32 to vector<16x896xf32>
    %106 = arith.subf %105, %0 : vector<16x896xf32>
    %cst_32 = arith.constant 0.000000e+00 : f32
    %107 = vector.broadcast %cst_32 : f32 to vector<16x896xf32>
    %108 = arith.maximumf %106, %107 : vector<16x896xf32>
    %109 = arith.mulf %104, %108 : vector<16x896xf32>
    %110 = arith.mulf %109, %109 : vector<16x896xf32>
    %111 = arith.truncf %110 : vector<16x896xf32> to vector<16x896xbf16>
    %c0_33 = arith.constant 0 : index
    %c6272 = arith.constant 6272 : index
    %112 = vector.load %arg15[%c0_33, %c6272] : memref<16x7168xbf16, #tpu.memory_space<vmem>>, vector<16x896xbf16>
    tpu.vector_store %arg15[%c0_33, %c6272], %111 {strides = array<i32>} : memref<16x7168xbf16, #tpu.memory_space<vmem>>, vector<16x896xbf16>,
    %c0_34 = arith.constant 0 : index
    %c0_35 = arith.constant 0 : index
    %113 = vector.load %arg15[%c0_34, %c0_35] : memref<16x7168xbf16, #tpu.memory_space<vmem>>, vector<16x7168xbf16>
    %c0_36 = arith.constant 0 : index
    %c0_37 = arith.constant 0 : index
    %114 = vector.load %arg4[%c0_36, %c0_37] : memref<7168x128xbf16, #tpu.memory_space<vmem>>, vector<7168x128xbf16>
    %cst_38 = arith.constant dense<0.000000e+00> : vector<16x128xf32>
    %115 = tpu.matmul %113, %114, %cst_38 {dimension_numbers = #tpu.dot_dimension_numbers<[1], [0], [0], [1], [0, 0, 1, 1], [], []>} : vector<16x7168xbf16>, vector<7168x128xbf16>, vector<16x128xf32> -> vector<16x128xf32>
    %c0_39 = arith.constant 0 : index
    %c0_40 = arith.constant 0 : index
    %116 = vector.load %arg5[%c0_39, %c0_40] : memref<1x128xf32, #tpu.memory_space<vmem>>, vector<1x128xf32>
    %117 = vector.broadcast %116 : vector<1x128xf32> to vector<16x128xf32>
    %118 = arith.addf %115, %117 : vector<16x128xf32>
    %c0_41 = arith.constant 0 : index
    %119 = memref.load %arg6[%c0_41] : memref<8xf32, #tpu.memory_space<smem>>
    %c0_42 = arith.constant 0 : index
    %120 = memref.load %arg7[%c0_42] : memref<8xf32, #tpu.memory_space<smem>>
    %121 = vector.broadcast %119 : f32 to vector<16x128xf32>
    %122 = arith.subf %118, %121 : vector<16x128xf32>
    %cst_43 = arith.constant 0.000000e+00 : f32
    %123 = vector.broadcast %cst_43 : f32 to vector<16x128xf32>
    %124 = arith.maximumf %122, %123 : vector<16x128xf32>
    %125 = vector.broadcast %120 : f32 to vector<16x128xf32>
    %126 = arith.subf %125, %118 : vector<16x128xf32>
    %cst_44 = arith.constant 0.000000e+00 : f32
    %127 = vector.broadcast %cst_44 : f32 to vector<16x128xf32>
    %128 = arith.maximumf %126, %127 : vector<16x128xf32>
    %129 = arith.mulf %124, %128 : vector<16x128xf32>
    %130 = arith.mulf %129, %129 : vector<16x128xf32>
    %131 = arith.truncf %130 : vector<16x128xf32> to vector<16x128xbf16>
    %c0_45 = arith.constant 0 : index
    %c0_46 = arith.constant 0 : index
    %132 = vector.load %arg16[%c0_45, %c0_46] : memref<16x1024xbf16, #tpu.memory_space<vmem>>, vector<16x128xbf16>
    tpu.vector_store %arg16[%c0_45, %c0_46], %131 {strides = array<i32>} : memref<16x1024xbf16, #tpu.memory_space<vmem>>, vector<16x128xbf16>,
    %c1_47 = arith.constant 1 : index
    %133 = memref.load %arg6[%c1_47] : memref<8xf32, #tpu.memory_space<smem>>
    %c1_48 = arith.constant 1 : index
    %134 = memref.load %arg7[%c1_48] : memref<8xf32, #tpu.memory_space<smem>>
    %135 = vector.broadcast %133 : f32 to vector<16x128xf32>
    %136 = arith.subf %118, %135 : vector<16x128xf32>
    %cst_49 = arith.constant 0.000000e+00 : f32
    %137 = vector.broadcast %cst_49 : f32 to vector<16x128xf32>
    %138 = arith.maximumf %136, %137 : vector<16x128xf32>
    %139 = vector.broadcast %134 : f32 to vector<16x128xf32>
    %140 = arith.subf %139, %118 : vector<16x128xf32>
    %cst_50 = arith.constant 0.000000e+00 : f32
    %141 = vector.broadcast %cst_50 : f32 to vector<16x128xf32>
    %142 = arith.maximumf %140, %141 : vector<16x128xf32>
    %143 = arith.mulf %138, %142 : vector<16x128xf32>
    %144 = arith.mulf %143, %143 : vector<16x128xf32>
    %145 = arith.truncf %144 : vector<16x128xf32> to vector<16x128xbf16>
    %c0_51 = arith.constant 0 : index
    %c128 = arith.constant 128 : index
    %146 = vector.load %arg16[%c0_51, %c128] : memref<16x1024xbf16, #tpu.memory_space<vmem>>, vector<16x128xbf16>
    tpu.vector_store %arg16[%c0_51, %c128], %145 {strides = array<i32>} : memref<16x1024xbf16, #tpu.memory_space<vmem>>, vector<16x128xbf16>,
    %c2_52 = arith.constant 2 : index
    %147 = memref.load %arg6[%c2_52] : memref<8xf32, #tpu.memory_space<smem>>
    %c2_53 = arith.constant 2 : index
    %148 = memref.load %arg7[%c2_53] : memref<8xf32, #tpu.memory_space<smem>>
    %149 = vector.broadcast %147 : f32 to vector<16x128xf32>
    %150 = arith.subf %118, %149 : vector<16x128xf32>
    %cst_54 = arith.constant 0.000000e+00 : f32
    %151 = vector.broadcast %cst_54 : f32 to vector<16x128xf32>
    %152 = arith.maximumf %150, %151 : vector<16x128xf32>
    %153 = vector.broadcast %148 : f32 to vector<16x128xf32>
    %154 = arith.subf %153, %118 : vector<16x128xf32>
    %cst_55 = arith.constant 0.000000e+00 : f32
    %155 = vector.broadcast %cst_55 : f32 to vector<16x128xf32>
    %156 = arith.maximumf %154, %155 : vector<16x128xf32>
    %157 = arith.mulf %152, %156 : vector<16x128xf32>
    %158 = arith.mulf %157, %157 : vector<16x128xf32>
    %159 = arith.truncf %158 : vector<16x128xf32> to vector<16x128xbf16>
    %c0_56 = arith.constant 0 : index
    %c256 = arith.constant 256 : index
    %160 = vector.load %arg16[%c0_56, %c256] : memref<16x1024xbf16, #tpu.memory_space<vmem>>, vector<16x128xbf16>
    tpu.vector_store %arg16[%c0_56, %c256], %159 {strides = array<i32>} : memref<16x1024xbf16, #tpu.memory_space<vmem>>, vector<16x128xbf16>,
    %c3_57 = arith.constant 3 : index
    %161 = memref.load %arg6[%c3_57] : memref<8xf32, #tpu.memory_space<smem>>
    %c3_58 = arith.constant 3 : index
    %162 = memref.load %arg7[%c3_58] : memref<8xf32, #tpu.memory_space<smem>>
    %163 = vector.broadcast %161 : f32 to vector<16x128xf32>
    %164 = arith.subf %118, %163 : vector<16x128xf32>
    %cst_59 = arith.constant 0.000000e+00 : f32
    %165 = vector.broadcast %cst_59 : f32 to vector<16x128xf32>
    %166 = arith.maximumf %164, %165 : vector<16x128xf32>
    %167 = vector.broadcast %162 : f32 to vector<16x128xf32>
    %168 = arith.subf %167, %118 : vector<16x128xf32>
    %cst_60 = arith.constant 0.000000e+00 : f32
    %169 = vector.broadcast %cst_60 : f32 to vector<16x128xf32>
    %170 = arith.maximumf %168, %169 : vector<16x128xf32>
    %171 = arith.mulf %166, %170 : vector<16x128xf32>
    %172 = arith.mulf %171, %171 : vector<16x128xf32>
    %173 = arith.truncf %172 : vector<16x128xf32> to vector<16x128xbf16>
    %c0_61 = arith.constant 0 : index
    %c384 = arith.constant 384 : index
    %174 = vector.load %arg16[%c0_61, %c384] : memref<16x1024xbf16, #tpu.memory_space<vmem>>, vector<16x128xbf16>
    tpu.vector_store %arg16[%c0_61, %c384], %173 {strides = array<i32>} : memref<16x1024xbf16, #tpu.memory_space<vmem>>, vector<16x128xbf16>,
    %c4_62 = arith.constant 4 : index
    %175 = memref.load %arg6[%c4_62] : memref<8xf32, #tpu.memory_space<smem>>
    %c4_63 = arith.constant 4 : index
    %176 = memref.load %arg7[%c4_63] : memref<8xf32, #tpu.memory_space<smem>>
    %177 = vector.broadcast %175 : f32 to vector<16x128xf32>
    %178 = arith.subf %118, %177 : vector<16x128xf32>
    %cst_64 = arith.constant 0.000000e+00 : f32
    %179 = vector.broadcast %cst_64 : f32 to vector<16x128xf32>
    %180 = arith.maximumf %178, %179 : vector<16x128xf32>
    %181 = vector.broadcast %176 : f32 to vector<16x128xf32>
    %182 = arith.subf %181, %118 : vector<16x128xf32>
    %cst_65 = arith.constant 0.000000e+00 : f32
    %183 = vector.broadcast %cst_65 : f32 to vector<16x128xf32>
    %184 = arith.maximumf %182, %183 : vector<16x128xf32>
    %185 = arith.mulf %180, %184 : vector<16x128xf32>
    %186 = arith.mulf %185, %185 : vector<16x128xf32>
    %187 = arith.truncf %186 : vector<16x128xf32> to vector<16x128xbf16>
    %c0_66 = arith.constant 0 : index
    %c512 = arith.constant 512 : index
    %188 = vector.load %arg16[%c0_66, %c512] : memref<16x1024xbf16, #tpu.memory_space<vmem>>, vector<16x128xbf16>
    tpu.vector_store %arg16[%c0_66, %c512], %187 {strides = array<i32>} : memref<16x1024xbf16, #tpu.memory_space<vmem>>, vector<16x128xbf16>,
    %c5_67 = arith.constant 5 : index
    %189 = memref.load %arg6[%c5_67] : memref<8xf32, #tpu.memory_space<smem>>
    %c5_68 = arith.constant 5 : index
    %190 = memref.load %arg7[%c5_68] : memref<8xf32, #tpu.memory_space<smem>>
    %191 = vector.broadcast %189 : f32 to vector<16x128xf32>
    %192 = arith.subf %118, %191 : vector<16x128xf32>
    %cst_69 = arith.constant 0.000000e+00 : f32
    %193 = vector.broadcast %cst_69 : f32 to vector<16x128xf32>
    %194 = arith.maximumf %192, %193 : vector<16x128xf32>
    %195 = vector.broadcast %190 : f32 to vector<16x128xf32>
    %196 = arith.subf %195, %118 : vector<16x128xf32>
    %cst_70 = arith.constant 0.000000e+00 : f32
    %197 = vector.broadcast %cst_70 : f32 to vector<16x128xf32>
    %198 = arith.maximumf %196, %197 : vector<16x128xf32>
    %199 = arith.mulf %194, %198 : vector<16x128xf32>
    %200 = arith.mulf %199, %199 : vector<16x128xf32>
    %201 = arith.truncf %200 : vector<16x128xf32> to vector<16x128xbf16>
    %c0_71 = arith.constant 0 : index
    %c640 = arith.constant 640 : index
    %202 = vector.load %arg16[%c0_71, %c640] : memref<16x1024xbf16, #tpu.memory_space<vmem>>, vector<16x128xbf16>
    tpu.vector_store %arg16[%c0_71, %c640], %201 {strides = array<i32>} : memref<16x1024xbf16, #tpu.memory_space<vmem>>, vector<16x128xbf16>,
    %c6_72 = arith.constant 6 : index
    %203 = memref.load %arg6[%c6_72] : memref<8xf32, #tpu.memory_space<smem>>
    %c6_73 = arith.constant 6 : index
    %204 = memref.load %arg7[%c6_73] : memref<8xf32, #tpu.memory_space<smem>>
    %205 = vector.broadcast %203 : f32 to vector<16x128xf32>
    %206 = arith.subf %118, %205 : vector<16x128xf32>
    %cst_74 = arith.constant 0.000000e+00 : f32
    %207 = vector.broadcast %cst_74 : f32 to vector<16x128xf32>
    %208 = arith.maximumf %206, %207 : vector<16x128xf32>
    %209 = vector.broadcast %204 : f32 to vector<16x128xf32>
    %210 = arith.subf %209, %118 : vector<16x128xf32>
    %cst_75 = arith.constant 0.000000e+00 : f32
    %211 = vector.broadcast %cst_75 : f32 to vector<16x128xf32>
    %212 = arith.maximumf %210, %211 : vector<16x128xf32>
    %213 = arith.mulf %208, %212 : vector<16x128xf32>
    %214 = arith.mulf %213, %213 : vector<16x128xf32>
    %215 = arith.truncf %214 : vector<16x128xf32> to vector<16x128xbf16>
    %c0_76 = arith.constant 0 : index
    %c768 = arith.constant 768 : index
    %216 = vector.load %arg16[%c0_76, %c768] : memref<16x1024xbf16, #tpu.memory_space<vmem>>, vector<16x128xbf16>
    tpu.vector_store %arg16[%c0_76, %c768], %215 {strides = array<i32>} : memref<16x1024xbf16, #tpu.memory_space<vmem>>, vector<16x128xbf16>,
    %c7_77 = arith.constant 7 : index
    %217 = memref.load %arg6[%c7_77] : memref<8xf32, #tpu.memory_space<smem>>
    %c7_78 = arith.constant 7 : index
    %218 = memref.load %arg7[%c7_78] : memref<8xf32, #tpu.memory_space<smem>>
    %219 = vector.broadcast %217 : f32 to vector<16x128xf32>
    %220 = arith.subf %118, %219 : vector<16x128xf32>
    %cst_79 = arith.constant 0.000000e+00 : f32
    %221 = vector.broadcast %cst_79 : f32 to vector<16x128xf32>
    %222 = arith.maximumf %220, %221 : vector<16x128xf32>
    %223 = vector.broadcast %218 : f32 to vector<16x128xf32>
    %224 = arith.subf %223, %118 : vector<16x128xf32>
    %cst_80 = arith.constant 0.000000e+00 : f32
    %225 = vector.broadcast %cst_80 : f32 to vector<16x128xf32>
    %226 = arith.maximumf %224, %225 : vector<16x128xf32>
    %227 = arith.mulf %222, %226 : vector<16x128xf32>
    %228 = arith.mulf %227, %227 : vector<16x128xf32>
    %229 = arith.truncf %228 : vector<16x128xf32> to vector<16x128xbf16>
    %c0_81 = arith.constant 0 : index
    %c896_82 = arith.constant 896 : index
    %230 = vector.load %arg16[%c0_81, %c896_82] : memref<16x1024xbf16, #tpu.memory_space<vmem>>, vector<16x128xbf16>
    tpu.vector_store %arg16[%c0_81, %c896_82], %229 {strides = array<i32>} : memref<16x1024xbf16, #tpu.memory_space<vmem>>, vector<16x128xbf16>,
    %c0_83 = arith.constant 0 : index
    %c0_84 = arith.constant 0 : index
    %231 = vector.load %arg16[%c0_83, %c0_84] : memref<16x1024xbf16, #tpu.memory_space<vmem>>, vector<16x1024xbf16>
    %c0_85 = arith.constant 0 : index
    %c0_86 = arith.constant 0 : index
    %232 = vector.load %arg8[%c0_85, %c0_86] : memref<1024x128xbf16, #tpu.memory_space<vmem>>, vector<1024x128xbf16>
    %cst_87 = arith.constant dense<0.000000e+00> : vector<16x128xf32>
    %233 = tpu.matmul %231, %232, %cst_87 {dimension_numbers = #tpu.dot_dimension_numbers<[1], [0], [0], [1], [0, 0, 1, 1], [], []>} : vector<16x1024xbf16>, vector<1024x128xbf16>, vector<16x128xf32> -> vector<16x128xf32>
    %c0_88 = arith.constant 0 : index
    %c0_89 = arith.constant 0 : index
    %234 = vector.load %arg9[%c0_88, %c0_89] : memref<1x128xf32, #tpu.memory_space<vmem>>, vector<1x128xf32>
    %235 = vector.broadcast %234 : vector<1x128xf32> to vector<16x128xf32>
    %236 = arith.addf %233, %235 : vector<16x128xf32>
    %c0_90 = arith.constant 0 : index
    %237 = memref.load %arg10[%c0_90] : memref<8xf32, #tpu.memory_space<smem>>
    %c0_91 = arith.constant 0 : index
    %238 = memref.load %arg11[%c0_91] : memref<8xf32, #tpu.memory_space<smem>>
    %239 = vector.broadcast %237 : f32 to vector<16x128xf32>
    %240 = arith.subf %236, %239 : vector<16x128xf32>
    %cst_92 = arith.constant 0.000000e+00 : f32
    %241 = vector.broadcast %cst_92 : f32 to vector<16x128xf32>
    %242 = arith.maximumf %240, %241 : vector<16x128xf32>
    %243 = vector.broadcast %238 : f32 to vector<16x128xf32>
    %244 = arith.subf %243, %236 : vector<16x128xf32>
    %cst_93 = arith.constant 0.000000e+00 : f32
    %245 = vector.broadcast %cst_93 : f32 to vector<16x128xf32>
    %246 = arith.maximumf %244, %245 : vector<16x128xf32>
    %247 = arith.mulf %242, %246 : vector<16x128xf32>
    %248 = arith.mulf %247, %247 : vector<16x128xf32>
    %249 = arith.truncf %248 : vector<16x128xf32> to vector<16x128xbf16>
    %c0_94 = arith.constant 0 : index
    %c0_95 = arith.constant 0 : index
    %250 = vector.load %arg16[%c0_94, %c0_95] : memref<16x1024xbf16, #tpu.memory_space<vmem>>, vector<16x128xbf16>
    tpu.vector_store %arg16[%c0_94, %c0_95], %249 {strides = array<i32>} : memref<16x1024xbf16, #tpu.memory_space<vmem>>, vector<16x128xbf16>,
    %c1_96 = arith.constant 1 : index
    %251 = memref.load %arg10[%c1_96] : memref<8xf32, #tpu.memory_space<smem>>
    %c1_97 = arith.constant 1 : index
    %252 = memref.load %arg11[%c1_97] : memref<8xf32, #tpu.memory_space<smem>>
    %253 = vector.broadcast %251 : f32 to vector<16x128xf32>
    %254 = arith.subf %236, %253 : vector<16x128xf32>
    %cst_98 = arith.constant 0.000000e+00 : f32
    %255 = vector.broadcast %cst_98 : f32 to vector<16x128xf32>
    %256 = arith.maximumf %254, %255 : vector<16x128xf32>
    %257 = vector.broadcast %252 : f32 to vector<16x128xf32>
    %258 = arith.subf %257, %236 : vector<16x128xf32>
    %cst_99 = arith.constant 0.000000e+00 : f32
    %259 = vector.broadcast %cst_99 : f32 to vector<16x128xf32>
    %260 = arith.maximumf %258, %259 : vector<16x128xf32>
    %261 = arith.mulf %256, %260 : vector<16x128xf32>
    %262 = arith.mulf %261, %261 : vector<16x128xf32>
    %263 = arith.truncf %262 : vector<16x128xf32> to vector<16x128xbf16>
    %c0_100 = arith.constant 0 : index
    %c128_101 = arith.constant 128 : index
    %264 = vector.load %arg16[%c0_100, %c128_101] : memref<16x1024xbf16, #tpu.memory_space<vmem>>, vector<16x128xbf16>
    tpu.vector_store %arg16[%c0_100, %c128_101], %263 {strides = array<i32>} : memref<16x1024xbf16, #tpu.memory_space<vmem>>, vector<16x128xbf16>,
    %c2_102 = arith.constant 2 : index
    %265 = memref.load %arg10[%c2_102] : memref<8xf32, #tpu.memory_space<smem>>
    %c2_103 = arith.constant 2 : index
    %266 = memref.load %arg11[%c2_103] : memref<8xf32, #tpu.memory_space<smem>>
    %267 = vector.broadcast %265 : f32 to vector<16x128xf32>
    %268 = arith.subf %236, %267 : vector<16x128xf32>
    %cst_104 = arith.constant 0.000000e+00 : f32
    %269 = vector.broadcast %cst_104 : f32 to vector<16x128xf32>
    %270 = arith.maximumf %268, %269 : vector<16x128xf32>
    %271 = vector.broadcast %266 : f32 to vector<16x128xf32>
    %272 = arith.subf %271, %236 : vector<16x128xf32>
    %cst_105 = arith.constant 0.000000e+00 : f32
    %273 = vector.broadcast %cst_105 : f32 to vector<16x128xf32>
    %274 = arith.maximumf %272, %273 : vector<16x128xf32>
    %275 = arith.mulf %270, %274 : vector<16x128xf32>
    %276 = arith.mulf %275, %275 : vector<16x128xf32>
    %277 = arith.truncf %276 : vector<16x128xf32> to vector<16x128xbf16>
    %c0_106 = arith.constant 0 : index
    %c256_107 = arith.constant 256 : index
    %278 = vector.load %arg16[%c0_106, %c256_107] : memref<16x1024xbf16, #tpu.memory_space<vmem>>, vector<16x128xbf16>
    tpu.vector_store %arg16[%c0_106, %c256_107], %277 {strides = array<i32>} : memref<16x1024xbf16, #tpu.memory_space<vmem>>, vector<16x128xbf16>,
    %c3_108 = arith.constant 3 : index
    %279 = memref.load %arg10[%c3_108] : memref<8xf32, #tpu.memory_space<smem>>
    %c3_109 = arith.constant 3 : index
    %280 = memref.load %arg11[%c3_109] : memref<8xf32, #tpu.memory_space<smem>>
    %281 = vector.broadcast %279 : f32 to vector<16x128xf32>
    %282 = arith.subf %236, %281 : vector<16x128xf32>
    %cst_110 = arith.constant 0.000000e+00 : f32
    %283 = vector.broadcast %cst_110 : f32 to vector<16x128xf32>
    %284 = arith.maximumf %282, %283 : vector<16x128xf32>
    %285 = vector.broadcast %280 : f32 to vector<16x128xf32>
    %286 = arith.subf %285, %236 : vector<16x128xf32>
    %cst_111 = arith.constant 0.000000e+00 : f32
    %287 = vector.broadcast %cst_111 : f32 to vector<16x128xf32>
    %288 = arith.maximumf %286, %287 : vector<16x128xf32>
    %289 = arith.mulf %284, %288 : vector<16x128xf32>
    %290 = arith.mulf %289, %289 : vector<16x128xf32>
    %291 = arith.truncf %290 : vector<16x128xf32> to vector<16x128xbf16>
    %c0_112 = arith.constant 0 : index
    %c384_113 = arith.constant 384 : index
    %292 = vector.load %arg16[%c0_112, %c384_113] : memref<16x1024xbf16, #tpu.memory_space<vmem>>, vector<16x128xbf16>
    tpu.vector_store %arg16[%c0_112, %c384_113], %291 {strides = array<i32>} : memref<16x1024xbf16, #tpu.memory_space<vmem>>, vector<16x128xbf16>,
    %c4_114 = arith.constant 4 : index
    %293 = memref.load %arg10[%c4_114] : memref<8xf32, #tpu.memory_space<smem>>
    %c4_115 = arith.constant 4 : index
    %294 = memref.load %arg11[%c4_115] : memref<8xf32, #tpu.memory_space<smem>>
    %295 = vector.broadcast %293 : f32 to vector<16x128xf32>
    %296 = arith.subf %236, %295 : vector<16x128xf32>
    %cst_116 = arith.constant 0.000000e+00 : f32
    %297 = vector.broadcast %cst_116 : f32 to vector<16x128xf32>
    %298 = arith.maximumf %296, %297 : vector<16x128xf32>
    %299 = vector.broadcast %294 : f32 to vector<16x128xf32>
    %300 = arith.subf %299, %236 : vector<16x128xf32>
    %cst_117 = arith.constant 0.000000e+00 : f32
    %301 = vector.broadcast %cst_117 : f32 to vector<16x128xf32>
    %302 = arith.maximumf %300, %301 : vector<16x128xf32>
    %303 = arith.mulf %298, %302 : vector<16x128xf32>
    %304 = arith.mulf %303, %303 : vector<16x128xf32>
    %305 = arith.truncf %304 : vector<16x128xf32> to vector<16x128xbf16>
    %c0_118 = arith.constant 0 : index
    %c512_119 = arith.constant 512 : index
    %306 = vector.load %arg16[%c0_118, %c512_119] : memref<16x1024xbf16, #tpu.memory_space<vmem>>, vector<16x128xbf16>
    tpu.vector_store %arg16[%c0_118, %c512_119], %305 {strides = array<i32>} : memref<16x1024xbf16, #tpu.memory_space<vmem>>, vector<16x128xbf16>,
    %c5_120 = arith.constant 5 : index
    %307 = memref.load %arg10[%c5_120] : memref<8xf32, #tpu.memory_space<smem>>
    %c5_121 = arith.constant 5 : index
    %308 = memref.load %arg11[%c5_121] : memref<8xf32, #tpu.memory_space<smem>>
    %309 = vector.broadcast %307 : f32 to vector<16x128xf32>
    %310 = arith.subf %236, %309 : vector<16x128xf32>
    %cst_122 = arith.constant 0.000000e+00 : f32
    %311 = vector.broadcast %cst_122 : f32 to vector<16x128xf32>
    %312 = arith.maximumf %310, %311 : vector<16x128xf32>
    %313 = vector.broadcast %308 : f32 to vector<16x128xf32>
    %314 = arith.subf %313, %236 : vector<16x128xf32>
    %cst_123 = arith.constant 0.000000e+00 : f32
    %315 = vector.broadcast %cst_123 : f32 to vector<16x128xf32>
    %316 = arith.maximumf %314, %315 : vector<16x128xf32>
    %317 = arith.mulf %312, %316 : vector<16x128xf32>
    %318 = arith.mulf %317, %317 : vector<16x128xf32>
    %319 = arith.truncf %318 : vector<16x128xf32> to vector<16x128xbf16>
    %c0_124 = arith.constant 0 : index
    %c640_125 = arith.constant 640 : index
    %320 = vector.load %arg16[%c0_124, %c640_125] : memref<16x1024xbf16, #tpu.memory_space<vmem>>, vector<16x128xbf16>
    tpu.vector_store %arg16[%c0_124, %c640_125], %319 {strides = array<i32>} : memref<16x1024xbf16, #tpu.memory_space<vmem>>, vector<16x128xbf16>,
    %c6_126 = arith.constant 6 : index
    %321 = memref.load %arg10[%c6_126] : memref<8xf32, #tpu.memory_space<smem>>
    %c6_127 = arith.constant 6 : index
    %322 = memref.load %arg11[%c6_127] : memref<8xf32, #tpu.memory_space<smem>>
    %323 = vector.broadcast %321 : f32 to vector<16x128xf32>
    %324 = arith.subf %236, %323 : vector<16x128xf32>
    %cst_128 = arith.constant 0.000000e+00 : f32
    %325 = vector.broadcast %cst_128 : f32 to vector<16x128xf32>
    %326 = arith.maximumf %324, %325 : vector<16x128xf32>
    %327 = vector.broadcast %322 : f32 to vector<16x128xf32>
    %328 = arith.subf %327, %236 : vector<16x128xf32>
    %cst_129 = arith.constant 0.000000e+00 : f32
    %329 = vector.broadcast %cst_129 : f32 to vector<16x128xf32>
    %330 = arith.maximumf %328, %329 : vector<16x128xf32>
    %331 = arith.mulf %326, %330 : vector<16x128xf32>
    %332 = arith.mulf %331, %331 : vector<16x128xf32>
    %333 = arith.truncf %332 : vector<16x128xf32> to vector<16x128xbf16>
    %c0_130 = arith.constant 0 : index
    %c768_131 = arith.constant 768 : index
    %334 = vector.load %arg16[%c0_130, %c768_131] : memref<16x1024xbf16, #tpu.memory_space<vmem>>, vector<16x128xbf16>
    tpu.vector_store %arg16[%c0_130, %c768_131], %333 {strides = array<i32>} : memref<16x1024xbf16, #tpu.memory_space<vmem>>, vector<16x128xbf16>,
    %c7_132 = arith.constant 7 : index
    %335 = memref.load %arg10[%c7_132] : memref<8xf32, #tpu.memory_space<smem>>
    %c7_133 = arith.constant 7 : index
    %336 = memref.load %arg11[%c7_133] : memref<8xf32, #tpu.memory_space<smem>>
    %337 = vector.broadcast %335 : f32 to vector<16x128xf32>
    %338 = arith.subf %236, %337 : vector<16x128xf32>
    %cst_134 = arith.constant 0.000000e+00 : f32
    %339 = vector.broadcast %cst_134 : f32 to vector<16x128xf32>
    %340 = arith.maximumf %338, %339 : vector<16x128xf32>
    %341 = vector.broadcast %336 : f32 to vector<16x128xf32>
    %342 = arith.subf %341, %236 : vector<16x128xf32>
    %cst_135 = arith.constant 0.000000e+00 : f32
    %343 = vector.broadcast %cst_135 : f32 to vector<16x128xf32>
    %344 = arith.maximumf %342, %343 : vector<16x128xf32>
    %345 = arith.mulf %340, %344 : vector<16x128xf32>
    %346 = arith.mulf %345, %345 : vector<16x128xf32>
    %347 = arith.truncf %346 : vector<16x128xf32> to vector<16x128xbf16>
    %c0_136 = arith.constant 0 : index
    %c896_137 = arith.constant 896 : index
    %348 = vector.load %arg16[%c0_136, %c896_137] : memref<16x1024xbf16, #tpu.memory_space<vmem>>, vector<16x128xbf16>
    tpu.vector_store %arg16[%c0_136, %c896_137], %347 {strides = array<i32>} : memref<16x1024xbf16, #tpu.memory_space<vmem>>, vector<16x128xbf16>,
    %c0_138 = arith.constant 0 : index
    %c0_139 = arith.constant 0 : index
    %349 = vector.load %arg16[%c0_138, %c0_139] : memref<16x1024xbf16, #tpu.memory_space<vmem>>, vector<16x1024xbf16>
    %c0_140 = arith.constant 0 : index
    %c0_141 = arith.constant 0 : index
    %350 = vector.load %arg12[%c0_140, %c0_141] : memref<1024x128xbf16, #tpu.memory_space<vmem>>, vector<1024x128xbf16>
    %cst_142 = arith.constant dense<0.000000e+00> : vector<16x128xf32>
    %351 = tpu.matmul %349, %350, %cst_142 {dimension_numbers = #tpu.dot_dimension_numbers<[1], [0], [0], [1], [0, 0, 1, 1], [], []>} : vector<16x1024xbf16>, vector<1024x128xbf16>, vector<16x128xf32> -> vector<16x128xf32>
    %c0_143 = arith.constant 0 : index
    %c0_144 = arith.constant 0 : index
    %352 = vector.load %arg13[%c0_143, %c0_144] : memref<1x128xf32, #tpu.memory_space<vmem>>, vector<1x128xf32>
    %353 = vector.broadcast %352 : vector<1x128xf32> to vector<16x128xf32>
    %354 = arith.addf %351, %353 : vector<16x128xf32>
    %355 = tpu.iota {dimensions = array<i32: 1>} : vector<16x128xi32>
    %c10_i32 = arith.constant 10 : i32
    %356 = vector.broadcast %c10_i32 : i32 to vector<16x128xi32>
    %357 = arith.cmpi slt, %355, %356 : vector<16x128xi32>
    %cst_145 = arith.constant -1.000000e+30 : f32
    %358 = vector.broadcast %cst_145 : f32 to vector<16x128xf32>
    %359 = arith.select %357, %354, %358 : vector<16x128xi1>, vector<16x128xf32>
    %cst_146 = arith.constant dense<0xFF800000> : vector<16xf32>
    %360 = vector.multi_reduction <maximumf>, %359, %cst_146 [1] : vector<16x128xf32> to vector<16xf32>
    %361 = vector.shape_cast %360 : vector<16xf32> to vector<16x1xf32>
    %362 = vector.broadcast %361 : vector<16x1xf32> to vector<16x128xf32>
    %363 = arith.subf %359, %362 : vector<16x128xf32>
    %364 = math.exp %363 : vector<16x128xf32>
    %cst_147 = arith.constant dense<0.000000e+00> : vector<16xf32>
    %365 = vector.multi_reduction <add>, %364, %cst_147 [1] : vector<16x128xf32> to vector<16xf32>
    %366 = vector.shape_cast %365 : vector<16xf32> to vector<16x1xf32>
    %367 = tpu.reciprocal %366 {approx = true} : vector<16x1xf32> -> vector<16x1xf32>
    %368 = vector.broadcast %367 : vector<16x1xf32> to vector<16x128xf32>
    %369 = arith.mulf %364, %368 : vector<16x128xf32>
    %c0_148 = arith.constant 0 : index
    %c0_149 = arith.constant 0 : index
    %370 = vector.load %arg14[%c0_148, %c0_149] : memref<16x128xf32, #tpu.memory_space<vmem>>, vector<16x128xf32>
    tpu.vector_store %arg14[%c0_148, %c0_149], %369 {strides = array<i32>} : memref<16x128xf32, #tpu.memory_space<vmem>>, vector<16x128xf32>,
    return
  }
  func.func @transform_0(%arg0: i32) -> (i32, i32) {
    %c0_i32 = arith.constant 0 : i32
    %c0_i32_0 = arith.constant 0 : i32
    return %arg0, %c0_i32 : i32, i32
  }
  func.func @transform_1(%arg0: i32) -> i32 {
    %c0_i32 = arith.constant 0 : i32
    %c0_i32_0 = arith.constant 0 : i32
    return %c0_i32 : i32
  }
  func.func @transform_2(%arg0: i32) -> i32 {
    %c0_i32 = arith.constant 0 : i32
    %c0_i32_0 = arith.constant 0 : i32
    return %c0_i32 : i32
  }
  func.func @transform_3(%arg0: i32) -> (i32, i32) {
    %c0_i32 = arith.constant 0 : i32
    %c0_i32_0 = arith.constant 0 : i32
    %c0_i32_1 = arith.constant 0 : i32
    return %c0_i32, %c0_i32_0 : i32, i32
  }
  func.func @transform_4(%arg0: i32) -> (i32, i32) {
    %c0_i32 = arith.constant 0 : i32
    %c0_i32_0 = arith.constant 0 : i32
    %c0_i32_1 = arith.constant 0 : i32
    return %c0_i32, %c0_i32_0 : i32, i32
  }
  func.func @transform_5(%arg0: i32) -> i32 {
    %c0_i32 = arith.constant 0 : i32
    %c0_i32_0 = arith.constant 0 : i32
    return %c0_i32 : i32
  }
  func.func @transform_6(%arg0: i32) -> i32 {
    %c0_i32 = arith.constant 0 : i32
    %c0_i32_0 = arith.constant 0 : i32
    return %c0_i32 : i32
  }
  func.func @transform_7(%arg0: i32) -> (i32, i32) {
    %c0_i32 = arith.constant 0 : i32
    %c0_i32_0 = arith.constant 0 : i32
    %c0_i32_1 = arith.constant 0 : i32
    return %c0_i32, %c0_i32_0 : i32, i32
  }
  func.func @transform_8(%arg0: i32) -> (i32, i32) {
    %c0_i32 = arith.constant 0 : i32
    %c0_i32_0 = arith.constant 0 : i32
    %c0_i32_1 = arith.constant 0 : i32
    return %c0_i32, %c0_i32_0 : i32, i32
  }
  func.func @transform_9(%arg0: i32) -> i32 {
    %c0_i32 = arith.constant 0 : i32
    %c0_i32_0 = arith.constant 0 : i32
    return %c0_i32 : i32
  }
  func.func @transform_10(%arg0: i32) -> i32 {
    %c0_i32 = arith.constant 0 : i32
    %c0_i32_0 = arith.constant 0 : i32
    return %c0_i32 : i32
  }
  func.func @transform_11(%arg0: i32) -> (i32, i32) {
    %c0_i32 = arith.constant 0 : i32
    %c0_i32_0 = arith.constant 0 : i32
    %c0_i32_1 = arith.constant 0 : i32
    return %c0_i32, %c0_i32_0 : i32, i32
  }
  func.func @transform_12(%arg0: i32) -> (i32, i32) {
    %c0_i32 = arith.constant 0 : i32
    %c0_i32_0 = arith.constant 0 : i32
    %c0_i32_1 = arith.constant 0 : i32
    return %c0_i32, %c0_i32_0 : i32, i32
  }
  func.func @transform_13(%arg0: i32) -> (i32, i32) {
    %c0_i32 = arith.constant 0 : i32
    %c0_i32_0 = arith.constant 0 : i32
    return %arg0, %c0_i32 : i32, i32
  }
}

</mosaic_0001>

<bundles_post_ra>
// kernel: tpu_custom_call.1
= control target key start
LH: loop header
LB: loop body
LE: loop exit
PB: predicated region body
PF: predicated region fallthrough
CT: control target
= control target key end

     0   :  { %18 = vsyncpa [#allocation5], 0  ;;  %s12239_s0 = inlined_call_operand.hbm [shape: f32[16,896], index: 0, kind: input, shape index: {}]   ;;  %s12240_s1 = inlined_call_operand.hbm [shape: f32[8], index: 1, kind: input, shape index: {}]   ;;  %s12241_s2 = inlined_call_operand.hbm [shape: f32[8], index: 2, kind: input, shape index: {}]   ;;  %s12242_s3 = inlined_call_operand.hbm [shape: bf16[7168,128], index: 3, kind: input, shape index: {}]   ;;  %s12243_s4 = inlined_call_operand.hbm [shape: f32[1,128], index: 4, kind: input, shape index: {}]   ;;  %s12244_s5 = inlined_call_operand.hbm [shape: f32[8], index: 5, kind: input, shape index: {}]   ;;  %s12245_s6 = inlined_call_operand.hbm [shape: f32[8], index: 6, kind: input, shape index: {}]   ;;  %s12246_s7 = inlined_call_operand.hbm [shape: bf16[1024,128], index: 7, kind: input, shape index: {}]   ;;  %s12247_s8 = inlined_call_operand.hbm [shape: f32[1,128], index: 8, kind: input, shape index: {}]   ;;  %s12248_s9 = inlined_call_operand.hbm [shape: f32[8], index: 9, kind: input, shape index: {}]   ;;  %s12249_s10 = inlined_call_operand.hbm [shape: f32[8], index: 10, kind: input, shape index: {}]   ;;  %s12250_s11 = inlined_call_operand.hbm [shape: bf16[1024,128], index: 11, kind: input, shape index: {}]   ;;  %s12251_s12 = inlined_call_operand.hbm [shape: f32[1,128], index: 12, kind: input, shape index: {}]   ;;  %s12252_s13 = inlined_call_operand.hbm [shape: f32[16,128], index: 13, kind: output, shape index: {}]  }
   0x1   :  { %19 = vsyncpa [#allocation7], 0 }
   0x2   :  { %20 = vsyncpa [#allocation10], 0 }
   0x3   :  { %21 = vsyncpa [#allocation12], 0 }
   0x4   :  { %22 = vsyncpa [#allocation16], 0 }
   0x5   :  { %23 = vsyncpa [#allocation18], 0 }
   0x6   :  { %24 = vsyncpa [#allocation22], 0 }
   0x7   :  { %25 = vsyncpa [#allocation24], 0  ;;  %s54_s27 = sshll.u32 %s12241_s2, 4  ;;  %s55_s27 = int_to_ptr.hbm [resolvable:$true] %s54_s27 }
   0x8   :  { %26 = vsyncpa [#allocation6], 0  ;;  %s62_s30 = sshll.u32 %s12242_s3, 4  ;;  %s11136_s14 = smov [#allocation9]   ;;  %s63_s30 = int_to_ptr.hbm [resolvable:$true] %s62_s30 }
   0x9   :  { %57 = dma.hbm_to_smem %s55_s27, 16, %s11136_s14, [#allocation10]  }
   0xa   :  { %s11137_s15 = smov [#allocation11]   ;;  %s11138_s17 = smov 64  }
   0xb   :  { %s64_s16 = sshll.u32 %s11137_s15, 4  ;;  %s11139_s18 = smov 4   ;;  %s65_s16 = int_to_ptr.vmem [resolvable:$true] %s64_s16 }
   0xc   :  { %70 = dma.hbm_to_vmem [thread:$0]  %s63_s30, 57344, %s65_s16, [#allocation12], %s11138_s17, %s11138_s17, %s11139_s18  }
   0xd   :  { %s96_s21 = sshll.u32 %s12245_s6, 4  ;;  %s104_s23 = sshll.u32 %s12246_s7, 4  ;;  %s97_s21 = int_to_ptr.hbm [resolvable:$true] %s96_s21  ;;  %s105_s23 = int_to_ptr.hbm [resolvable:$true] %s104_s23 }
   0xe   :  { %s11140_s24 = smov [#allocation15]   ;;  %s11141_s3 = smov [#allocation17]  }
   0xf   :  { %99 = dma.hbm_to_smem %s97_s21, 16, %s11140_s24, [#allocation16]  }
  0x10   :  { %s106_s25 = sshll.u32 %s11141_s3, 4  ;;  %s146_s28 = sshll.u32 %s12250_s11, 4  ;;  %s107_s25 = int_to_ptr.vmem [resolvable:$true] %s106_s25  ;;  %s147_s28 = int_to_ptr.hbm [resolvable:$true] %s146_s28 }
  0x11   :  { %112 = dma.hbm_to_vmem [thread:$0]  %s105_s23, 8192, %s107_s25, [#allocation18], %s11138_s17, %s11138_s17, %s11139_s18  }
  0x12   :  { %s31_s6 = sshll.u32 %s12239_s0, 4  ;;  %s11142_s14 = smov [#allocation23]   ;;  %s32_s6 = int_to_ptr.hbm [resolvable:$true] %s31_s6 }
  0x13   :  { %s148_s15 = sshll.u32 %s11142_s14, 4  ;;  %s11143_s7 = smov [#allocation4]   ;;  %s149_s15 = int_to_ptr.vmem [resolvable:$true] %s148_s15 }
  0x14   :  { %154 = dma.hbm_to_vmem [thread:$0]  %s147_s28, 8192, %s149_s15, [#allocation24], %s11138_s17, %s11138_s17, %s11139_s18  }
  0x15   :  { %s33_s16 = sshll.u32 %s11143_s7, 4  ;;  %s11144_s19 = smov 896   ;;  %s34_s16 = int_to_ptr.vmem [resolvable:$true] %s33_s16 }
  0x16   :  { %s11145_s20 = smov 56   ;;  %s45_s2 = sshll.u32 %s12240_s1, 4  ;;  %s46_s2 = int_to_ptr.hbm [resolvable:$true] %s45_s2 }
  0x17   :  { %39 = dma.hbm_to_vmem [thread:$0]  %s32_s6, 1792, %s34_s16, [#allocation5], %s11144_s19, %s11144_s19, %s11145_s20  }
  0x18   :  { %s76_s0 = sshll.u32 %s12243_s4, 4  ;;  %s11146_s24 = smov [#allocation8]   ;;  %s77_s0 = int_to_ptr.hbm [resolvable:$true] %s76_s0 }
  0x19   :  { %48 = dma.hbm_to_smem %s46_s2, 16, %s11146_s24, [#allocation7]  }
  0x1a   :  { %s11147_s3 = smov [#allocation13]   ;;  %s87_s26 = sshll.u32 %s12244_s5, 4  ;;  %s88_s26 = int_to_ptr.hbm [resolvable:$true] %s87_s26 }
  0x1b   :  { %s78_s17 = sshll.u32 %s11147_s3, 4  ;;  %s118_s1 = sshll.u32 %s12247_s8, 4  ;;  %s79_s17 = int_to_ptr.vmem [resolvable:$true] %s78_s17  ;;  %s119_s1 = int_to_ptr.hbm [resolvable:$true] %s118_s1 }
  0x1c   :  { %81 = dma.hbm_to_vmem [thread:$0]  %s77_s0, 16, %s79_s17, [#allocation12]  }
  0x1d   :  { %s11148_s29 = smov [#allocation14]   ;;  %s11149_s4 = smov [#allocation19]  }
  0x1e   :  { %90 = dma.hbm_to_smem %s88_s26, 16, %s11148_s29, [#allocation10]  }
  0x1f   :  { %s120_s30 = sshll.u32 %s11149_s4, 4  ;;  %s129_s15 = sshll.u32 %s12248_s9, 4  ;;  %s121_s30 = int_to_ptr.vmem [resolvable:$true] %s120_s30  ;;  %s130_s15 = int_to_ptr.hbm [resolvable:$true] %s129_s15 }
  0x20   :  { %123 = dma.hbm_to_vmem [thread:$0]  %s119_s1, 16, %s121_s30, [#allocation18]  }
  0x21   :  { %s138_s16 = sshll.u32 %s12249_s10, 4  ;;  %s11150_s19 = smov [#allocation20]   ;;  %s139_s16 = int_to_ptr.hbm [resolvable:$true] %s138_s16 }
  0x22   :  { %132 = dma.hbm_to_smem %s130_s15, 16, %s11150_s19, [#allocation16]  }
  0x23   :  { %s11151_s8 = smov [#allocation21]   ;;  %s160_s11 = sshll.u32 %s12251_s12, 4  ;;  %s161_s11 = int_to_ptr.hbm [resolvable:$true] %s160_s11 }
  0x24   :  { %141 = dma.hbm_to_smem %s139_s16, 16, %s11151_s8, [#allocation22]  }
  0x25   :  { %s11152_s2 = smov [#allocation25]  }
  0x26   :  { %s162_s22 = sshll.u32 %s11152_s2, 4  ;;  %s163_s22 = int_to_ptr.vmem [resolvable:$true] %s162_s22 }
  0x27   :  { %165 = dma.hbm_to_vmem [thread:$0]  %s161_s11, 16, %s163_s22, [#allocation24]  }
  0x28   :  { %11114 = dma.done.wait [#allocation5], 1792  }
  0x29   :  { %11115 = vsyncadd [#allocation5], 4294965504 }
  0x2a   :  { %11116 = dma.done.wait [#allocation7], 16  }
  0x2b   :  { %11117 = vsyncadd [#allocation7], 4294967280 }
  0x2c   :  { %11118 = dma.done.wait [#allocation10], 16  }
  0x2d   :  { %11119 = vsyncadd [#allocation10], 4294967280 }
  0x2e   :  { %11120 = dma.done.wait [#allocation12], 57360  }
  0x2f   :  { %11121 = vsyncadd [#allocation12], 4294909936 }
  0x30   :  { %11122 = dma.done.wait [#allocation10], 16  }
  0x31   :  { %11123 = vsyncadd [#allocation10], 4294967280 }
  0x32   :  { %11124 = dma.done.wait [#allocation16], 16  }
  0x33   :  { %11125 = vsyncadd [#allocation16], 4294967280 }
  0x34   :  { %11126 = dma.done.wait [#allocation18], 8208  }
  0x35   :  { %11127 = vsyncadd [#allocation18], 4294959088 }
  0x36   :  { %11128 = dma.done.wait [#allocation16], 16  }
  0x37   :  { %11129 = vsyncadd [#allocation16], 4294967280 }
  0x38   :  { %11130 = dma.done.wait [#allocation22], 16  }
  0x39   :  { %11131 = vsyncadd [#allocation22], 4294967280 }
  0x3a   :  { %11132 = dma.done.wait [#allocation24], 8208  }
  0x3b   :  { %11133 = vsyncadd [#allocation24], 4294959088 }
  0x3c   :  { %218 = sfence }
  0x3d   :  { %v10193_v0 = vld [vmem:[#allocation11 + $0x38] sm:$0xff]  ;;  %v10192_v4 = vld [vmem:[#allocation11 + $0x30] sm:$0xff]  ;;  %s233_s9 = sld [smem:[#allocation8]]  ;;  %v10191_v8 = vld [vmem:[#allocation11 + $0x28] sm:$0xff] }
  0x3e   :  { %v10201_v1 = vld [vmem:[#allocation11 + $0x78] sm:$0xff]  ;;  %4989 = vmatpush.bf16.msra.mxu0 %v10193_v0  ;;  %v10200_v5 = vld [vmem:[#allocation11 + $0x70] sm:$0xff]  ;;  %v10199_v9 = vld [vmem:[#allocation11 + $0x68] sm:$0xff]  ;;  %s234_s10 = sld [smem:[#allocation9]] }
  0x3f   :  { %v10209_v2 = vld [vmem:[#allocation11 + $0xb8] sm:$0xff]  ;;  %5003 = vmatpush.bf16.msra.mxu1 %v10201_v1  ;;  %v10208_v6 = vld [vmem:[#allocation11 + $0xb0] sm:$0xff]  ;;  %v10207_v10 = vld [vmem:[#allocation11 + $0xa8] sm:$0xff]  ;;  %s11307_s12 = sld [smem:[#allocation8 + $0x1]] }
  0x40   :  { %v10217_v3 = vld [vmem:[#allocation11 + $0xf8] sm:$0xff]  ;;  %5017 = vmatpush.bf16.msra.mxu2 %v10209_v2  ;;  %v10216_v7 = vld [vmem:[#allocation11 + $0xf0] sm:$0xff]  ;;  %v10215_v11 = vld [vmem:[#allocation11 + $0xe8] sm:$0xff]  ;;  %s11329_s23 = sld [smem:[#allocation9 + $0x1]] }
  0x41   :  { %5031 = vmatpush.bf16.msra.mxu3 %v10217_v3  ;;  %v10190_v12 = vld [vmem:[#allocation11 + $0x20] sm:$0xff]  ;;  %v10189_v16 = vld [vmem:[#allocation11 + $0x18] sm:$0xff]  ;;  %v11269_v22 = vld [vmem:[#allocation4] sm:$0xff]  ;;  %s7498_s0 = sld [smem:[#allocation8 + $0x2]] }
  0x42   :  { %4990 = vmatpush.bf16.msra.mxu0 %v10192_v4  ;;  %v10198_v13 = vld [vmem:[#allocation11 + $0x60] sm:$0xff]  ;;  %v10197_v17 = vld [vmem:[#allocation11 + $0x58] sm:$0xff]  ;;  %v11273_v24 = vld [vmem:[#allocation4 + $0x38] sm:$0xff]  ;;  %s7499_s24 = sld [smem:[#allocation9 + $0x2]] }
  0x43   :  { %5004 = vmatpush.bf16.msra.mxu1 %v10200_v5  ;;  %v10206_v14 = vld [vmem:[#allocation11 + $0xa0] sm:$0xff]  ;;  %v11265_v18 = vstv %s233_s9  ;;  %v10205_v20 = vld [vmem:[#allocation11 + $0x98] sm:$0xff]  ;;  %v10188_v25 = vld [vmem:[#allocation11 + $0x10] sm:$0xff]  ;;  %s7500_s3 = sld [smem:[#allocation8 + $0x3]] }
  0x44   :  { %5018 = vmatpush.bf16.msra.mxu2 %v10208_v6  ;;  %v10214_v15 = vld [vmem:[#allocation11 + $0xe0] sm:$0xff]  ;;  %v11267_v19 = vstv %s234_s10  ;;  %v10213_v21 = vld [vmem:[#allocation11 + $0xd8] sm:$0xff]  ;;  %v10196_v26 = vld [vmem:[#allocation11 + $0x50] sm:$0xff]  ;;  %v236_v28 = vsub.f32 %v11269_v22, %v11265_v18  ;;  %v243_v30 = vsub.f32 %v11273_v24, %v11265_v18  ;;  %s7501_s17 = sld [smem:[#allocation9 + $0x3]] }
  0x45   :  { %5032 = vmatpush.bf16.msra.mxu3 %v10216_v7  ;;  %v11271_v23 = vld [vmem:[#allocation4 + $0x8] sm:$0xff]  ;;  %v11275_v27 = vld [vmem:[#allocation4 + $0x40] sm:$0xff]  ;;  %v265_v31 = vsub.f32 %v11267_v19, %v11269_v22  ;;  %v272_v34 = vsub.f32 %v11267_v19, %v11273_v24  ;;  %v11291_v35 = vld [vmem:[#allocation4 + $0x10] sm:$0xff]  ;;  %s7502_s18 = sld [smem:[#allocation8 + $0x4]] }
  0x46   :  { %4991 = vmatpush.bf16.msra.mxu0 %v10191_v8  ;;  %v237_v29 = vsub.f32 %v11271_v23, %v11265_v18  ;;  %v244_v32 = vsub.f32 %v11275_v27, %v11265_v18  ;;  %v266_v33 = vsub.f32 %v11267_v19, %v11271_v23  ;;  %v11293_v36 = vld [vmem:[#allocation4 + $0x18] sm:$0xff]  ;;  %v11295_v37 = vld [vmem:[#allocation4 + $0x48] sm:$0xff]  ;;  %v10204_v38 = vld [vmem:[#allocation11 + $0x90] sm:$0xff]  ;;  %v250_v40 = vmax.f32 %v236_v28, 0.0  ;;  %s7503_s25 = sld [smem:[#allocation9 + $0x4]] }
  0x47   :  { %5005 = vmatpush.bf16.msra.mxu1 %v10199_v9  ;;  %v10212_v39 = vld [vmem:[#allocation11 + $0xd0] sm:$0xff]  ;;  %v257_v42 = vmax.f32 %v243_v30, 0.0  ;;  %v273_v43 = vsub.f32 %v11267_v19, %v11275_v27  ;;  %v279_v45 = vmax.f32 %v265_v31, 0.0  ;;  %v286_v47 = vmax.f32 %v272_v34, 0.0  ;;  %v11299_v48 = vld [vmem:[#allocation4 + $0x50] sm:$0xff]  ;;  %v10187_v53 = vld [vmem:[#allocation11 + $0x8] sm:$0xff] }
  0x48   :  { %5019 = vmatpush.bf16.msra.mxu2 %v10207_v10  ;;  %v251_v41 = vmax.f32 %v237_v29, 0.0  ;;  %v258_v44 = vmax.f32 %v244_v32, 0.0  ;;  %v280_v46 = vmax.f32 %v266_v33, 0.0  ;;  %v238_v50 = vsub.f32 %v11291_v35, %v11265_v18  ;;  %v10195_v54 = vld [vmem:[#allocation11 + $0x48] sm:$0xff]  ;;  %v10186_v63 = vld [vmem:[#allocation11] sm:$0xff]  ;;  %v11311_v4 = vld [vmem:[#allocation4 + $0x20] sm:$0xff] }
  0x49   :  { %5033 = vmatpush.bf16.msra.mxu3 %v10215_v11  ;;  %v287_v49 = vmax.f32 %v273_v43, 0.0  ;;  %v239_v51 = vsub.f32 %v11293_v36, %v11265_v18  ;;  %v245_v52 = vsub.f32 %v11295_v37, %v11265_v18  ;;  %v293_v55 = vmul.f32 %v279_v45, %v250_v40  ;;  %v10203_v58 = vld [vmem:[#allocation11 + $0x88] sm:$0xff]  ;;  %v11313_v5 = vld [vmem:[#allocation4 + $0x28] sm:$0xff]  ;;  %v10194_v11 = vld [vmem:[#allocation11 + $0x40] sm:$0xff]  ;;  %s11625_s26 = sld [smem:[#allocation8 + $0x5]] }
  0x4a   :  { %4992 = vmatpush.bf16.msra.mxu0 %v10190_v12  ;;  %v294_v56 = vmul.f32 %v280_v46, %v251_v41  ;;  %v300_v57 = vmul.f32 %v286_v47, %v257_v42  ;;  %v10211_v59 = vld [vmem:[#allocation11 + $0xc8] sm:$0xff]  ;;  %v246_v61 = vsub.f32 %v11299_v48, %v11265_v18  ;;  %v252_v62 = vmax.f32 %v238_v50, 0.0  ;;  %v10225_v29 = vld [vmem:[#allocation11 + $0x138] sm:$0xff]  ;;  %s11627_s27 = sld [smem:[#allocation9 + $0x5]] }
  0x4b   :  { %5006 = vmatpush.bf16.msra.mxu1 %v10198_v13  ;;  %v301_v60 = vmul.f32 %v287_v49, %v258_v44  ;;  %v307_v0 = vmul.f32 %v293_v55, %v293_v55  ;;  %v253_v3 = vmax.f32 %v239_v51, 0.0  ;;  %v259_v7 = vmax.f32 %v245_v52, 0.0  ;;  %v11319_v10 = vld [vmem:[#allocation4 + $0x58] sm:$0xff]  ;;  %v10233_v30 = vld [vmem:[#allocation11 + $0x178] sm:$0xff]  ;;  %v10224_v55 = vld [vmem:[#allocation11 + $0x130] sm:$0xff]  ;;  %s7506_s28 = sld [smem:[#allocation8 + $0x6]] }
  0x4c   :  { %5020 = vmatpush.bf16.msra.mxu2 %v10206_v14  ;;  %v308_v1 = vmul.f32 %v294_v56, %v294_v56  ;;  %v314_v2 = vmul.f32 %v300_v57, %v300_v57  ;;  %v267_v8 = vsub.f32 %v11267_v19, %v11291_v35  ;;  %v268_v9 = vsub.f32 %v11267_v19, %v11293_v36  ;;  %v10232_v56 = vld [vmem:[#allocation11 + $0x170] sm:$0xff]  ;;  %s7507_s1 = sld [smem:[#allocation9 + $0x6]] }
  0x4d   :  { %5034 = vmatpush.bf16.msra.mxu3 %v10214_v15  ;;  %v315_v6 = vmul.f32 %v301_v60, %v301_v60  ;;  %v260_v13 = vmax.f32 %v246_v61, 0.0  ;;  %v274_v14 = vsub.f32 %v11267_v19, %v11295_v37  ;;  %v275_v15 = vsub.f32 %v11267_v19, %v11299_v48  ;;  %v10240_v61 = vld [vmem:[#allocation11 + $0x1b0] sm:$0xff]  ;;  %s7508_s29 = sld [smem:[#allocation8 + $0x7]] }
  0x4e   :  { %4993 = vmatpush.bf16.msra.mxu0 %v10189_v16  ;;  %v321_v12 = vpack.c.bf16 %v308_v1, %v307_v0  ;;  %v11325_v16 = vld [vmem:[#allocation4 + $0x60] sm:$0xff]  ;;  %v240_v28 = vsub.f32 %v11311_v4, %v11265_v18  ;;  %v241_v33 = vsub.f32 %v11313_v5, %v11265_v18  ;;  %v247_v34 = vsub.f32 %v11319_v10, %v11265_v18  ;;  %s7509_s4 = sld [smem:[#allocation9 + $0x7]] }
  0x4f   :  { %5007 = vmatpush.bf16.msra.mxu1 %v10197_v17  ;;  %v10202_v17 = vld [vmem:[#allocation11 + $0x80] sm:$0xff]  ;;  %v288_v31 = vmax.f32 %v274_v14, 0.0  ;;  %v289_v32 = vmax.f32 %v275_v15, 0.0  ;;  %v248_v42 = vsub.f32 %v11325_v16, %v11265_v18  ;;  %v11338_v43 = vstv %s11307_s12  ;;  %s11924_s30 = sld [smem:[#allocation14]] }
  0x50   :  { %5021 = vmatpush.bf16.msra.mxu2 %v10205_v20  ;;  %v10210_v20 = vld [vmem:[#allocation11 + $0xc0] sm:$0xff]  ;;  %329 = vst [vmem:[#allocation2] sm:$0xff] %v321_v12  ;;  %v254_v46 = vmax.f32 %v240_v28, 0.0  ;;  %v255_v47 = vmax.f32 %v241_v33, 0.0  ;;  %v261_v51 = vmax.f32 %v247_v34, 0.0  ;;  %v269_v52 = vsub.f32 %v11267_v19, %v11311_v4  ;;  %s11926_s6 = sld [smem:[#allocation15]] }
  0x51   :  { %5035 = vmatpush.bf16.msra.mxu3 %v10213_v21  ;;  %v325_v21 = vpack.c.bf16 %v315_v6, %v314_v2  ;;  %v302_v44 = vmul.f32 %v288_v31, %v259_v7  ;;  %v303_v45 = vmul.f32 %v289_v32, %v260_v13  ;;  %v270_v60 = vsub.f32 %v11267_v19, %v11313_v5  ;;  %v10231_v6 = vld [vmem:[#allocation11 + $0x168] sm:$0xff]  ;;  %s11928_s14 = sld [smem:[#allocation14 + $0x1]] }
  0x52   :  { %4994 = vmatpush.bf16.msra.mxu0 %v10188_v25  ;;  %v281_v25 = vmax.f32 %v267_v8, 0.0  ;;  %v276_v0 = vsub.f32 %v11267_v19, %v11319_v10  ;;  %v277_v1 = vsub.f32 %v11267_v19, %v11325_v16  ;;  %v283_v2 = vmax.f32 %v269_v52, 0.0  ;;  %v10247_v31 = vld [vmem:[#allocation11 + $0x1e8] sm:$0xff]  ;;  %s11930_s15 = sld [smem:[#allocation15 + $0x1]] }
  0x53   :  { %5008 = vmatpush.bf16.msra.mxu1 %v10196_v26  ;;  %v282_v26 = vmax.f32 %v268_v9, 0.0  ;;  %333 = vst [vmem:[#allocation2 + $0xe0] sm:$0xff] %v325_v21  ;;  %v316_v57 = vmul.f32 %v302_v44, %v302_v44  ;;  %v284_v8 = vmax.f32 %v270_v60, 0.0  ;;  %v348_v60 = vsub.f32 %v11275_v27, %v11338_v43  ;;  %s11932_s5 = sld [smem:[#allocation14 + $0x2]] }
  0x54   :  { %5022 = vmatpush.bf16.msra.mxu2 %v10204_v38  ;;  %v10241_v38 = vld [vmem:[#allocation11 + $0x1b8] sm:$0xff]  ;;  %v295_v40 = vmul.f32 %v281_v25, %v252_v62  ;;  %v10248_v62 = vld [vmem:[#allocation11 + $0x1f0] sm:$0xff]  ;;  %v290_v14 = vmax.f32 %v276_v0, 0.0  ;;  %v297_v15 = vmul.f32 %v283_v2, %v254_v46  ;;  %v341_v46 = vsub.f32 %v11271_v23, %v11338_v43  ;;  %s11934_s7 = sld [smem:[#allocation15 + $0x2]] }
  0x55   :  { %5036 = vmatpush.bf16.msra.mxu3 %v10212_v39  ;;  %v10249_v39 = vld [vmem:[#allocation11 + $0x1f8] sm:$0xff]  ;;  %v296_v41 = vmul.f32 %v282_v26, %v253_v3  ;;  %v10223_v3 = vld [vmem:[#allocation11 + $0x128] sm:$0xff]  ;;  %v291_v26 = vmax.f32 %v277_v1, 0.0  ;;  %v298_v28 = vmul.f32 %v284_v8, %v255_v47  ;;  %v10222_v47 = vld [vmem:[#allocation11 + $0x120] sm:$0xff]  ;;  %s11936_s16 = sld [smem:[#allocation14 + $0x3]] }
  0x56   :  { %4995 = vmatpush.bf16.msra.mxu0 %v10187_v53  ;;  %v309_v49 = vmul.f32 %v295_v40, %v295_v40  ;;  %v11342_v53 = vld [vmem:[#allocation4 + $0x30] sm:$0xff]  ;;  %v304_v34 = vmul.f32 %v290_v14, %v261_v51  ;;  %v347_v51 = vsub.f32 %v11273_v24, %v11338_v43  ;;  %v10221_v14 = vld [vmem:[#allocation11 + $0x118] sm:$0xff]  ;;  %s11938_s19 = sld [smem:[#allocation15 + $0x3]] }
  0x57   :  { %5009 = vmatpush.bf16.msra.mxu1 %v10195_v54  ;;  %v310_v50 = vmul.f32 %v296_v41, %v296_v41  ;;  %v11344_v54 = vld [vmem:[#allocation4 + $0x68] sm:$0xff]  ;;  %v242_v9 = vsub.f32 %v11342_v53, %v11265_v18  ;;  %v7512_v12 = vld [vmem:[#allocation2] sm:$0xf]  ;;  %v10130_v13 = vld [vmem:[#allocation2 + $0x4] sm:$0xf]  ;;  %v312_v40 = vmul.f32 %v298_v28, %v298_v28  ;;  %s11940_s8 = sld [smem:[#allocation14 + $0x4]] }
  0x58   :  { %5023 = vmatpush.bf16.msra.mxu2 %v10203_v58  ;;  %v317_v58 = vmul.f32 %v303_v45, %v303_v45  ;;  %v361_v1 = vmax.f32 %v347_v51, 0.0  ;;  %s11942_s20 = sld [smem:[#allocation15 + $0x4]] }
  0x59   :  { %5037 = vmatpush.bf16.msra.mxu3 %v10211_v59  ;;  %v262_v59 = vmax.f32 %v248_v42, 0.0  ;;  %v318_v42 = vmul.f32 %v304_v34, %v304_v34  ;;  %v343_v34 = vsub.f32 %v11293_v36, %v11338_v43  ;;  %s11944_s21 = sld [smem:[#allocation14 + $0x5]] }
  0x5a   :  { %4996 = vmatpush.bf16.msra.mxu0 %v10186_v63  ;;  %v322_v63 = vpack.c.bf16 %v310_v50, %v309_v49  ;;  %v326_v7 = vpack.c.bf16 %v317_v58, %v316_v57  ;;  %v10158_v21 = vld [vmem:[#allocation2 + $0xdc] sm:$0xf0]  ;;  %v7514_v25 = vld [vmem:[#allocation2 + $0xe0] sm:$0xf0]  ;;  %v10230_v49 = vld [vmem:[#allocation11 + $0x160] sm:$0xff]  ;;  %s11946_s11 = sld [smem:[#allocation15 + $0x5]] }
  0x5b   :  { %5010 = vmatpush.bf16.msra.mxu1 %v10194_v11  ;;  %v249_v11 = vsub.f32 %v11344_v54, %v11265_v18  ;;  %v340_v18 = vsub.f32 %v11269_v22, %v11338_v43  ;;  %v7513_v32 = vor.u32 %v10158_v21, %v7512_v12  ;;  %v7517_v33 = vor.u32 %v10130_v13, %v7514_v25  ;;  %v10246_v57 = vld [vmem:[#allocation11 + $0x1e0] sm:$0xff]  ;;  %v10237_v21 = vld [vmem:[#allocation11 + $0x198] sm:$0xff]  ;;  %s11948_s2 = sld [smem:[#allocation14 + $0x6]] }
  0x5c   :  { %5024 = vmatpush.bf16.msra.mxu2 %v10202_v17  ;;  %330 = vst [vmem:[#allocation2 + $0x8] sm:$0xff] %v322_v63  ;;  %v271_v17 = vsub.f32 %v11267_v19, %v11342_v53  ;;  %v10245_v25 = vld [vmem:[#allocation11 + $0x1d8] sm:$0xff]  ;;  %s11950_s22 = sld [smem:[#allocation15 + $0x6]] }
  0x5d   :  { %5038 = vmatpush.bf16.msra.mxu3 %v10210_v20  ;;  %v278_v20 = vsub.f32 %v11267_v19, %v11344_v54  ;;  %334 = vst [vmem:[#allocation2 + $0xe8] sm:$0xff] %v326_v7  ;;  %v256_v19 = vmax.f32 %v242_v9, 0.0  ;;  %v263_v41 = vmax.f32 %v249_v11, 0.0  ;;  %4997 = vmatmul.bf16.vlgmr.msra.gmra.mxu0 %v7513_v32  ;;  %v362_v11 = vmax.f32 %v348_v60, 0.0  ;;  %s11952_s9 = sld [smem:[#allocation14 + $0x7]] }
  0x5e   :  { %5045 = vmatpush.bf16.msrb.mxu0 %v10225_v29  ;;  %v11363_v29 = vstv %s11329_s23  ;;  %5011 = vmatmul.bf16.vlgmr.msra.gmra.mxu1 %v7517_v33  ;;  %v285_v44 = vmax.f32 %v271_v17, 0.0  ;;  %v342_v33 = vsub.f32 %v11291_v35, %v11338_v43  ;;  %s11954_s10 = sld [smem:[#allocation15 + $0x7]] }
  0x5f   :  { %5059 = vmatpush.bf16.msrb.mxu1 %v10233_v30  ;;  %v10239_v30 = vld [vmem:[#allocation11 + $0x1a8] sm:$0xff]  ;;  %v292_v45 = vmax.f32 %v278_v20, 0.0  ;;  %v369_v2 = vsub.f32 %v11363_v29, %v11269_v22  ;;  %v376_v12 = vsub.f32 %v11363_v29, %v11273_v24  ;;  %v377_v20 = vsub.f32 %v11363_v29, %v11275_v27  ;;  %s12080_s12 = sld [smem:[#allocation20]] }
  0x60   :  { %5073 = vmatpush.bf16.msrb.mxu2 %v10241_v38  ;;  %v305_v38 = vmul.f32 %v291_v26, %v262_v59  ;;  %v299_v58 = vmul.f32 %v285_v44, %v256_v19  ;;  %v372_v60 = vsub.f32 %v11363_v29, %v11293_v36  ;;  %s12082_s23 = sld [smem:[#allocation21]] }
  0x61   :  { %5087 = vmatpush.bf16.msrb.mxu3 %v10249_v39  ;;  %v311_v39 = vmul.f32 %v297_v15, %v297_v15  ;;  %v306_v59 = vmul.f32 %v292_v45, %v263_v41  ;;  %v10229_v15 = vld [vmem:[#allocation11 + $0x158] sm:$0xff]  ;;  %v391_v32 = vmax.f32 %v377_v20, 0.0  ;;  %v10220_v41 = vld [vmem:[#allocation11 + $0x110] sm:$0xff]  ;;  %v10226_v20 = vld [vmem:[#allocation11 + $0x140] sm:$0xff] }
  0x62   :  { %5046 = vmatpush.bf16.msrb.mxu0 %v10224_v55  ;;  %v319_v50 = vmul.f32 %v305_v38, %v305_v38  ;;  %v354_v55 = vmax.f32 %v340_v18, 0.0  ;;  %v313_v8 = vmul.f32 %v299_v58, %v299_v58  ;;  %v383_v18 = vmax.f32 %v369_v2, 0.0  ;;  %v10227_v2 = vld [vmem:[#allocation11 + $0x148] sm:$0xff] }
  0x63   :  { %5060 = vmatpush.bf16.msrb.mxu1 %v10232_v56  ;;  %v323_v52 = vpack.c.bf16 %v312_v40, %v311_v39  ;;  %v10238_v56 = vld [vmem:[#allocation11 + $0x1a0] sm:$0xff]  ;;  %v10131_v63 = vld [vmem:[#allocation2 + $0xc] sm:$0xf]  ;;  %v320_v9 = vmul.f32 %v306_v59, %v306_v59  ;;  %v349_v39 = vsub.f32 %v11295_v37, %v11338_v43  ;;  %v350_v40 = vsub.f32 %v11299_v48, %v11338_v43 }
  0x64   :  { %5074 = vmatpush.bf16.msrb.mxu2 %v10240_v61  ;;  %v355_v61 = vmax.f32 %v341_v46, 0.0  ;;  %v327_v0 = vpack.c.bf16 %v319_v50, %v318_v42  ;;  %v7522_v7 = vld [vmem:[#allocation2 + $0xe8] sm:$0xf0]  ;;  %v324_v26 = vpack.c.bf16 %v313_v8, %v313_v8  ;;  %v397_v19 = vmul.f32 %v383_v18, %v354_v55  ;;  %v10228_v42 = vld [vmem:[#allocation11 + $0x150] sm:$0xff]  ;;  %v10243_v8 = vld [vmem:[#allocation11 + $0x1c8] sm:$0xff] }
  0x65   :  { %5088 = vmatpush.bf16.msrb.mxu3 %v10248_v62  ;;  %v7520_v62 = vld [vmem:[#allocation2 + $0x8] sm:$0xf]  ;;  %331 = vst [vmem:[#allocation2 + $0x10] sm:$0xff] %v323_v52  ;;  %v7525_v17 = vor.u32 %v10131_v63, %v7522_v7  ;;  %v328_v28 = vpack.c.bf16 %v320_v9, %v320_v9  ;;  %v405_v45 = vmul.f32 %v391_v32, %v362_v11  ;;  %v356_v46 = vmax.f32 %v342_v33, 0.0  ;;  %v10244_v50 = vld [vmem:[#allocation11 + $0x1d0] sm:$0xff]  ;;  %v10235_v7 = vld [vmem:[#allocation11 + $0x188] sm:$0xff] }
  0x66   :  { %5047 = vmatpush.bf16.msrb.mxu0 %v10223_v3  ;;  %v370_v3 = vsub.f32 %v11363_v29, %v11271_v23  ;;  %335 = vst [vmem:[#allocation2 + $0xf0] sm:$0xff] %v327_v0  ;;  %v411_v52 = vmul.f32 %v397_v19, %v397_v19  ;;  %v363_v55 = vmax.f32 %v349_v39, 0.0  ;;  %v364_v59 = vmax.f32 %v350_v40, 0.0 }
  0x67   :  { %5061 = vmatpush.bf16.msrb.mxu1 %v10231_v6  ;;  %v10159_v6 = vld [vmem:[#allocation2 + $0xe4] sm:$0xf0]  ;;  %5039 = vmatmul.bf16.vlgmr.msra.gmra.mxu3 %v7525_v17  ;;  %332 = vst [vmem:[#allocation2 + $0x18] sm:$0xf] %v324_v26  ;;  %v419_v58 = vmul.f32 %v405_v45, %v405_v45  ;;  %v379_v63 = vsub.f32 %v11363_v29, %v11299_v48  ;;  %v10218_v17 = vld [vmem:[#allocation11 + $0x100] sm:$0xff] }
  0x68   :  { %5075 = vmatpush.bf16.msrb.mxu2 %v10239_v30  ;;  %v7521_v13 = vor.u32 %v10159_v6, %v7520_v62  ;;  %v384_v30 = vmax.f32 %v370_v3, 0.0  ;;  %336 = vst [vmem:[#allocation2 + $0xf8] sm:$0xf] %v328_v28  ;;  %v378_v62 = vsub.f32 %v11363_v29, %v11295_v37  ;;  %v386_v6 = vmax.f32 %v372_v60, 0.0 }
  0x69   :  { %5089 = vmatpush.bf16.msrb.mxu3 %v10247_v31  ;;  %v390_v31 = vmax.f32 %v376_v12, 0.0  ;;  %v393_v11 = vmax.f32 %v379_v63, 0.0  ;;  %v351_v18 = vsub.f32 %v11319_v10, %v11338_v43  ;;  %v373_v45 = vsub.f32 %v11363_v29, %v11311_v4 }
  0x6a   :  { %5048 = vmatpush.bf16.msrb.mxu0 %v10222_v47  ;;  %5025 = vmatmul.bf16.vlgmr.msra.gmra.mxu2 %v7521_v13  ;;  %v398_v38 = vmul.f32 %v384_v30, %v355_v61  ;;  %v357_v47 = vmax.f32 %v343_v34, 0.0  ;;  %v392_v9 = vmax.f32 %v378_v62, 0.0  ;;  %v344_v13 = vsub.f32 %v11311_v4, %v11338_v43  ;;  %v10242_v30 = vld [vmem:[#allocation11 + $0x1c0] sm:$0xff] }
  0x6b   :  { %5062 = vmatpush.bf16.msrb.mxu1 %v10230_v49  ;;  %v404_v44 = vmul.f32 %v390_v31, %v361_v1  ;;  %v10236_v49 = vld [vmem:[#allocation11 + $0x190] sm:$0xff]  ;;  %v10219_v1 = vld [vmem:[#allocation11 + $0x108] sm:$0xff]  ;;  %v407_v26 = vmul.f32 %v393_v11, %v364_v59  ;;  %v352_v34 = vsub.f32 %v11325_v16, %v11338_v43  ;;  %v365_v59 = vmax.f32 %v351_v18, 0.0 }
  0x6c   :  { %5076 = vmatpush.bf16.msrb.mxu2 %v10238_v56  ;;  %v412_v51 = vmul.f32 %v398_v38, %v398_v38  ;;  %v371_v56 = vsub.f32 %v11363_v29, %v11291_v35  ;;  %v7528_v31 = vld [vmem:[#allocation2 + $0x10] sm:$0xf]  ;;  %v358_v19 = vmax.f32 %v344_v13, 0.0  ;;  %v10257_v38 = vld [vmem:[#allocation11 + $0x238] sm:$0xff]  ;;  %v387_v60 = vmax.f32 %v373_v45, 0.0  ;;  %v10264_v11 = vld [vmem:[#allocation11 + $0x270] sm:$0xff] }
  0x6d   :  { %5090 = vmatpush.bf16.msrb.mxu3 %v10246_v57  ;;  %v418_v57 = vmul.f32 %v404_v44, %v404_v44  ;;  %v10160_v32 = vld [vmem:[#allocation2 + $0xec] sm:$0xf0]  ;;  %v10263_v18 = vld [vmem:[#allocation11 + $0x268] sm:$0xff] }
  0x6e   :  { %5049 = vmatpush.bf16.msrb.mxu0 %v10221_v14  ;;  %v425_v61 = vpack.c.bf16 %v412_v51, %v411_v52  ;;  %v385_v0 = vmax.f32 %v371_v56, 0.0  ;;  %v400_v14 = vmul.f32 %v386_v6, %v357_v47  ;;  %v7536_v39 = vld [vmem:[#allocation2 + $0x18] sm:$0xf]  ;;  %v10132_v47 = vld [vmem:[#allocation2 + $0x14] sm:$0xf]  ;;  %v374_v52 = vsub.f32 %v11363_v29, %v11313_v5  ;;  %v10273_v56 = vld [vmem:[#allocation11 + $0x2b8] sm:$0xff] }
  0x6f   :  { %5063 = vmatpush.bf16.msrb.mxu1 %v10229_v15  ;;  %v429_v3 = vpack.c.bf16 %v419_v58, %v418_v57  ;;  %v345_v15 = vsub.f32 %v11313_v5, %v11338_v43  ;;  %v10161_v40 = vld [vmem:[#allocation2 + $0xf4] sm:$0xf0]  ;;  %v380_v51 = vsub.f32 %v11363_v29, %v11319_v10  ;;  %v10281_v57 = vld [vmem:[#allocation11 + $0x2f8] sm:$0xff] }
  0x70   :  { %5077 = vmatpush.bf16.msrb.mxu2 %v10237_v21  ;;  %433 = vst [vmem:[#allocation2 + $0x1c] sm:$0xff] %v425_v61  ;;  %v399_v12 = vmul.f32 %v385_v0, %v356_v46  ;;  %v10234_v21 = vld [vmem:[#allocation11 + $0x180] sm:$0xff]  ;;  %v414_v33 = vmul.f32 %v400_v14, %v400_v14  ;;  %v10265_v46 = vld [vmem:[#allocation11 + $0x278] sm:$0xff]  ;;  %v7529_v61 = vor.u32 %v10160_v32, %v7528_v31  ;;  %v366_v0 = vmax.f32 %v352_v34, 0.0  ;;  %v10272_v14 = vld [vmem:[#allocation11 + $0x2b0] sm:$0xff] }
  0x71   :  { %5091 = vmatpush.bf16.msrb.mxu3 %v10245_v25  ;;  %437 = vst [vmem:[#allocation2 + $0xfc] sm:$0xff] %v429_v3  ;;  %v406_v25 = vmul.f32 %v392_v9, %v363_v55  ;;  %v359_v44 = vmax.f32 %v345_v15, 0.0  ;;  %v381_v55 = vsub.f32 %v11363_v29, %v11325_v16  ;;  %v7537_v62 = vor.u32 %v10161_v40, %v7536_v39  ;;  %v10256_v9 = vld [vmem:[#allocation11 + $0x230] sm:$0xff]  ;;  %v10271_v32 = vld [vmem:[#allocation11 + $0x2a8] sm:$0xff]  ;;  %v10270_v39 = vld [vmem:[#allocation11 + $0x2a0] sm:$0xff] }
  0x72   :  { %5050 = vmatpush.bf16.msrb.mxu0 %v10220_v41  ;;  %v413_v28 = vmul.f32 %v399_v12, %v399_v12  ;;  %v394_v6 = vmax.f32 %v380_v51, 0.0  ;;  %v10280_v15 = vld [vmem:[#allocation11 + $0x2f0] sm:$0xff]  ;;  %v10278_v40 = vld [vmem:[#allocation11 + $0x2e0] sm:$0xff] }
  0x73   :  { %5064 = vmatpush.bf16.msrb.mxu1 %v10228_v42  ;;  %v420_v41 = vmul.f32 %v406_v25, %v406_v25  ;;  %v421_v42 = vmul.f32 %v407_v26, %v407_v26  ;;  %v395_v12 = vmax.f32 %v381_v55, 0.0 }
  0x74   :  { %5078 = vmatpush.bf16.msrb.mxu2 %v10236_v49  ;;  %v7530_v49 = vld [vmem:[#allocation2 + $0xf0] sm:$0xf0] }
  0x75   :  { %5092 = vmatpush.bf16.msrb.mxu3 %v10244_v50  ;;  %v426_v50 = vpack.c.bf16 %v414_v33, %v413_v28  ;;  %v430_v58 = vpack.c.bf16 %v421_v42, %v420_v41  ;;  %v10255_v28 = vld [vmem:[#allocation11 + $0x228] sm:$0xff]  ;;  %v11411_v41 = vstv %s7498_s0  ;;  %v11413_v42 = vstv %s7499_s24  ;;  %s12084_s0 = sld [smem:[#allocation20 + $0x1]] }
  0x76   :  { %5051 = vmatpush.bf16.msrb.mxu0 %v10219_v1  ;;  %v388_v1 = vmax.f32 %v374_v52, 0.0  ;;  %v10279_v33 = vld [vmem:[#allocation11 + $0x2e8] sm:$0xff]  ;;  %v445_v45 = vsub.f32 %v11271_v23, %v11411_v41  ;;  %v473_v52 = vsub.f32 %v11413_v42, %v11269_v22  ;;  %v474_v51 = vsub.f32 %v11413_v42, %v11271_v23  ;;  %s12086_s24 = sld [smem:[#allocation21 + $0x1]] }
  0x77   :  { %5065 = vmatpush.bf16.msrb.mxu1 %v10227_v2  ;;  %v10133_v63 = vld [vmem:[#allocation2 + $0x1c] sm:$0xf]  ;;  %434 = vst [vmem:[#allocation2 + $0x24] sm:$0xff] %v426_v50  ;;  %v7533_v2 = vor.u32 %v10132_v47, %v7530_v49  ;;  %v452_v47 = vsub.f32 %v11275_v27, %v11411_v41  ;;  %v10253_v49 = vld [vmem:[#allocation11 + $0x218] sm:$0xff]  ;;  %v480_v55 = vsub.f32 %v11413_v42, %v11273_v24 }
  0x78   :  { %5079 = vmatpush.bf16.msrb.mxu2 %v10235_v7  ;;  %v7538_v3 = vld [vmem:[#allocation2 + $0xf8] sm:$0xf0]  ;;  %438 = vst [vmem:[#allocation2 + $0x104] sm:$0xff] %v430_v58  ;;  %v401_v7 = vmul.f32 %v387_v60, %v358_v19  ;;  %v402_v13 = vmul.f32 %v388_v1, %v359_v44  ;;  %v10254_v19 = vld [vmem:[#allocation11 + $0x220] sm:$0xff]  ;;  %v444_v44 = vsub.f32 %v11269_v22, %v11411_v41  ;;  %v10261_v50 = vld [vmem:[#allocation11 + $0x258] sm:$0xff] }
  0x79   :  { %5093 = vmatpush.bf16.msrb.mxu3 %v10243_v8  ;;  %v7541_v8 = vor.u32 %v10133_v63, %v7538_v3  ;;  %v481_v60 = vsub.f32 %v11413_v42, %v11275_v27  ;;  %v466_v22 = vmax.f32 %v452_v47, 0.0  ;;  %v487_v63 = vmax.f32 %v473_v52, 0.0  ;;  %v10260_v3 = vld [vmem:[#allocation11 + $0x250] sm:$0xff] }
  0x7a   :  { %5052 = vmatpush.bf16.msrb.mxu0 %v10218_v17  ;;  %v408_v17 = vmul.f32 %v394_v6, %v365_v59  ;;  %v416_v25 = vmul.f32 %v402_v13, %v402_v13  ;;  %v458_v58 = vmax.f32 %v444_v44, 0.0  ;;  %v459_v59 = vmax.f32 %v445_v45, 0.0  ;;  %v10268_v27 = vld [vmem:[#allocation11 + $0x290] sm:$0xff]  ;;  %v10297_v44 = vld [vmem:[#allocation11 + $0x378] sm:$0xff] }
  0x7b   :  { %5066 = vmatpush.bf16.msrb.mxu1 %v10226_v20  ;;  %v415_v20 = vmul.f32 %v401_v7, %v401_v7  ;;  %v494_v23 = vmax.f32 %v480_v55, 0.0  ;;  %v495_v1 = vmax.f32 %v481_v60, 0.0  ;;  %v375_v13 = vsub.f32 %v11363_v29, %v11342_v53  ;;  %v7544_v45 = vld [vmem:[#allocation2 + $0x20] sm:$0xf]  ;;  %v10313_v60 = vld [vmem:[#allocation11 + $0x3f8] sm:$0xff] }
  0x7c   :  { %5080 = vmatpush.bf16.msrb.mxu2 %v10234_v21  ;;  %v409_v21 = vmul.f32 %v395_v12, %v366_v0  ;;  %v422_v26 = vmul.f32 %v408_v17, %v408_v17  ;;  %v488_v0 = vmax.f32 %v474_v51, 0.0  ;;  %v501_v6 = vmul.f32 %v487_v63, %v458_v58 }
  0x7d   :  { %5094 = vmatpush.bf16.msrb.mxu3 %v10242_v30  ;;  %5053 = vmatmul.bf16.vlgmr.msrb.gmra.mxu0 %v7529_v61  ;;  %v427_v31 = vpack.c.bf16 %v416_v25, %v415_v20  ;;  %v346_v61 = vsub.f32 %v11342_v53, %v11338_v43  ;;  %v389_v25 = vmax.f32 %v375_v13, 0.0  ;;  %v447_v13 = vsub.f32 %v11293_v36, %v11411_v41 }
  0x7e   :  { %5101 = vmatpush.bf16.msra.mxu0 %v10257_v38  ;;  %5067 = vmatmul.bf16.vlgmr.msrb.gmra.mxu1 %v7533_v2  ;;  %v423_v30 = vmul.f32 %v409_v21, %v409_v21  ;;  %v10262_v38 = vld [vmem:[#allocation11 + $0x260] sm:$0xff]  ;;  %v10252_v2 = vld [vmem:[#allocation11 + $0x210] sm:$0xff]  ;;  %v502_v7 = vmul.f32 %v488_v0, %v459_v59  ;;  %v10305_v59 = vld [vmem:[#allocation11 + $0x3b8] sm:$0xff] }
  0x7f   :  { %5115 = vmatpush.bf16.msra.mxu1 %v10265_v46  ;;  %5081 = vmatmul.bf16.vlgmr.msrb.gmra.mxu2 %v7537_v62  ;;  %435 = vst [vmem:[#allocation2 + $0x2c] sm:$0xff] %v427_v31  ;;  %v451_v46 = vsub.f32 %v11273_v24, %v11411_v41  ;;  %v353_v24 = vsub.f32 %v11344_v54, %v11338_v43  ;;  %v360_v12 = vmax.f32 %v346_v61, 0.0  ;;  %v10267_v31 = vld [vmem:[#allocation11 + $0x288] sm:$0xff]  ;;  %v10134_v52 = vld [vmem:[#allocation2 + $0x24] sm:$0xf] }
  0x80   :  { %5129 = vmatpush.bf16.msra.mxu2 %v10273_v56  ;;  %5095 = vmatmul.bf16.vlgmr.msrb.gmra.mxu3 %v7541_v8  ;;  %v431_v34 = vpack.c.bf16 %v423_v30, %v422_v26  ;;  %v10269_v56 = vld [vmem:[#allocation11 + $0x298] sm:$0xff]  ;;  %v10276_v8 = vld [vmem:[#allocation11 + $0x2d0] sm:$0xff]  ;;  %v382_v43 = vsub.f32 %v11363_v29, %v11344_v54  ;;  %v10251_v26 = vld [vmem:[#allocation11 + $0x208] sm:$0xff] }
  0x81   :  { %5143 = vmatpush.bf16.msra.mxu3 %v10281_v57  ;;  %v10277_v57 = vld [vmem:[#allocation11 + $0x2d8] sm:$0xff]  ;;  %v465_v62 = vmax.f32 %v451_v46, 0.0  ;;  %v367_v17 = vmax.f32 %v353_v24, 0.0  ;;  %v10266_v54 = vld [vmem:[#allocation11 + $0x280] sm:$0xff]  ;;  %v10162_v46 = vld [vmem:[#allocation2 + $0xfc] sm:$0xf0] }
  0x82   :  { %5102 = vmatpush.bf16.msra.mxu0 %v10256_v9  ;;  %439 = vst [vmem:[#allocation2 + $0x10c] sm:$0xff] %v431_v34  ;;  %v396_v30 = vmax.f32 %v382_v43, 0.0  ;;  %v10250_v34 = vld [vmem:[#allocation11 + $0x200] sm:$0xff]  ;;  %v7546_v55 = vld [vmem:[#allocation2 + $0x100] sm:$0xf0]  ;;  %v7545_v61 = vor.u32 %v10162_v46, %v7544_v45  ;;  %v10293_v43 = vld [vmem:[#allocation11 + $0x358] sm:$0xff] }
  0x83   :  { %5116 = vmatpush.bf16.msra.mxu1 %v10264_v11  ;;  %v508_v9 = vmul.f32 %v494_v23, %v465_v62  ;;  %v509_v11 = vmul.f32 %v495_v1, %v466_v22  ;;  %v10274_v29 = vld [vmem:[#allocation11 + $0x2c0] sm:$0xff]  ;;  %v7549_v22 = vor.u32 %v10134_v52, %v7546_v55  ;;  %v10288_v0 = vld [vmem:[#allocation11 + $0x330] sm:$0xff] }
  0x84   :  { %5130 = vmatpush.bf16.msra.mxu2 %v10272_v14  ;;  %v515_v14 = vmul.f32 %v501_v6, %v501_v6  ;;  %v10296_v23 = vld [vmem:[#allocation11 + $0x370] sm:$0xff]  ;;  %v10303_v6 = vld [vmem:[#allocation11 + $0x3a8] sm:$0xff] }
  0x85   :  { %5144 = vmatpush.bf16.msra.mxu3 %v10280_v15  ;;  %v516_v15 = vmul.f32 %v502_v7, %v502_v7  ;;  %v522_v20 = vmul.f32 %v508_v9, %v508_v9  ;;  %v523_v21 = vmul.f32 %v509_v11, %v509_v11  ;;  %v10304_v1 = vld [vmem:[#allocation11 + $0x3b0] sm:$0xff]  ;;  %v10311_v7 = vld [vmem:[#allocation11 + $0x3e8] sm:$0xff]  ;;  %v10302_v9 = vld [vmem:[#allocation11 + $0x3a0] sm:$0xff] }
  0x86   :  { %5103 = vmatpush.bf16.msra.mxu0 %v10255_v28  ;;  %v10259_v28 = vld [vmem:[#allocation11 + $0x248] sm:$0xff]  ;;  %v10312_v24 = vld [vmem:[#allocation11 + $0x3f0] sm:$0xff]  ;;  %v10310_v11 = vld [vmem:[#allocation11 + $0x3e0] sm:$0xff] }
  0x87   :  { %5117 = vmatpush.bf16.msra.mxu1 %v10263_v18  ;;  %v529_v18 = vpack.c.bf16 %v516_v15, %v515_v14  ;;  %v533_v53 = vpack.c.bf16 %v523_v21, %v522_v20  ;;  %v453_v14 = vsub.f32 %v11295_v37, %v11411_v41  ;;  %v454_v15 = vsub.f32 %v11299_v48, %v11411_v41  ;;  %v10308_v45 = vld [vmem:[#allocation11 + $0x3d0] sm:$0xff] }
  0x88   :  { %5131 = vmatpush.bf16.msra.mxu2 %v10271_v32  ;;  %v10275_v32 = vld [vmem:[#allocation11 + $0x2c8] sm:$0xff]  ;;  %v475_v20 = vsub.f32 %v11413_v42, %v11291_v35  ;;  %v476_v21 = vsub.f32 %v11413_v42, %v11293_v36  ;;  %v448_v36 = vsub.f32 %v11311_v4, %v11411_v41 }
  0x89   :  { %5145 = vmatpush.bf16.msra.mxu3 %v10279_v33  ;;  %v403_v33 = vmul.f32 %v389_v25, %v360_v12  ;;  %537 = vst [vmem:[#allocation2 + $0x38] sm:$0xff] %v529_v18  ;;  %v446_v12 = vsub.f32 %v11291_v35, %v11411_v41  ;;  %v482_v25 = vsub.f32 %v11413_v42, %v11295_v37 }
  0x8a   :  { %5104 = vmatpush.bf16.msra.mxu0 %v10254_v19  ;;  %v410_v19 = vmul.f32 %v396_v30, %v367_v17  ;;  %541 = vst [vmem:[#allocation2 + $0x118] sm:$0xff] %v533_v53  ;;  %v10285_v17 = vld [vmem:[#allocation11 + $0x318] sm:$0xff]  ;;  %v461_v30 = vmax.f32 %v447_v13, 0.0  ;;  %v468_v53 = vmax.f32 %v454_v15, 0.0  ;;  %v449_v37 = vsub.f32 %v11313_v5, %v11411_v41  ;;  %v10164_v13 = vld [vmem:[#allocation2 + $0x10c] sm:$0xf0] }
  0x8b   :  { %5118 = vmatpush.bf16.msra.mxu1 %v10262_v38  ;;  %v10258_v38 = vld [vmem:[#allocation11 + $0x240] sm:$0xff]  ;;  %v460_v18 = vmax.f32 %v446_v12, 0.0  ;;  %v496_v35 = vmax.f32 %v482_v25, 0.0 }
  0x8c   :  { %5132 = vmatpush.bf16.msra.mxu2 %v10270_v39  ;;  %v417_v39 = vmul.f32 %v403_v33, %v403_v33  ;;  %v424_v47 = vmul.f32 %v410_v19, %v410_v19  ;;  %v489_v33 = vmax.f32 %v475_v20, 0.0  ;;  %v463_v55 = vmax.f32 %v449_v37, 0.0  ;;  %v7560_v12 = vld [vmem:[#allocation2 + $0x30] sm:$0xf] }
  0x8d   :  { %5146 = vmatpush.bf16.msra.mxu3 %v10278_v40  ;;  %v10289_v40 = vld [vmem:[#allocation11 + $0x338] sm:$0xff] }
  0x8e   :  { %5105 = vmatpush.bf16.msra.mxu0 %v10253_v49  ;;  %v7552_v49 = vld [vmem:[#allocation2 + $0x28] sm:$0xf]  ;;  %v428_v51 = vpack.c.bf16 %v417_v39, %v417_v39  ;;  %v432_v58 = vpack.c.bf16 %v424_v47, %v424_v47  ;;  %v503_v39 = vmul.f32 %v489_v33, %v460_v18  ;;  %v456_v47 = vsub.f32 %v11325_v16, %v11411_v41 }
  0x8f   :  { %5119 = vmatpush.bf16.msra.mxu1 %v10261_v50  ;;  %v10163_v50 = vld [vmem:[#allocation2 + $0x104] sm:$0xf0] }
  0x90   :  { %5133 = vmatpush.bf16.msra.mxu2 %v10269_v56  ;;  %v10135_v56 = vld [vmem:[#allocation2 + $0x2c] sm:$0xf]  ;;  %436 = vst [vmem:[#allocation2 + $0x34] sm:$0xf] %v428_v51  ;;  %v7553_v62 = vor.u32 %v10163_v50, %v7552_v49  ;;  %v462_v49 = vmax.f32 %v448_v36, 0.0  ;;  %v517_v50 = vmul.f32 %v503_v39, %v503_v39  ;;  %v10344_v39 = vld [vmem:[#allocation11 + $0x4f0] sm:$0xff] }
  0x91   :  { %5147 = vmatpush.bf16.msra.mxu3 %v10277_v57  ;;  %v7554_v57 = vld [vmem:[#allocation2 + $0x108] sm:$0xf0]  ;;  %440 = vst [vmem:[#allocation2 + $0x114] sm:$0xf] %v432_v58  ;;  %v477_v58 = vsub.f32 %v11413_v42, %v11311_v4  ;;  %v10137_v20 = vld [vmem:[#allocation2 + $0x3c] sm:$0xf] }
  0x92   :  { %5106 = vmatpush.bf16.msra.mxu0 %v10252_v2  ;;  %v7557_v63 = vor.u32 %v10135_v56, %v7554_v57  ;;  %v10287_v2 = vld [vmem:[#allocation11 + $0x328] sm:$0xff] }
  0x93   :  { %5120 = vmatpush.bf16.msra.mxu1 %v10260_v3  ;;  %v10295_v3 = vld [vmem:[#allocation11 + $0x368] sm:$0xff] }
  0x94   :  { %5134 = vmatpush.bf16.msra.mxu2 %v10268_v27  ;;  %v10286_v27 = vld [vmem:[#allocation11 + $0x320] sm:$0xff]  ;;  %v7570_v18 = vld [vmem:[#allocation2 + $0x118] sm:$0xf0] }
  0x95   :  { %5148 = vmatpush.bf16.msra.mxu3 %v10276_v8  ;;  %v10294_v8 = vld [vmem:[#allocation11 + $0x360] sm:$0xff]  ;;  %v7573_v37 = vor.u32 %v10137_v20, %v7570_v18  ;;  %v10332_v20 = vld [vmem:[#allocation11 + $0x490] sm:$0xff] }
  0x96   :  { %5107 = vmatpush.bf16.msra.mxu0 %v10251_v26  ;;  %v10301_v26 = vld [vmem:[#allocation11 + $0x398] sm:$0xff]  ;;  %v11511_v18 = vld [vmem:[#allocation4 + $0x10] sm:$0xff] }
  0x97   :  { %5121 = vmatpush.bf16.msra.mxu1 %v10259_v28  ;;  %v10309_v28 = vld [vmem:[#allocation11 + $0x3d8] sm:$0xff] }
  0x98   :  { %5135 = vmatpush.bf16.msra.mxu2 %v10267_v31  ;;  %v467_v31 = vmax.f32 %v453_v14, 0.0 }
  0x99   :  { %5149 = vmatpush.bf16.msra.mxu3 %v10275_v32  ;;  %v483_v32 = vsub.f32 %v11413_v42, %v11299_v48 }
  0x9a   :  { %5108 = vmatpush.bf16.msra.mxu0 %v10250_v34  ;;  %v490_v34 = vmax.f32 %v476_v21, 0.0 }
  0x9b   :  { %5122 = vmatpush.bf16.msra.mxu1 %v10258_v38  ;;  %v497_v19 = vmax.f32 %v483_v32, 0.0  ;;  %v455_v38 = vsub.f32 %v11319_v10, %v11411_v41  ;;  %v10337_v32 = vld [vmem:[#allocation11 + $0x4b8] sm:$0xff] }
  0x9c   :  { %5136 = vmatpush.bf16.msra.mxu2 %v10266_v54  ;;  %v10284_v54 = vld [vmem:[#allocation11 + $0x310] sm:$0xff]  ;;  %v504_v48 = vmul.f32 %v490_v34, %v461_v30  ;;  %v7561_v34 = vor.u32 %v10164_v13, %v7560_v12 }
  0x9d   :  { %5150 = vmatpush.bf16.msra.mxu3 %v10274_v29  ;;  %5109 = vmatmul.bf16.vlgmr.msra.gmra.mxu0 %v7545_v61  ;;  %v10292_v29 = vld [vmem:[#allocation11 + $0x350] sm:$0xff]  ;;  %v511_v46 = vmul.f32 %v497_v19, %v468_v53  ;;  %v469_v57 = vmax.f32 %v455_v38, 0.0  ;;  %v10291_v61 = vld [vmem:[#allocation11 + $0x348] sm:$0xff]  ;;  %v10345_v53 = vld [vmem:[#allocation11 + $0x4f8] sm:$0xff] }
  0x9e   :  { %5157 = vmatpush.bf16.msrb.mxu0 %v10289_v40  ;;  %5123 = vmatmul.bf16.vlgmr.msra.gmra.mxu1 %v7549_v22  ;;  %v510_v40 = vmul.f32 %v496_v35, %v467_v31  ;;  %v518_v52 = vmul.f32 %v504_v48, %v504_v48  ;;  %v470_v22 = vmax.f32 %v456_v47, 0.0  ;;  %v10320_v38 = vld [vmem:[#allocation11 + $0x430] sm:$0xff]  ;;  %v10319_v48 = vld [vmem:[#allocation11 + $0x428] sm:$0xff]  ;;  %v10326_v47 = vld [vmem:[#allocation11 + $0x460] sm:$0xff] }
  0x9f   :  { %5171 = vmatpush.bf16.msrb.mxu1 %v10297_v44  ;;  %5137 = vmatmul.bf16.vlgmr.msra.gmra.mxu2 %v7553_v62  ;;  %v10300_v44 = vld [vmem:[#allocation11 + $0x390] sm:$0xff]  ;;  %v525_v56 = vmul.f32 %v511_v46, %v511_v46  ;;  %v10318_v46 = vld [vmem:[#allocation11 + $0x420] sm:$0xff] }
  0xa0   :  { %5185 = vmatpush.bf16.msrb.mxu2 %v10305_v59  ;;  %5151 = vmatmul.bf16.vlgmr.msra.gmra.mxu3 %v7557_v63  ;;  %v524_v51 = vmul.f32 %v510_v40, %v510_v40  ;;  %v478_v59 = vsub.f32 %v11413_v42, %v11313_v5  ;;  %v530_v62 = vpack.c.bf16 %v518_v52, %v517_v50  ;;  %v10282_v5 = vld [vmem:[#allocation11 + $0x300] sm:$0xff]  ;;  %v10327_v40 = vld [vmem:[#allocation11 + $0x468] sm:$0xff]  ;;  %v11471_v52 = vstv %s7500_s3  ;;  %v10316_v12 = vld [vmem:[#allocation11 + $0x410] sm:$0xff]  ;;  %s12088_s3 = sld [smem:[#allocation20 + $0x2]] }
  0xa1   :  { %5199 = vmatpush.bf16.msrb.mxu3 %v10313_v60  ;;  %v10283_v60 = vld [vmem:[#allocation11 + $0x308] sm:$0xff]  ;;  %v484_v63 = vsub.f32 %v11413_v42, %v11319_v10  ;;  %v10342_v50 = vld [vmem:[#allocation11 + $0x4e0] sm:$0xff]  ;;  %v10324_v13 = vld [vmem:[#allocation11 + $0x450] sm:$0xff] }
  0xa2   :  { %5158 = vmatpush.bf16.msrb.mxu0 %v10288_v0  ;;  %v485_v0 = vsub.f32 %v11413_v42, %v11325_v16  ;;  %v534_v4 = vpack.c.bf16 %v525_v56, %v524_v51  ;;  %538 = vst [vmem:[#allocation2 + $0x40] sm:$0xff] %v530_v62  ;;  %v10321_v16 = vld [vmem:[#allocation11 + $0x438] sm:$0xff]  ;;  %v11473_v51 = vld [vmem:[#allocation4 + $0x30] sm:$0xff]  ;;  %v11485_v62 = vld [vmem:[#allocation4] sm:$0xff] }
  0xa3   :  { %5172 = vmatpush.bf16.msrb.mxu1 %v10296_v23  ;;  %v10299_v23 = vld [vmem:[#allocation11 + $0x388] sm:$0xff]  ;;  %v11477_v56 = vld [vmem:[#allocation4 + $0x68] sm:$0xff] }
  0xa4   :  { %5186 = vmatpush.bf16.msrb.mxu2 %v10304_v1  ;;  %v10307_v1 = vld [vmem:[#allocation11 + $0x3c8] sm:$0xff]  ;;  %542 = vst [vmem:[#allocation2 + $0x120] sm:$0xff] %v534_v4  ;;  %v10341_v4 = vld [vmem:[#allocation11 + $0x4d8] sm:$0xff] }
  0xa5   :  { %5200 = vmatpush.bf16.msrb.mxu3 %v10312_v24  ;;  %v491_v24 = vmax.f32 %v477_v58, 0.0  ;;  %v479_v58 = vsub.f32 %v11413_v42, %v11473_v51 }
  0xa6   :  { %5159 = vmatpush.bf16.msrb.mxu0 %v10287_v2  ;;  %v492_v2 = vmax.f32 %v478_v59, 0.0  ;;  %v486_v59 = vsub.f32 %v11413_v42, %v11477_v56  ;;  %v11497_v42 = vstv %s7501_s17  ;;  %s12090_s17 = sld [smem:[#allocation21 + $0x2]] }
  0xa7   :  { %5173 = vmatpush.bf16.msrb.mxu1 %v10295_v3  ;;  %v498_v3 = vmax.f32 %v484_v63, 0.0  ;;  %v11489_v63 = vld [vmem:[#allocation4 + $0x8] sm:$0xff] }
  0xa8   :  { %5187 = vmatpush.bf16.msrb.mxu2 %v10303_v6  ;;  %v499_v6 = vmax.f32 %v485_v0, 0.0  ;;  %v506_v10 = vmul.f32 %v492_v2, %v463_v55  ;;  %v450_v55 = vsub.f32 %v11473_v51, %v11411_v41  ;;  %v11493_v0 = vld [vmem:[#allocation4 + $0x38] sm:$0xff] }
  0xa9   :  { %5201 = vmatpush.bf16.msrb.mxu3 %v10311_v7  ;;  %v10290_v7 = vld [vmem:[#allocation11 + $0x340] sm:$0xff]  ;;  %v512_v14 = vmul.f32 %v498_v3, %v469_v57  ;;  %v457_v57 = vsub.f32 %v11477_v56, %v11411_v41  ;;  %v549_v41 = vsub.f32 %v11489_v63, %v11471_v52  ;;  %v11499_v3 = vld [vmem:[#allocation4 + $0x40] sm:$0xff] }
  0xaa   :  { %5160 = vmatpush.bf16.msrb.mxu0 %v10286_v27  ;;  %v10298_v27 = vld [vmem:[#allocation11 + $0x380] sm:$0xff]  ;;  %v513_v15 = vmul.f32 %v499_v6, %v470_v22  ;;  %v520_v25 = vmul.f32 %v506_v10, %v506_v10  ;;  %v548_v22 = vsub.f32 %v11485_v62, %v11471_v52  ;;  %v556_v6 = vsub.f32 %v11499_v3, %v11471_v52 }
  0xab   :  { %5174 = vmatpush.bf16.msrb.mxu1 %v10294_v8  ;;  %v10306_v8 = vld [vmem:[#allocation11 + $0x3c0] sm:$0xff]  ;;  %v526_v30 = vmul.f32 %v512_v14, %v512_v14  ;;  %v471_v2 = vmax.f32 %v457_v57, 0.0 }
  0xac   :  { %5188 = vmatpush.bf16.msrb.mxu2 %v10302_v9  ;;  %v505_v9 = vmul.f32 %v491_v24, %v462_v49  ;;  %v527_v31 = vmul.f32 %v513_v15, %v513_v15  ;;  %v10334_v49 = vld [vmem:[#allocation11 + $0x4a0] sm:$0xff]  ;;  %v464_v24 = vmax.f32 %v450_v55, 0.0  ;;  %v570_v15 = vmax.f32 %v556_v6, 0.0 }
  0xad   :  { %5202 = vmatpush.bf16.msrb.mxu3 %v10310_v11  ;;  %v10329_v11 = vld [vmem:[#allocation11 + $0x478] sm:$0xff]  ;;  %v10314_v55 = vld [vmem:[#allocation11 + $0x400] sm:$0xff] }
  0xae   :  { %5161 = vmatpush.bf16.msrb.mxu0 %v10285_v17  ;;  %v7568_v17 = vld [vmem:[#allocation2 + $0x38] sm:$0xf]  ;;  %v519_v21 = vmul.f32 %v505_v9, %v505_v9  ;;  %v535_v19 = vpack.c.bf16 %v527_v31, %v526_v30  ;;  %v550_v30 = vsub.f32 %v11511_v18, %v11471_v52  ;;  %v10322_v57 = vld [vmem:[#allocation11 + $0x440] sm:$0xff] }
  0xaf   :  { %5175 = vmatpush.bf16.msrb.mxu1 %v10293_v43  ;;  %v10165_v43 = vld [vmem:[#allocation2 + $0x114] sm:$0xf0] }
  0xb0   :  { %5189 = vmatpush.bf16.msrb.mxu2 %v10301_v26  ;;  %v10136_v26 = vld [vmem:[#allocation2 + $0x34] sm:$0xf]  ;;  %v531_v33 = vpack.c.bf16 %v520_v25, %v519_v21  ;;  %v7569_v35 = vor.u32 %v10165_v43, %v7568_v17  ;;  %543 = vst [vmem:[#allocation2 + $0x128] sm:$0xff] %v535_v19  ;;  %v584_v17 = vsub.f32 %v11497_v42, %v11493_v0  ;;  %v10340_v21 = vld [vmem:[#allocation11 + $0x4d0] sm:$0xff] }
  0xb1   :  { %5203 = vmatpush.bf16.msrb.mxu3 %v10309_v28  ;;  %v7562_v28 = vld [vmem:[#allocation2 + $0x110] sm:$0xf0]  ;;  %v585_v43 = vsub.f32 %v11497_v42, %v11499_v3 }
  0xb2   :  { %5162 = vmatpush.bf16.msrb.mxu0 %v10284_v54  ;;  %v7565_v36 = vor.u32 %v10136_v26, %v7562_v28  ;;  %539 = vst [vmem:[#allocation2 + $0x48] sm:$0xff] %v531_v33  ;;  %v10328_v54 = vld [vmem:[#allocation11 + $0x470] sm:$0xff]  ;;  %v11515_v33 = vld [vmem:[#allocation4 + $0x18] sm:$0xff] }
  0xb3   :  { %5176 = vmatpush.bf16.msrb.mxu1 %v10292_v29  ;;  %v10336_v29 = vld [vmem:[#allocation11 + $0x4b0] sm:$0xff]  ;;  %v580_v6 = vsub.f32 %v11497_v42, %v11515_v33 }
  0xb4   :  { %5190 = vmatpush.bf16.msrb.mxu2 %v10300_v44  ;;  %v10335_v44 = vld [vmem:[#allocation11 + $0x4a8] sm:$0xff] }
  0xb5   :  { %5204 = vmatpush.bf16.msrb.mxu3 %v10308_v45  ;;  %v10343_v45 = vld [vmem:[#allocation11 + $0x4e8] sm:$0xff] }
  0xb6   :  { %5163 = vmatpush.bf16.msrb.mxu0 %v10283_v60  ;;  %v10317_v60 = vld [vmem:[#allocation11 + $0x418] sm:$0xff] }
  0xb7   :  { %5177 = vmatpush.bf16.msrb.mxu1 %v10291_v61  ;;  %v10325_v61 = vld [vmem:[#allocation11 + $0x458] sm:$0xff] }
  0xb8   :  { %5191 = vmatpush.bf16.msrb.mxu2 %v10299_v23  ;;  %v555_v23 = vsub.f32 %v11493_v0, %v11471_v52 }
  0xb9   :  { %5205 = vmatpush.bf16.msrb.mxu3 %v10307_v1  ;;  %v10333_v1 = vld [vmem:[#allocation11 + $0x498] sm:$0xff] }
  0xba   :  { %5164 = vmatpush.bf16.msrb.mxu0 %v10282_v5  ;;  %v493_v5 = vmax.f32 %v479_v58, 0.0  ;;  %v569_v10 = vmax.f32 %v555_v23, 0.0  ;;  %v7576_v58 = vld [vmem:[#allocation2 + $0x40] sm:$0xf]  ;;  %v10330_v23 = vld [vmem:[#allocation11 + $0x480] sm:$0xff] }
  0xbb   :  { %5178 = vmatpush.bf16.msrb.mxu1 %v10290_v7  ;;  %v500_v7 = vmax.f32 %v486_v59, 0.0  ;;  %v10166_v59 = vld [vmem:[#allocation2 + $0x11c] sm:$0xf0] }
  0xbc   :  { %5192 = vmatpush.bf16.msrb.mxu2 %v10298_v27  ;;  %v562_v27 = vmax.f32 %v548_v22, 0.0  ;;  %v507_v9 = vmul.f32 %v493_v5, %v464_v24  ;;  %v564_v22 = vmax.f32 %v550_v30, 0.0  ;;  %v579_v5 = vsub.f32 %v11497_v42, %v11511_v18 }
  0xbd   :  { %5206 = vmatpush.bf16.msrb.mxu3 %v10306_v8  ;;  %5165 = vmatmul.bf16.vlgmr.msrb.gmra.mxu0 %v7561_v34  ;;  %v563_v8 = vmax.f32 %v549_v41, 0.0  ;;  %v514_v14 = vmul.f32 %v500_v7, %v471_v2  ;;  %v551_v34 = vsub.f32 %v11515_v33, %v11471_v52  ;;  %v10338_v7 = vld [vmem:[#allocation11 + $0x4c0] sm:$0xff] }
  0xbe   :  { %5213 = vmatpush.bf16.msra.mxu0 %v10321_v16  ;;  %5179 = vmatmul.bf16.vlgmr.msrb.gmra.mxu1 %v7565_v36  ;;  %v577_v16 = vsub.f32 %v11497_v42, %v11485_v62  ;;  %v521_v25 = vmul.f32 %v507_v9, %v507_v9 }
  0xbf   :  { %5227 = vmatpush.bf16.msra.mxu1 %v10329_v11  ;;  %5193 = vmatmul.bf16.vlgmr.msrb.gmra.mxu2 %v7569_v35  ;;  %v578_v11 = vsub.f32 %v11497_v42, %v11489_v63  ;;  %v528_v31 = vmul.f32 %v514_v14, %v514_v14  ;;  %v565_v41 = vmax.f32 %v551_v34, 0.0  ;;  %v593_v14 = vmax.f32 %v579_v5, 0.0  ;;  %v11547_v5 = vld [vmem:[#allocation4 + $0x60] sm:$0xff] }
  0xc0   :  { %5241 = vmatpush.bf16.msra.mxu2 %v10337_v32  ;;  %5207 = vmatmul.bf16.vlgmr.msrb.gmra.mxu3 %v7573_v37  ;;  %v591_v26 = vmax.f32 %v577_v16, 0.0  ;;  %v598_v32 = vmax.f32 %v584_v17, 0.0  ;;  %v532_v35 = vpack.c.bf16 %v521_v25, %v521_v25  ;;  %v11519_v37 = vld [vmem:[#allocation4 + $0x48] sm:$0xff] }
  0xc1   :  { %5255 = vmatpush.bf16.msra.mxu3 %v10345_v53  ;;  %v592_v28 = vmax.f32 %v578_v11, 0.0  ;;  %v599_v53 = vmax.f32 %v585_v43, 0.0  ;;  %v586_v16 = vsub.f32 %v11497_v42, %v11519_v37  ;;  %v10361_v17 = vld [vmem:[#allocation11 + $0x578] sm:$0xff] }
  0xc2   :  { %5214 = vmatpush.bf16.msra.mxu0 %v10320_v38  ;;  %v605_v19 = vmul.f32 %v591_v26, %v562_v27  ;;  %v557_v38 = vsub.f32 %v11519_v37, %v11471_v52  ;;  %540 = vst [vmem:[#allocation2 + $0x50] sm:$0xf] %v532_v35  ;;  %v7584_v27 = vld [vmem:[#allocation2 + $0x48] sm:$0xf]  ;;  %v7586_v43 = vld [vmem:[#allocation2 + $0x128] sm:$0xf0] }
  0xc3   :  { %5228 = vmatpush.bf16.msra.mxu1 %v10328_v54  ;;  %v606_v36 = vmul.f32 %v592_v28, %v563_v8  ;;  %v10315_v54 = vld [vmem:[#allocation11 + $0x408] sm:$0xff]  ;;  %v10139_v8 = vld [vmem:[#allocation2 + $0x4c] sm:$0xf]  ;;  %v7577_v28 = vor.u32 %v10166_v59, %v7576_v58  ;;  %v10350_v58 = vld [vmem:[#allocation11 + $0x520] sm:$0xff] }
  0xc4   :  { %5242 = vmatpush.bf16.msra.mxu2 %v10336_v29  ;;  %v10323_v29 = vld [vmem:[#allocation11 + $0x448] sm:$0xff]  ;;  %v571_v2 = vmax.f32 %v557_v38, 0.0  ;;  %v10369_v25 = vld [vmem:[#allocation11 + $0x5b8] sm:$0xff]  ;;  %v10358_v59 = vld [vmem:[#allocation11 + $0x560] sm:$0xff] }
  0xc5   :  { %5256 = vmatpush.bf16.msra.mxu3 %v10344_v39  ;;  %v536_v39 = vpack.c.bf16 %v528_v31, %v528_v31  ;;  %v10377_v26 = vld [vmem:[#allocation11 + $0x5f8] sm:$0xff]  ;;  %v607_v31 = vmul.f32 %v593_v14, %v564_v22  ;;  %v10798_v22 = vld [vmem:[#allocation13] ss:$0 sm:$0xff] }
  0xc6   :  { %5215 = vmatpush.bf16.msra.mxu0 %v10319_v48  ;;  %v612_v48 = vmul.f32 %v598_v32, %v569_v10 }
  0xc7   :  { %5229 = vmatpush.bf16.msra.mxu1 %v10327_v40  ;;  %v613_v40 = vmul.f32 %v599_v53, %v570_v15  ;;  %544 = vst [vmem:[#allocation2 + $0x130] sm:$0xf] %v536_v39  ;;  %v594_v15 = vmax.f32 %v580_v6, 0.0  ;;  %v560_v6 = vsub.f32 %v11547_v5, %v11471_v52 }
  0xc8   :  { %5243 = vmatpush.bf16.msra.mxu2 %v10335_v44  ;;  %v10331_v44 = vld [vmem:[#allocation11 + $0x488] sm:$0xff] }
  0xc9   :  { %5257 = vmatpush.bf16.msra.mxu3 %v10343_v45  ;;  %v10339_v45 = vld [vmem:[#allocation11 + $0x4c8] sm:$0xff]  ;;  %v608_v32 = vmul.f32 %v594_v15, %v565_v41  ;;  %v11535_v41 = vld [vmem:[#allocation4 + $0x20] sm:$0xff] }
  0xca   :  { %5216 = vmatpush.bf16.msra.mxu0 %v10318_v46  ;;  %v619_v46 = vmul.f32 %v605_v19, %v605_v19  ;;  %v7589_v19 = vor.u32 %v10139_v8, %v7586_v43  ;;  %v574_v43 = vmax.f32 %v560_v6, 0.0 }
  0xcb   :  { %5230 = vmatpush.bf16.msra.mxu1 %v10326_v47  ;;  %v620_v47 = vmul.f32 %v606_v36, %v606_v36  ;;  %v621_v36 = vmul.f32 %v607_v31, %v607_v31  ;;  %v622_v38 = vmul.f32 %v608_v32, %v608_v32  ;;  %v561_v31 = vsub.f32 %v11477_v56, %v11471_v52  ;;  %v10348_v32 = vld [vmem:[#allocation11 + $0x510] sm:$0xff] }
  0xcc   :  { %5244 = vmatpush.bf16.msra.mxu2 %v10334_v49  ;;  %v11523_v49 = vld [vmem:[#allocation4 + $0x50] sm:$0xff] }
  0xcd   :  { %5258 = vmatpush.bf16.msra.mxu3 %v10342_v50  ;;  %v558_v50 = vsub.f32 %v11523_v49, %v11471_v52  ;;  %v633_v24 = vpack.c.bf16 %v620_v47, %v619_v46  ;;  %v587_v11 = vsub.f32 %v11497_v42, %v11523_v49  ;;  %v10351_v47 = vld [vmem:[#allocation11 + $0x528] sm:$0xff] }
  0xce   :  { %5217 = vmatpush.bf16.msra.mxu0 %v10317_v60  ;;  %v626_v60 = vmul.f32 %v612_v48, %v612_v48 }
  0xcf   :  { %5231 = vmatpush.bf16.msra.mxu1 %v10325_v61  ;;  %v627_v61 = vmul.f32 %v613_v40, %v613_v40  ;;  %v572_v10 = vmax.f32 %v558_v50, 0.0  ;;  %641 = vst [vmem:[#allocation2 + $0x54] sm:$0xff] %v633_v24  ;;  %v10368_v40 = vld [vmem:[#allocation11 + $0x5b0] sm:$0xff]  ;;  %v10359_v50 = vld [vmem:[#allocation11 + $0x568] sm:$0xff] }
  0xd0   :  { %5245 = vmatpush.bf16.msra.mxu2 %v10333_v1  ;;  %v10138_v1 = vld [vmem:[#allocation2 + $0x44] sm:$0xf]  ;;  %v11543_v24 = vld [vmem:[#allocation4 + $0x58] sm:$0xff] }
  0xd1   :  { %5259 = vmatpush.bf16.msra.mxu3 %v10341_v4  ;;  %v7578_v4 = vld [vmem:[#allocation2 + $0x120] sm:$0xf0]  ;;  %v637_v9 = vpack.c.bf16 %v627_v61, %v626_v60  ;;  %v10366_v60 = vld [vmem:[#allocation11 + $0x5a0] sm:$0xff] }
  0xd2   :  { %5218 = vmatpush.bf16.msra.mxu0 %v10316_v12  ;;  %v10353_v12 = vld [vmem:[#allocation11 + $0x538] sm:$0xff]  ;;  %v7581_v30 = vor.u32 %v10138_v1, %v7578_v4  ;;  %v10374_v61 = vld [vmem:[#allocation11 + $0x5e0] sm:$0xff] }
  0xd3   :  { %5232 = vmatpush.bf16.msra.mxu1 %v10324_v13  ;;  %v10167_v13 = vld [vmem:[#allocation2 + $0x124] sm:$0xf0]  ;;  %645 = vst [vmem:[#allocation2 + $0x134] sm:$0xff] %v637_v9  ;;  %v581_v9 = vsub.f32 %v11497_v42, %v11535_v41 }
  0xd4   :  { %5246 = vmatpush.bf16.msra.mxu2 %v10332_v20  ;;  %v600_v20 = vmax.f32 %v586_v16, 0.0  ;;  %v7585_v53 = vor.u32 %v10167_v13, %v7584_v27  ;;  %v11539_v1 = vld [vmem:[#allocation4 + $0x28] sm:$0xff] }
  0xd5   :  { %5260 = vmatpush.bf16.msra.mxu3 %v10340_v21  ;;  %v601_v21 = vmax.f32 %v587_v11, 0.0  ;;  %v553_v4 = vsub.f32 %v11539_v1, %v11471_v52  ;;  %v10357_v27 = vld [vmem:[#allocation11 + $0x558] sm:$0xff] }
  0xd6   :  { %5219 = vmatpush.bf16.msra.mxu0 %v10315_v54  ;;  %v614_v34 = vmul.f32 %v600_v20, %v571_v2  ;;  %v10352_v54 = vld [vmem:[#allocation11 + $0x530] sm:$0xff]  ;;  %v559_v2 = vsub.f32 %v11543_v24, %v11471_v52  ;;  %v10365_v16 = vld [vmem:[#allocation11 + $0x598] sm:$0xff]  ;;  %v588_v20 = vsub.f32 %v11497_v42, %v11543_v24 }
  0xd7   :  { %5233 = vmatpush.bf16.msra.mxu1 %v10323_v29  ;;  %v615_v35 = vmul.f32 %v601_v21, %v572_v10  ;;  %v10360_v29 = vld [vmem:[#allocation11 + $0x570] sm:$0xff]  ;;  %v582_v10 = vsub.f32 %v11497_v42, %v11539_v1  ;;  %v10373_v11 = vld [vmem:[#allocation11 + $0x5d8] sm:$0xff]  ;;  %v567_v14 = vmax.f32 %v553_v4, 0.0  ;;  %v589_v21 = vsub.f32 %v11497_v42, %v11547_v5 }
  0xd8   :  { %5247 = vmatpush.bf16.msra.mxu2 %v10331_v44  ;;  %v628_v39 = vmul.f32 %v614_v34, %v614_v34  ;;  %v10376_v44 = vld [vmem:[#allocation11 + $0x5f0] sm:$0xff]  ;;  %v573_v15 = vmax.f32 %v559_v2, 0.0  ;;  %v602_v34 = vmax.f32 %v588_v20, 0.0  ;;  %v10354_v2 = vld [vmem:[#allocation11 + $0x540] sm:$0xff] }
  0xd9   :  { %5261 = vmatpush.bf16.msra.mxu3 %v10339_v45  ;;  %v629_v48 = vmul.f32 %v615_v35, %v615_v35  ;;  %v634_v45 = vpack.c.bf16 %v622_v38, %v621_v36  ;;  %v603_v35 = vmax.f32 %v589_v21, 0.0  ;;  %v583_v36 = vsub.f32 %v11497_v42, %v11473_v51  ;;  %v10364_v38 = vld [vmem:[#allocation11 + $0x590] sm:$0xff]  ;;  %v10140_v20 = vld [vmem:[#allocation2 + $0x54] sm:$0xf] }
  0xda   :  { %5220 = vmatpush.bf16.msra.mxu0 %v10314_v55  ;;  %v10367_v55 = vld [vmem:[#allocation11 + $0x5a8] sm:$0xff]  ;;  %v4998_v8 = vpop.f32.mrf.mxu0  ;;  %v7594_v21 = vld [vmem:[#allocation2 + $0x130] sm:$0xf0] }
  0xdb   :  { %5234 = vmatpush.bf16.msra.mxu1 %v10322_v57  ;;  %v638_v46 = vpack.c.bf16 %v629_v48, %v628_v39  ;;  %642 = vst [vmem:[#allocation2 + $0x5c] sm:$0xff] %v634_v45  ;;  %v10375_v57 = vld [vmem:[#allocation11 + $0x5e8] sm:$0xff]  ;;  %v575_v48 = vmax.f32 %v561_v31, 0.0 }
  0xdc   :  { %5248 = vmatpush.bf16.msra.mxu2 %v10330_v23  ;;  %v552_v23 = vsub.f32 %v11535_v41, %v11471_v52 }
  0xdd   :  { %5262 = vmatpush.bf16.msra.mxu3 %v10338_v7  ;;  %5221 = vmatmul.bf16.vlgmr.msra.gmra.mxu0 %v7577_v28  ;;  %646 = vst [vmem:[#allocation2 + $0x13c] sm:$0xff] %v638_v46  ;;  %v10349_v7 = vld [vmem:[#allocation11 + $0x518] sm:$0xff]  ;;  %v596_v28 = vmax.f32 %v582_v10, 0.0  ;;  %v597_v46 = vmax.f32 %v583_v36, 0.0 }
  0xde   :  { %5269 = vmatpush.bf16.msrb.mxu0 %v10353_v12  ;;  %5235 = vmatmul.bf16.vlgmr.msra.gmra.mxu1 %v7581_v30  ;;  %v4999_v12 = vadd.f32 %v10798_v22, %v4998_v8  ;;  %v566_v13 = vmax.f32 %v552_v23, 0.0  ;;  %v554_v30 = vsub.f32 %v11473_v51, %v11471_v52  ;;  %v590_v52 = vsub.f32 %v11497_v42, %v11477_v56  ;;  %v10371_v22 = vld [vmem:[#allocation11 + $0x5c8] sm:$0xff]  ;;  %v10346_v42 = vld [vmem:[#allocation11 + $0x500] sm:$0xff] }
  0xdf   :  { %5283 = vmatpush.bf16.msrb.mxu1 %v10361_v17  ;;  %5249 = vmatmul.bf16.vlgmr.msra.gmra.mxu2 %v7585_v53  ;;  %v5012_v17 = vpop.f32.mrf.mxu1  ;;  %v10356_v53 = vld [vmem:[#allocation11 + $0x550] sm:$0xff]  ;;  %v10370_v8 = vld [vmem:[#allocation11 + $0x5c0] sm:$0xff] }
  0xe0   :  { %5297 = vmatpush.bf16.msrb.mxu2 %v10369_v25  ;;  %5263 = vmatmul.bf16.vlgmr.msra.gmra.mxu3 %v7589_v19  ;;  %v595_v25 = vmax.f32 %v581_v9, 0.0  ;;  %v568_v39 = vmax.f32 %v554_v30, 0.0  ;;  %v7592_v9 = vld [vmem:[#allocation2 + $0x50] sm:$0xf] }
  0xe1   :  { %5311 = vmatpush.bf16.msrb.mxu3 %v10377_v26  ;;  %v11559_v26 = vadd.f32 %v5012_v17, %v4999_v12  ;;  %v10168_v12 = vld [vmem:[#allocation2 + $0x12c] sm:$0xf0]  ;;  %v10169_v17 = vld [vmem:[#allocation2 + $0x134] sm:$0xf0] }
  0xe2   :  { %5270 = vmatpush.bf16.msrb.mxu0 %v10352_v54  ;;  %v609_v19 = vmul.f32 %v595_v25, %v566_v13  ;;  %v10372_v54 = vld [vmem:[#allocation11 + $0x5d0] sm:$0xff]  ;;  %v7600_v13 = vld [vmem:[#allocation2 + $0x58] sm:$0xf]  ;;  %v10141_v30 = vld [vmem:[#allocation2 + $0x5c] sm:$0xf] }
  0xe3   :  { %5284 = vmatpush.bf16.msrb.mxu1 %v10360_v29  ;;  %v610_v29 = vmul.f32 %v596_v28, %v567_v14 }
  0xe4   :  { %5298 = vmatpush.bf16.msrb.mxu2 %v10368_v40  ;;  %v616_v40 = vmul.f32 %v602_v34, %v573_v15  ;;  %v623_v45 = vmul.f32 %v609_v19, %v609_v19  ;;  %v7602_v31 = vld [vmem:[#allocation2 + $0x138] sm:$0xf0]  ;;  %v11570_v34 = vpop.f32.mrf.mxu0  ;;  %v7601_v19 = vor.u32 %v10169_v17, %v7600_v13  ;;  %v10405_v13 = vld [vmem:[#allocation11 + $0x6d8] sm:$0xff] }
  0xe5   :  { %5312 = vmatpush.bf16.msrb.mxu3 %v10376_v44  ;;  %v617_v44 = vmul.f32 %v603_v35, %v574_v43  ;;  %v7593_v35 = vor.u32 %v10168_v12, %v7592_v9  ;;  %v10389_v9 = vld [vmem:[#allocation11 + $0x658] sm:$0xff] }
  0xe6   :  { %5271 = vmatpush.bf16.msrb.mxu0 %v10351_v47  ;;  %v624_v47 = vmul.f32 %v610_v29, %v610_v29  ;;  %v10397_v12 = vld [vmem:[#allocation11 + $0x698] sm:$0xff] }
  0xe7   :  { %5285 = vmatpush.bf16.msrb.mxu1 %v10359_v50  ;;  %v604_v50 = vmax.f32 %v590_v52, 0.0  ;;  %v11572_v29 = vpop.f32.mrf.mxu1  ;;  %v10408_v52 = vld [vmem:[#allocation11 + $0x6f0] sm:$0xff] }
  0xe8   :  { %5299 = vmatpush.bf16.msrb.mxu2 %v10367_v55  ;;  %v10347_v55 = vld [vmem:[#allocation11 + $0x508] sm:$0xff]  ;;  %v635_v23 = vpack.c.bf16 %v624_v47, %v623_v45 }
  0xe9   :  { %5313 = vmatpush.bf16.msrb.mxu3 %v10375_v57  ;;  %v10355_v57 = vld [vmem:[#allocation11 + $0x548] sm:$0xff]  ;;  %v618_v4 = vmul.f32 %v604_v50, %v575_v48  ;;  %v10400_v48 = vld [vmem:[#allocation11 + $0x6b0] sm:$0xff] }
  0xea   :  { %5272 = vmatpush.bf16.msrb.mxu0 %v10350_v58  ;;  %v630_v58 = vmul.f32 %v616_v40, %v616_v40  ;;  %643 = vst [vmem:[#allocation2 + $0x64] sm:$0xff] %v635_v23  ;;  %v5040_v43 = vpop.f32.mrf.mxu3  ;;  %v10391_v45 = vld [vmem:[#allocation11 + $0x668] sm:$0xff] }
  0xeb   :  { %5286 = vmatpush.bf16.msrb.mxu1 %v10358_v59  ;;  %v631_v59 = vmul.f32 %v617_v44, %v617_v44  ;;  %v632_v10 = vmul.f32 %v618_v4, %v618_v4  ;;  %v10383_v44 = vld [vmem:[#allocation11 + $0x628] sm:$0xff]  ;;  %v11578_v4 = vstv %s7502_s18  ;;  %s12092_s18 = sld [smem:[#allocation20 + $0x3]] }
  0xec   :  { %5300 = vmatpush.bf16.msrb.mxu2 %v10366_v60  ;;  %v611_v60 = vmul.f32 %v597_v46, %v568_v39  ;;  %v10392_v39 = vld [vmem:[#allocation11 + $0x670] sm:$0xff]  ;;  %v10399_v46 = vld [vmem:[#allocation11 + $0x6a8] sm:$0xff] }
  0xed   :  { %5314 = vmatpush.bf16.msrb.mxu3 %v10374_v61  ;;  %v10363_v61 = vld [vmem:[#allocation11 + $0x588] sm:$0xff]  ;;  %v639_v6 = vpack.c.bf16 %v631_v59, %v630_v58  ;;  %v5026_v15 = vpop.f32.mrf.mxu2  ;;  %v640_v25 = vpack.c.bf16 %v632_v10, %v632_v10  ;;  %v10382_v58 = vld [vmem:[#allocation11 + $0x620] sm:$0xff] }
  0xee   :  { %5273 = vmatpush.bf16.msrb.mxu0 %v10349_v7  ;;  %v625_v7 = vmul.f32 %v611_v60, %v611_v60  ;;  %v5027_v28 = vadd.f32 %v5026_v15, %v11559_v26  ;;  %v10384_v26 = vld [vmem:[#allocation11 + $0x630] sm:$0xff]  ;;  %v10407_v47 = vld [vmem:[#allocation11 + $0x6e8] sm:$0xff]  ;;  %v10390_v59 = vld [vmem:[#allocation11 + $0x660] sm:$0xff] }
  0xef   :  { %5287 = vmatpush.bf16.msrb.mxu1 %v10357_v27  ;;  %v10362_v27 = vld [vmem:[#allocation11 + $0x580] sm:$0xff]  ;;  %647 = vst [vmem:[#allocation2 + $0x144] sm:$0xff] %v639_v6  ;;  %v653_v6 = vsub.f32 %v11489_v63, %v11578_v4 }
  0xf0   :  { %5301 = vmatpush.bf16.msrb.mxu2 %v10365_v16  ;;  %v10385_v16 = vld [vmem:[#allocation11 + $0x638] sm:$0xff]  ;;  %v636_v14 = vpack.c.bf16 %v625_v7, %v625_v7  ;;  %648 = vst [vmem:[#allocation2 + $0x14c] sm:$0xf] %v640_v25  ;;  %v5041_v36 = vadd.f32 %v5040_v43, %v5027_v28  ;;  %v10398_v60 = vld [vmem:[#allocation11 + $0x6a0] sm:$0xff]  ;;  %v659_v7 = vsub.f32 %v11493_v0, %v11578_v4 }
  0xf1   :  { %5315 = vmatpush.bf16.msrb.mxu3 %v10373_v11  ;;  %v10393_v11 = vld [vmem:[#allocation11 + $0x678] sm:$0xff]  ;;  %v667_v17 = vmax.f32 %v653_v6, 0.0 }
  0xf2   :  { %5274 = vmatpush.bf16.msrb.mxu0 %v10348_v32  ;;  %644 = vst [vmem:[#allocation2 + $0x6c] sm:$0xf] %v636_v14  ;;  %v10401_v32 = vld [vmem:[#allocation11 + $0x6b8] sm:$0xff]  ;;  %v11576_v50 = vpop.f32.mrf.mxu3  ;;  %v673_v43 = vmax.f32 %v659_v7, 0.0  ;;  %v10395_v7 = vld [vmem:[#allocation11 + $0x688] sm:$0xff] }
  0xf3   :  { %5288 = vmatpush.bf16.msrb.mxu1 %v10356_v53  ;;  %v10409_v53 = vld [vmem:[#allocation11 + $0x6f8] sm:$0xff] }
  0xf4   :  { %5302 = vmatpush.bf16.msrb.mxu2 %v10364_v38  ;;  %v7597_v38 = vor.u32 %v10140_v20, %v7594_v21 }
  0xf5   :  { %5316 = vmatpush.bf16.msrb.mxu3 %v10372_v54  ;;  %v7605_v54 = vor.u32 %v10141_v30, %v7602_v31  ;;  %v11574_v40 = vpop.f32.mrf.mxu2 }
  0xf6   :  { %5275 = vmatpush.bf16.msrb.mxu0 %v10347_v55 }
  0xf7   :  { %5289 = vmatpush.bf16.msrb.mxu1 %v10355_v57 }
  0xf8   :  { %5303 = vmatpush.bf16.msrb.mxu2 %v10363_v61  ;;  %v10406_v61 = vld [vmem:[#allocation11 + $0x6e0] sm:$0xff] }
  0xf9   :  { %5317 = vmatpush.bf16.msrb.mxu3 %v10371_v22 }
  0xfa   :  { %5276 = vmatpush.bf16.msrb.mxu0 %v10346_v42  ;;  %v5054_v55 = vpop.f32.mrf.mxu0  ;;  %v11580_v42 = vstv %s7503_s25  ;;  %s12094_s25 = sld [smem:[#allocation21 + $0x3]] }
  0xfb   :  { %5290 = vmatpush.bf16.msrb.mxu1 %v10354_v2  ;;  %v5055_v57 = vadd.f32 %v5054_v55, %v5041_v36  ;;  %v5068_v22 = vpop.f32.mrf.mxu1  ;;  %v652_v2 = vsub.f32 %v11485_v62, %v11578_v4  ;;  %v681_v10 = vsub.f32 %v11580_v42, %v11485_v62  ;;  %v689_v20 = vsub.f32 %v11580_v42, %v11499_v3  ;;  %v10380_v36 = vld [vmem:[#allocation11 + $0x610] sm:$0xff] }
  0xfc   :  { %5304 = vmatpush.bf16.msrb.mxu2 %v10362_v27  ;;  %v660_v27 = vsub.f32 %v11499_v3, %v11578_v4  ;;  %v662_v55 = vsub.f32 %v11523_v49, %v11578_v4  ;;  %v684_v6 = vsub.f32 %v11580_v42, %v11515_v33 }
  0xfd   :  { %5318 = vmatpush.bf16.msrb.mxu3 %v10370_v8  ;;  %5277 = vmatmul.bf16.vlgmr.msrb.gmra.mxu0 %v7593_v35  ;;  %v5069_v23 = vadd.f32 %v5068_v22, %v5055_v57  ;;  %v10381_v8 = vld [vmem:[#allocation11 + $0x618] sm:$0xff]  ;;  %v666_v15 = vmax.f32 %v652_v2, 0.0  ;;  %v695_v28 = vmax.f32 %v681_v10, 0.0  ;;  %v654_v35 = vsub.f32 %v11511_v18, %v11578_v4 }
  0xfe   :  { %5325 = vmatpush.bf16.msra.mxu0 %v10385_v16  ;;  %5291 = vmatmul.bf16.vlgmr.msrb.gmra.mxu1 %v7597_v38  ;;  %v682_v16 = vsub.f32 %v11580_v42, %v11489_v63  ;;  %v674_v25 = vmax.f32 %v660_v27, 0.0  ;;  %v10388_v38 = vld [vmem:[#allocation11 + $0x650] sm:$0xff]  ;;  %v683_v2 = vsub.f32 %v11580_v42, %v11511_v18  ;;  %v10403_v27 = vld [vmem:[#allocation11 + $0x6c8] sm:$0xff]  ;;  %v698_v18 = vmax.f32 %v684_v6, 0.0 }
  0xff   :  { %5339 = vmatpush.bf16.msra.mxu1 %v10393_v11  ;;  %5305 = vmatmul.bf16.vlgmr.msrb.gmra.mxu2 %v7601_v19  ;;  %v688_v11 = vsub.f32 %v11580_v42, %v11493_v0  ;;  %v668_v22 = vmax.f32 %v654_v35, 0.0  ;;  %v10432_v6 = vld [vmem:[#allocation11 + $0x7b0] sm:$0xff] }
 0x100   :  { %5353 = vmatpush.bf16.msra.mxu2 %v10401_v32  ;;  %5319 = vmatmul.bf16.vlgmr.msrb.gmra.mxu3 %v7605_v54  ;;  %v696_v30 = vmax.f32 %v682_v16, 0.0  ;;  %v709_v54 = vmul.f32 %v695_v28, %v666_v15  ;;  %v690_v16 = vsub.f32 %v11580_v42, %v11519_v37  ;;  %v10386_v15 = vld [vmem:[#allocation11 + $0x640] sm:$0xff]  ;;  %v10170_v28 = vld [vmem:[#allocation2 + $0x13c] sm:$0xf0] }
 0x101   :  { %5367 = vmatpush.bf16.msra.mxu3 %v10409_v53  ;;  %v702_v32 = vmax.f32 %v688_v11, 0.0  ;;  %v703_v53 = vmax.f32 %v689_v20, 0.0  ;;  %v10378_v11 = vld [vmem:[#allocation11 + $0x600] sm:$0xff]  ;;  %v10417_v20 = vld [vmem:[#allocation11 + $0x738] sm:$0xff] }
 0x102   :  { %5326 = vmatpush.bf16.msra.mxu0 %v10384_v26  ;;  %v5082_v14 = vpop.f32.mrf.mxu2  ;;  %v655_v26 = vsub.f32 %v11515_v33, %v11578_v4  ;;  %v10402_v33 = vld [vmem:[#allocation11 + $0x6c0] sm:$0xff] }
 0x103   :  { %5340 = vmatpush.bf16.msra.mxu1 %v10392_v39  ;;  %v5083_v21 = vadd.f32 %v5082_v14, %v5069_v23  ;;  %v5096_v31 = vpop.f32.mrf.mxu3  ;;  %v10396_v39 = vld [vmem:[#allocation11 + $0x690] sm:$0xff]  ;;  %v697_v14 = vmax.f32 %v683_v2, 0.0 }
 0x104   :  { %5354 = vmatpush.bf16.msra.mxu2 %v10400_v48  ;;  %v10404_v48 = vld [vmem:[#allocation11 + $0x6d0] sm:$0xff]  ;;  %v669_v23 = vmax.f32 %v655_v26, 0.0 }
 0x105   :  { %5368 = vmatpush.bf16.msra.mxu3 %v10408_v52  ;;  %v11600_v19 = vadd.f32 %v5096_v31, %v5083_v21  ;;  %v710_v52 = vmul.f32 %v696_v30, %v667_v17  ;;  %v10394_v17 = vld [vmem:[#allocation11 + $0x680] sm:$0xff]  ;;  %v10425_v21 = vld [vmem:[#allocation11 + $0x778] sm:$0xff]  ;;  %v711_v30 = vmul.f32 %v697_v14, %v668_v22  ;;  %v10416_v22 = vld [vmem:[#allocation11 + $0x730] sm:$0xff] }
 0x106   :  { %5327 = vmatpush.bf16.msra.mxu0 %v10383_v44  ;;  %v716_v44 = vmul.f32 %v702_v32, %v673_v43  ;;  %v704_v43 = vmax.f32 %v690_v16, 0.0  ;;  %v7616_v31 = vld [vmem:[#allocation2 + $0x68] sm:$0xf]  ;;  %v10142_v32 = vld [vmem:[#allocation2 + $0x64] sm:$0xf]  ;;  %v10439_v16 = vld [vmem:[#allocation11 + $0x7e8] sm:$0xff] }
 0x107   :  { %5341 = vmatpush.bf16.msra.mxu1 %v10391_v45  ;;  %v717_v45 = vmul.f32 %v703_v53, %v674_v25  ;;  %v724_v57 = vmul.f32 %v710_v52, %v710_v52  ;;  %v7608_v25 = vld [vmem:[#allocation2 + $0x60] sm:$0xf]  ;;  %v712_v53 = vmul.f32 %v698_v18, %v669_v23  ;;  %v10441_v52 = vld [vmem:[#allocation11 + $0x7f8] sm:$0xff]  ;;  %v10414_v14 = vld [vmem:[#allocation11 + $0x720] sm:$0xff] }
 0x108   :  { %5355 = vmatpush.bf16.msra.mxu2 %v10399_v46  ;;  %v723_v46 = vmul.f32 %v709_v54, %v709_v54  ;;  %v7618_v54 = vld [vmem:[#allocation2 + $0x148] sm:$0xf0]  ;;  %v10424_v23 = vld [vmem:[#allocation11 + $0x770] sm:$0xff]  ;;  %v10422_v18 = vld [vmem:[#allocation11 + $0x760] sm:$0xff] }
 0x109   :  { %5369 = vmatpush.bf16.msra.mxu3 %v10407_v47  ;;  %v661_v47 = vsub.f32 %v11519_v37, %v11578_v4 }
 0x10a   :  { %5328 = vmatpush.bf16.msra.mxu0 %v10382_v58  ;;  %v730_v58 = vmul.f32 %v716_v44, %v716_v44  ;;  %v726_v44 = vmul.f32 %v712_v53, %v712_v53  ;;  %v10437_v53 = vld [vmem:[#allocation11 + $0x7d8] sm:$0xff] }
 0x10b   :  { %5342 = vmatpush.bf16.msra.mxu1 %v10390_v59  ;;  %v731_v59 = vmul.f32 %v717_v45, %v717_v45  ;;  %v675_v10 = vmax.f32 %v661_v47, 0.0 }
 0x10c   :  { %5356 = vmatpush.bf16.msra.mxu2 %v10398_v60  ;;  %v10379_v60 = vld [vmem:[#allocation11 + $0x608] sm:$0xff] }
 0x10d   :  { %5370 = vmatpush.bf16.msra.mxu3 %v10406_v61  ;;  %v10387_v61 = vld [vmem:[#allocation11 + $0x648] sm:$0xff]  ;;  %v718_v35 = vmul.f32 %v704_v43, %v675_v10 }
 0x10e   :  { %5329 = vmatpush.bf16.msra.mxu0 %v10381_v8  ;;  %v737_v8 = vpack.c.bf16 %v724_v57, %v723_v46  ;;  %v7609_v46 = vor.u32 %v10170_v28, %v7608_v25  ;;  %v11616_v57 = vpop.f32.mrf.mxu0  ;;  %v10431_v10 = vld [vmem:[#allocation11 + $0x7a8] sm:$0xff]  ;;  %v664_v25 = vsub.f32 %v11547_v5, %v11578_v4  ;;  %v10413_v28 = vld [vmem:[#allocation11 + $0x718] sm:$0xff] }
 0x10f   :  { %5343 = vmatpush.bf16.msra.mxu1 %v10389_v9  ;;  %v741_v9 = vpack.c.bf16 %v731_v59, %v730_v58  ;;  %v732_v45 = vmul.f32 %v718_v35, %v718_v35 }
 0x110   :  { %5357 = vmatpush.bf16.msra.mxu2 %v10397_v12  ;;  %v676_v12 = vmax.f32 %v662_v55, 0.0  ;;  %745 = vst [vmem:[#allocation2 + $0x70] sm:$0xff] %v737_v8  ;;  %v10423_v8 = vld [vmem:[#allocation11 + $0x768] sm:$0xff] }
 0x111   :  { %5371 = vmatpush.bf16.msra.mxu3 %v10405_v13  ;;  %v691_v13 = vsub.f32 %v11580_v42, %v11523_v49  ;;  %749 = vst [vmem:[#allocation2 + $0x150] sm:$0xff] %v741_v9  ;;  %v10171_v49 = vld [vmem:[#allocation2 + $0x144] sm:$0xf0]  ;;  %v11620_v9 = vpop.f32.mrf.mxu2 }
 0x112   :  { %5330 = vmatpush.bf16.msra.mxu0 %v10380_v36  ;;  %v7610_v36 = vld [vmem:[#allocation2 + $0x140] sm:$0xf0]  ;;  %v7617_v47 = vor.u32 %v10171_v49, %v7616_v31  ;;  %v686_v31 = vsub.f32 %v11580_v42, %v11539_v1  ;;  %v692_v49 = vsub.f32 %v11580_v42, %v11543_v24 }
 0x113   :  { %5344 = vmatpush.bf16.msra.mxu1 %v10388_v38  ;;  %v705_v37 = vmax.f32 %v691_v13, 0.0  ;;  %v10143_v38 = vld [vmem:[#allocation2 + $0x6c] sm:$0xf]  ;;  %v7613_v58 = vor.u32 %v10142_v32, %v7610_v36 }
 0x114   :  { %5358 = vmatpush.bf16.msra.mxu2 %v10396_v39  ;;  %v725_v39 = vmul.f32 %v711_v30, %v711_v30  ;;  %v7621_v59 = vor.u32 %v10143_v38, %v7618_v54  ;;  %v685_v30 = vsub.f32 %v11580_v42, %v11535_v41  ;;  %v10429_v32 = vld [vmem:[#allocation11 + $0x798] sm:$0xff] }
 0x115   :  { %5372 = vmatpush.bf16.msra.mxu3 %v10404_v48  ;;  %v719_v26 = vmul.f32 %v705_v37, %v676_v12  ;;  %v10433_v48 = vld [vmem:[#allocation11 + $0x7b8] sm:$0xff] }
 0x116   :  { %5331 = vmatpush.bf16.msra.mxu0 %v10379_v60  ;;  %v738_v60 = vpack.c.bf16 %v726_v44, %v725_v39  ;;  %v10421_v37 = vld [vmem:[#allocation11 + $0x758] sm:$0xff]  ;;  %v699_v44 = vmax.f32 %v685_v30, 0.0 }
 0x117   :  { %5345 = vmatpush.bf16.msra.mxu1 %v10387_v61  ;;  %v733_v55 = vmul.f32 %v719_v26, %v719_v26  ;;  %v11618_v61 = vpop.f32.mrf.mxu1  ;;  %v693_v26 = vsub.f32 %v11580_v42, %v11547_v5  ;;  %v11667_v30 = vld [vmem:[#allocation2 + $0x70] sm:$0xf] }
 0x118   :  { %5359 = vmatpush.bf16.msra.mxu2 %v10395_v7  ;;  %v10440_v7 = vld [vmem:[#allocation11 + $0x7f0] sm:$0xff]  ;;  %746 = vst [vmem:[#allocation2 + $0x78] sm:$0xff] %v738_v60 }
 0x119   :  { %5373 = vmatpush.bf16.msra.mxu3 %v10403_v27  ;;  %v742_v2 = vpack.c.bf16 %v733_v55, %v732_v45  ;;  %v10415_v27 = vld [vmem:[#allocation11 + $0x728] sm:$0xff]  ;;  %v700_v45 = vmax.f32 %v686_v31, 0.0  ;;  %v658_v55 = vsub.f32 %v11473_v51, %v11578_v4  ;;  %v10412_v60 = vld [vmem:[#allocation11 + $0x710] sm:$0xff] }
 0x11a   :  { %5332 = vmatpush.bf16.msra.mxu0 %v10378_v11  ;;  %v11622_v11 = vpop.f32.mrf.mxu3  ;;  %v5110_v12 = vpop.f32.mrf.mxu0 }
 0x11b   :  { %5346 = vmatpush.bf16.msra.mxu1 %v10386_v15  ;;  %750 = vst [vmem:[#allocation2 + $0x158] sm:$0xff] %v742_v2  ;;  %v5111_v13 = vadd.f32 %v5110_v12, %v11600_v19  ;;  %v663_v19 = vsub.f32 %v11543_v24, %v11578_v4  ;;  %v11652_v2 = vstv %s11625_s26  ;;  %s12096_s26 = sld [smem:[#allocation20 + $0x4]] }
 0x11c   :  { %5360 = vmatpush.bf16.msra.mxu2 %v10394_v17  ;;  %v10430_v17 = vld [vmem:[#allocation11 + $0x7a0] sm:$0xff] }
 0x11d   :  { %5374 = vmatpush.bf16.msra.mxu3 %v10402_v33  ;;  %5333 = vmatmul.bf16.vlgmr.msra.gmra.mxu0 %v7609_v46  ;;  %v10438_v33 = vld [vmem:[#allocation11 + $0x7e0] sm:$0xff]  ;;  %v677_v54 = vmax.f32 %v663_v19, 0.0  ;;  %v706_v46 = vmax.f32 %v692_v49, 0.0  ;;  %v756_v19 = vsub.f32 %v11485_v62, %v11652_v2  ;;  %v764_v49 = vsub.f32 %v11499_v3, %v11652_v2 }
 0x11e   :  { %5381 = vmatpush.bf16.msrb.mxu0 %v10417_v20  ;;  %5347 = vmatmul.bf16.vlgmr.msra.gmra.mxu1 %v7613_v58  ;;  %v656_v20 = vsub.f32 %v11535_v41, %v11578_v4  ;;  %v665_v58 = vsub.f32 %v11477_v56, %v11578_v4  ;;  %v11671_v62 = vld [vmem:[#allocation2 + $0x14c] sm:$0xf0] }
 0x11f   :  { %5395 = vmatpush.bf16.msrb.mxu1 %v10425_v21  ;;  %5361 = vmatmul.bf16.vlgmr.msra.gmra.mxu2 %v7617_v47  ;;  %v5124_v15 = vpop.f32.mrf.mxu1  ;;  %v657_v21 = vsub.f32 %v11539_v1, %v11578_v4  ;;  %v707_v47 = vmax.f32 %v693_v26, 0.0  ;;  %v672_v4 = vmax.f32 %v658_v55, 0.0 }
 0x120   :  { %5409 = vmatpush.bf16.msrb.mxu2 %v10433_v48  ;;  %5375 = vmatmul.bf16.vlgmr.msra.gmra.mxu3 %v7621_v59  ;;  %v5125_v43 = vadd.f32 %v5124_v15, %v5111_v13  ;;  %v670_v36 = vmax.f32 %v656_v20, 0.0  ;;  %v679_v13 = vmax.f32 %v665_v58, 0.0  ;;  %v10419_v20 = vld [vmem:[#allocation11 + $0x748] sm:$0xff]  ;;  %v10434_v58 = vld [vmem:[#allocation11 + $0x7c0] sm:$0xff] }
 0x121   :  { %5423 = vmatpush.bf16.msrb.mxu3 %v10441_v52  ;;  %v671_v38 = vmax.f32 %v657_v21, 0.0  ;;  %v678_v52 = vmax.f32 %v664_v25, 0.0  ;;  %v757_v25 = vsub.f32 %v11489_v63, %v11652_v2  ;;  %v11675_v63 = vld [vmem:[#allocation2 + $0x150] sm:$0xf0] }
 0x122   :  { %5382 = vmatpush.bf16.msrb.mxu0 %v10416_v22  ;;  %v5138_v35 = vpop.f32.mrf.mxu2  ;;  %v10420_v22 = vld [vmem:[#allocation11 + $0x750] sm:$0xff] }
 0x123   :  { %5396 = vmatpush.bf16.msrb.mxu1 %v10424_v23  ;;  %v5139_v39 = vadd.f32 %v5138_v35, %v5125_v43  ;;  %v5152_v48 = vpop.f32.mrf.mxu3  ;;  %v713_v23 = vmul.f32 %v699_v44, %v670_v36  ;;  %v10411_v43 = vld [vmem:[#allocation11 + $0x708] sm:$0xff]  ;;  %v10418_v35 = vld [vmem:[#allocation11 + $0x740] sm:$0xff]  ;;  %v771_v26 = vmax.f32 %v757_v25, 0.0 }
 0x124   :  { %5410 = vmatpush.bf16.msrb.mxu2 %v10432_v6  ;;  %v10428_v6 = vld [vmem:[#allocation11 + $0x790] sm:$0xff]  ;;  %v11677_v36 = vld [vmem:[#allocation2 + $0x78] sm:$0xf] }
 0x125   :  { %5424 = vmatpush.bf16.msrb.mxu3 %v10440_v7  ;;  %v11649_v59 = vadd.f32 %v5152_v48, %v5139_v39  ;;  %v10436_v7 = vld [vmem:[#allocation11 + $0x7d0] sm:$0xff]  ;;  %v727_v12 = vmul.f32 %v713_v23, %v713_v23  ;;  %v10426_v48 = vld [vmem:[#allocation11 + $0x780] sm:$0xff] }
 0x126   :  { %5383 = vmatpush.bf16.msrb.mxu0 %v10415_v27  ;;  %v714_v27 = vmul.f32 %v700_v45, %v671_v38  ;;  %v11679_v39 = vld [vmem:[#allocation4] sm:$0xff] }
 0x127   :  { %5397 = vmatpush.bf16.msrb.mxu1 %v10423_v8  ;;  %v720_v8 = vmul.f32 %v706_v46, %v677_v54  ;;  %v770_v54 = vmax.f32 %v756_v19, 0.0  ;;  %v778_v46 = vmax.f32 %v764_v49, 0.0  ;;  %v10448_v49 = vld [vmem:[#allocation11 + $0x830] sm:$0xff] }
 0x128   :  { %5411 = vmatpush.bf16.msrb.mxu2 %v10431_v10  ;;  %v721_v10 = vmul.f32 %v707_v47, %v678_v52  ;;  %v10145_v52 = vld [vmem:[#allocation2 + $0x7c] sm:$0xf]  ;;  %v11683_v47 = vld [vmem:[#allocation4 + $0x8] sm:$0xff] }
 0x129   :  { %5425 = vmatpush.bf16.msrb.mxu3 %v10439_v16  ;;  %v11655_v16 = vstv %s11627_s27  ;;  %v734_v15 = vmul.f32 %v720_v8, %v720_v8  ;;  %s12098_s27 = sld [smem:[#allocation21 + $0x4]] }
 0x12a   :  { %5384 = vmatpush.bf16.msrb.mxu0 %v10414_v14  ;;  %v687_v14 = vsub.f32 %v11580_v42, %v11473_v51  ;;  %v763_v51 = vsub.f32 %v11493_v0, %v11652_v2  ;;  %v785_v3 = vsub.f32 %v11655_v16, %v11679_v39  ;;  %v786_v55 = vsub.f32 %v11655_v16, %v11683_v47 }
 0x12b   :  { %5398 = vmatpush.bf16.msrb.mxu1 %v10422_v18  ;;  %v728_v18 = vmul.f32 %v714_v27, %v714_v27  ;;  %v11691_v27 = vld [vmem:[#allocation4 + $0x40] sm:$0xff] }
 0x12c   :  { %5412 = vmatpush.bf16.msrb.mxu2 %v10430_v17  ;;  %v735_v17 = vmul.f32 %v721_v10, %v721_v10  ;;  %v701_v21 = vmax.f32 %v687_v14, 0.0  ;;  %v777_v45 = vmax.f32 %v763_v51, 0.0  ;;  %v793_v8 = vsub.f32 %v11655_v16, %v11691_v27 }
 0x12d   :  { %5426 = vmatpush.bf16.msrb.mxu3 %v10438_v33  ;;  %v694_v33 = vsub.f32 %v11580_v42, %v11477_v56  ;;  %v739_v56 = vpack.c.bf16 %v728_v18, %v727_v12  ;;  %v799_v10 = vmax.f32 %v785_v3, 0.0  ;;  %v10449_v12 = vld [vmem:[#allocation11 + $0x838] sm:$0xff]  ;;  %v11704_v3 = vpop.f32.mrf.mxu2 }
 0x12e   :  { %5385 = vmatpush.bf16.msrb.mxu0 %v10413_v28  ;;  %v10427_v28 = vld [vmem:[#allocation11 + $0x788] sm:$0xff]  ;;  %v743_v42 = vpack.c.bf16 %v735_v17, %v734_v15  ;;  %v715_v0 = vmul.f32 %v701_v21, %v672_v4  ;;  %v10457_v4 = vld [vmem:[#allocation11 + $0x878] sm:$0xff]  ;;  %v800_v15 = vmax.f32 %v786_v55, 0.0  ;;  %v807_v21 = vmax.f32 %v793_v8, 0.0  ;;  %v10446_v55 = vld [vmem:[#allocation11 + $0x820] sm:$0xff] }
 0x12f   :  { %5399 = vmatpush.bf16.msrb.mxu1 %v10421_v37  ;;  %v10435_v37 = vld [vmem:[#allocation11 + $0x7c8] sm:$0xff]  ;;  %v708_v31 = vmax.f32 %v694_v33, 0.0  ;;  %747 = vst [vmem:[#allocation2 + $0x80] sm:$0xff] %v739_v56  ;;  %v10465_v17 = vld [vmem:[#allocation11 + $0x8b8] sm:$0xff]  ;;  %v813_v19 = vmul.f32 %v799_v10, %v770_v54  ;;  %v11709_v8 = vld [vmem:[#allocation4 + $0x10] sm:$0xff] }
 0x130   :  { %5413 = vmatpush.bf16.msrb.mxu2 %v10429_v32  ;;  %v10410_v32 = vld [vmem:[#allocation11 + $0x700] sm:$0xff]  ;;  %751 = vst [vmem:[#allocation2 + $0x160] sm:$0xff] %v743_v42  ;;  %v729_v44 = vmul.f32 %v715_v0, %v715_v0  ;;  %v10473_v33 = vld [vmem:[#allocation11 + $0x8f8] sm:$0xff]  ;;  %v821_v56 = vmul.f32 %v807_v21, %v778_v46  ;;  %v10447_v54 = vld [vmem:[#allocation11 + $0x828] sm:$0xff]  ;;  %v758_v10 = vsub.f32 %v11709_v8, %v11652_v2 }
 0x131   :  { %5427 = vmatpush.bf16.msrb.mxu3 %v10437_v53  ;;  %v11673_v53 = vld [vmem:[#allocation2 + $0x74] sm:$0xf]  ;;  %v722_v38 = vmul.f32 %v708_v31, %v679_v13  ;;  %v7625_v13 = vor.u32 %v11671_v62, %v11667_v30  ;;  %v827_v42 = vmul.f32 %v813_v19, %v813_v19  ;;  %v11702_v31 = vpop.f32.mrf.mxu1  ;;  %v10461_v21 = vld [vmem:[#allocation11 + $0x898] sm:$0xff] }
 0x132   :  { %5386 = vmatpush.bf16.msrb.mxu0 %v10412_v60  ;;  %v10173_v60 = vld [vmem:[#allocation2 + $0x154] sm:$0xf0]  ;;  %v7629_v14 = vor.u32 %v11673_v53, %v11675_v63  ;;  %v740_v18 = vpack.c.bf16 %v729_v44, %v729_v44  ;;  %v10464_v53 = vld [vmem:[#allocation11 + $0x8b0] sm:$0xff]  ;;  %v11706_v44 = vpop.f32.mrf.mxu3  ;;  %v10469_v19 = vld [vmem:[#allocation11 + $0x8d8] sm:$0xff] }
 0x133   :  { %5400 = vmatpush.bf16.msrb.mxu1 %v10420_v22  ;;  %v7634_v22 = vld [vmem:[#allocation2 + $0x158] sm:$0xf0]  ;;  %v736_v23 = vmul.f32 %v722_v38, %v722_v38  ;;  %v7633_v25 = vor.u32 %v10173_v60, %v11677_v36  ;;  %v10472_v63 = vld [vmem:[#allocation11 + $0x8f0] sm:$0xff] }
 0x134   :  { %5414 = vmatpush.bf16.msrb.mxu2 %v10428_v6  ;;  %v11687_v6 = vld [vmem:[#allocation4 + $0x38] sm:$0xff]  ;;  %v7637_v51 = vor.u32 %v10145_v52, %v7634_v22  ;;  %748 = vst [vmem:[#allocation2 + $0x88] sm:$0xf] %v740_v18  ;;  %v10462_v22 = vld [vmem:[#allocation11 + $0x8a0] sm:$0xff] }
 0x135   :  { %5428 = vmatpush.bf16.msrb.mxu3 %v10436_v7  ;;  %v792_v7 = vsub.f32 %v11655_v16, %v11687_v6  ;;  %v10471_v52 = vld [vmem:[#allocation11 + $0x8e8] sm:$0xff] }
 0x136   :  { %5387 = vmatpush.bf16.msrb.mxu0 %v10411_v43  ;;  %v744_v43 = vpack.c.bf16 %v736_v23, %v736_v23  ;;  %v10470_v23 = vld [vmem:[#allocation11 + $0x8e0] sm:$0xff] }
 0x137   :  { %5401 = vmatpush.bf16.msrb.mxu1 %v10419_v20  ;;  %v806_v20 = vmax.f32 %v792_v7, 0.0 }
 0x138   :  { %5415 = vmatpush.bf16.msrb.mxu2 %v10427_v28  ;;  %v814_v28 = vmul.f32 %v800_v15, %v771_v26  ;;  %752 = vst [vmem:[#allocation2 + $0x168] sm:$0xf] %v744_v43  ;;  %v10455_v26 = vld [vmem:[#allocation11 + $0x868] sm:$0xff]  ;;  %v10445_v15 = vld [vmem:[#allocation11 + $0x818] sm:$0xff] }
 0x139   :  { %5429 = vmatpush.bf16.msrb.mxu3 %v10435_v37  ;;  %v11700_v37 = vpop.f32.mrf.mxu0  ;;  %v820_v30 = vmul.f32 %v806_v20, %v777_v45 }
 0x13a   :  { %5388 = vmatpush.bf16.msrb.mxu0 %v10410_v32  ;;  %v10456_v32 = vld [vmem:[#allocation11 + $0x870] sm:$0xff]  ;;  %v828_v62 = vmul.f32 %v814_v28, %v814_v28 }
 0x13b   :  { %5402 = vmatpush.bf16.msrb.mxu1 %v10418_v35  ;;  %v834_v0 = vmul.f32 %v820_v30, %v820_v30  ;;  %v835_v35 = vmul.f32 %v821_v56, %v821_v56  ;;  %v5180_v60 = vpop.f32.mrf.mxu1 }
 0x13c   :  { %5416 = vmatpush.bf16.msrb.mxu2 %v10426_v48  ;;  %v841_v36 = vpack.c.bf16 %v828_v62, %v827_v42  ;;  %v10463_v48 = vld [vmem:[#allocation11 + $0x8a8] sm:$0xff] }
 0x13d   :  { %5430 = vmatpush.bf16.msrb.mxu3 %v10434_v58  ;;  %5389 = vmatmul.bf16.vlgmr.msrb.gmra.mxu0 %v7625_v13  ;;  %v845_v38 = vpack.c.bf16 %v835_v35, %v834_v0  ;;  %v10454_v58 = vld [vmem:[#allocation11 + $0x860] sm:$0xff]  ;;  %v11717_v13 = vld [vmem:[#allocation4 + $0x48] sm:$0xff]  ;;  %v760_v0 = vsub.f32 %v11535_v41, %v11652_v2  ;;  %v761_v35 = vsub.f32 %v11539_v1, %v11652_v2 }
 0x13e   :  { %5437 = vmatpush.bf16.msra.mxu0 %v10449_v12  ;;  %5403 = vmatmul.bf16.vlgmr.msrb.gmra.mxu1 %v7629_v14  ;;  %849 = vst [vmem:[#allocation2 + $0x8c] sm:$0xff] %v841_v36  ;;  %v11713_v12 = vld [vmem:[#allocation4 + $0x18] sm:$0xff]  ;;  %v11721_v14 = vld [vmem:[#allocation4 + $0x50] sm:$0xff]  ;;  %v794_v20 = vsub.f32 %v11655_v16, %v11717_v13  ;;  %v767_v41 = vsub.f32 %v11543_v24, %v11652_v2 }
 0x13f   :  { %5451 = vmatpush.bf16.msra.mxu1 %v10457_v4  ;;  %5417 = vmatmul.bf16.vlgmr.msrb.gmra.mxu2 %v7633_v25  ;;  %853 = vst [vmem:[#allocation2 + $0x16c] sm:$0xff] %v845_v38  ;;  %v759_v4 = vsub.f32 %v11713_v12, %v11652_v2  ;;  %v766_v18 = vsub.f32 %v11721_v14, %v11652_v2  ;;  %v10444_v38 = vld [vmem:[#allocation11 + $0x810] sm:$0xff] }
 0x140   :  { %5465 = vmatpush.bf16.msra.mxu2 %v10465_v17  ;;  %5431 = vmatmul.bf16.vlgmr.msrb.gmra.mxu3 %v7637_v51  ;;  %v10453_v17 = vld [vmem:[#allocation11 + $0x858] sm:$0xff]  ;;  %v788_v43 = vsub.f32 %v11655_v16, %v11713_v12  ;;  %v772_v51 = vmax.f32 %v758_v10, 0.0  ;;  %v768_v1 = vsub.f32 %v11547_v5, %v11652_v2  ;;  %v775_v10 = vmax.f32 %v761_v35, 0.0 }
 0x141   :  { %5479 = vmatpush.bf16.msra.mxu3 %v10473_v33  ;;  %v5166_v45 = vpop.f32.mrf.mxu0  ;;  %v787_v33 = vsub.f32 %v11655_v16, %v11709_v8  ;;  %v773_v28 = vmax.f32 %v759_v4, 0.0  ;;  %v10443_v4 = vld [vmem:[#allocation11 + $0x808] sm:$0xff] }
 0x142   :  { %5438 = vmatpush.bf16.msra.mxu0 %v10448_v49  ;;  %v5167_v46 = vadd.f32 %v5166_v45, %v11649_v59  ;;  %v765_v59 = vsub.f32 %v11717_v13, %v11652_v2  ;;  %v5194_v25 = vpop.f32.mrf.mxu2  ;;  %v780_v49 = vmax.f32 %v766_v18, 0.0  ;;  %v10468_v45 = vld [vmem:[#allocation11 + $0x8d0] sm:$0xff] }
 0x143   :  { %5452 = vmatpush.bf16.msra.mxu1 %v10456_v32  ;;  %v5208_v42 = vpop.f32.mrf.mxu3  ;;  %v795_v32 = vsub.f32 %v11655_v16, %v11721_v14  ;;  %v801_v62 = vmax.f32 %v787_v33, 0.0  ;;  %v11747_v33 = vld [vmem:[#allocation4 + $0x28] sm:$0xff] }
 0x144   :  { %5466 = vmatpush.bf16.msra.mxu2 %v10464_v53  ;;  %v5181_v7 = vadd.f32 %v5180_v60, %v5167_v46  ;;  %v779_v30 = vmax.f32 %v765_v59, 0.0  ;;  %v802_v53 = vmax.f32 %v788_v43, 0.0  ;;  %v10451_v59 = vld [vmem:[#allocation11 + $0x848] sm:$0xff]  ;;  %v790_v5 = vsub.f32 %v11655_v16, %v11747_v33 }
 0x145   :  { %5480 = vmatpush.bf16.msra.mxu3 %v10472_v63  ;;  %v808_v63 = vmax.f32 %v794_v20, 0.0  ;;  %v10459_v43 = vld [vmem:[#allocation11 + $0x888] sm:$0xff] }
 0x146   :  { %5439 = vmatpush.bf16.msra.mxu0 %v10447_v54  ;;  %v5195_v56 = vadd.f32 %v5194_v25, %v5181_v7  ;;  %v10452_v54 = vld [vmem:[#allocation11 + $0x850] sm:$0xff]  ;;  %v816_v46 = vmul.f32 %v802_v53, %v773_v28  ;;  %v774_v7 = vmax.f32 %v760_v0, 0.0  ;;  %v10467_v20 = vld [vmem:[#allocation11 + $0x8c8] sm:$0xff]  ;;  %v10458_v53 = vld [vmem:[#allocation11 + $0x880] sm:$0xff] }
 0x147   :  { %5453 = vmatpush.bf16.msra.mxu1 %v10455_v26  ;;  %v809_v26 = vmax.f32 %v795_v32, 0.0  ;;  %v11751_v25 = vld [vmem:[#allocation4 + $0x58] sm:$0xff]  ;;  %v11755_v28 = vld [vmem:[#allocation4 + $0x60] sm:$0xff]  ;;  %v804_v32 = vmax.f32 %v790_v5, 0.0 }
 0x148   :  { %5467 = vmatpush.bf16.msra.mxu2 %v10463_v48  ;;  %v11737_v36 = vadd.f32 %v5208_v42, %v5195_v56  ;;  %v815_v48 = vmul.f32 %v801_v62, %v772_v51  ;;  %v796_v51 = vsub.f32 %v11655_v16, %v11751_v25  ;;  %v10442_v56 = vld [vmem:[#allocation11 + $0x800] sm:$0xff] }
 0x149   :  { %5481 = vmatpush.bf16.msra.mxu3 %v10471_v52  ;;  %v10460_v52 = vld [vmem:[#allocation11 + $0x890] sm:$0xff]  ;;  %v10450_v62 = vld [vmem:[#allocation11 + $0x840] sm:$0xff] }
 0x14a   :  { %5440 = vmatpush.bf16.msra.mxu0 %v10446_v55  ;;  %v822_v55 = vmul.f32 %v808_v63, %v779_v30  ;;  %v829_v60 = vmul.f32 %v815_v48, %v815_v48  ;;  %v797_v30 = vsub.f32 %v11655_v16, %v11755_v28  ;;  %v10466_v63 = vld [vmem:[#allocation11 + $0x8c0] sm:$0xff]  ;;  %v810_v0 = vmax.f32 %v796_v51, 0.0  ;;  %v10146_v48 = vld [vmem:[#allocation2 + $0x84] sm:$0xf] }
 0x14b   :  { %5454 = vmatpush.bf16.msra.mxu1 %v10454_v58  ;;  %v823_v58 = vmul.f32 %v809_v26, %v780_v49  ;;  %v7640_v26 = vld [vmem:[#allocation2 + $0x80] sm:$0xf] }
 0x14c   :  { %5468 = vmatpush.bf16.msra.mxu2 %v10462_v22  ;;  %v830_v22 = vmul.f32 %v816_v46, %v816_v46  ;;  %v811_v35 = vmax.f32 %v797_v30, 0.0  ;;  %v10174_v46 = vld [vmem:[#allocation2 + $0x15c] sm:$0xf0]  ;;  %v11761_v30 = vpop.f32.mrf.mxu1 }
 0x14d   :  { %5482 = vmatpush.bf16.msra.mxu3 %v10470_v23  ;;  %v836_v23 = vmul.f32 %v822_v55, %v822_v55  ;;  %v837_v18 = vmul.f32 %v823_v58, %v823_v58  ;;  %v7648_v55 = vld [vmem:[#allocation2 + $0x88] sm:$0xf] }
 0x14e   :  { %5441 = vmatpush.bf16.msra.mxu0 %v10445_v15  ;;  %v781_v15 = vmax.f32 %v767_v41, 0.0  ;;  %v10175_v41 = vld [vmem:[#allocation2 + $0x164] sm:$0xf0] }
 0x14f   :  { %5455 = vmatpush.bf16.msra.mxu1 %v10453_v17  ;;  %v11743_v17 = vld [vmem:[#allocation4 + $0x20] sm:$0xff]  ;;  %v846_v42 = vpack.c.bf16 %v837_v18, %v836_v23  ;;  %v7650_v23 = vld [vmem:[#allocation2 + $0x168] sm:$0xf0] }
 0x150   :  { %5469 = vmatpush.bf16.msra.mxu2 %v10461_v21  ;;  %v789_v24 = vsub.f32 %v11655_v16, %v11743_v17  ;;  %v842_v21 = vpack.c.bf16 %v830_v22, %v829_v60  ;;  %v824_v58 = vmul.f32 %v810_v0, %v781_v15  ;;  %v10147_v22 = vld [vmem:[#allocation2 + $0x8c] sm:$0xf]  ;;  %v10495_v0 = vld [vmem:[#allocation11 + $0x9a8] sm:$0xff] }
 0x151   :  { %5483 = vmatpush.bf16.msra.mxu3 %v10469_v19  ;;  %v782_v19 = vmax.f32 %v768_v1, 0.0  ;;  %854 = vst [vmem:[#allocation2 + $0x174] sm:$0xff] %v846_v42  ;;  %v7642_v1 = vld [vmem:[#allocation2 + $0x160] sm:$0xf0] }
 0x152   :  { %5442 = vmatpush.bf16.msra.mxu0 %v10444_v38  ;;  %v803_v49 = vmax.f32 %v789_v24, 0.0  ;;  %850 = vst [vmem:[#allocation2 + $0x94] sm:$0xff] %v842_v21  ;;  %v10481_v38 = vld [vmem:[#allocation11 + $0x938] sm:$0xff]  ;;  %v838_v5 = vmul.f32 %v824_v58, %v824_v58  ;;  %v7645_v15 = vor.u32 %v10146_v48, %v7642_v1  ;;  %v10480_v42 = vld [vmem:[#allocation11 + $0x930] sm:$0xff]  ;;  %v10478_v48 = vld [vmem:[#allocation11 + $0x920] sm:$0xff]  ;;  %v11768_v58 = vstv %s7506_s28  ;;  %s12100_s28 = sld [smem:[#allocation20 + $0x5]] }
 0x153   :  { %5456 = vmatpush.bf16.msra.mxu1 %v10452_v54  ;;  %v10489_v54 = vld [vmem:[#allocation11 + $0x978] sm:$0xff]  ;;  %v825_v60 = vmul.f32 %v811_v35, %v782_v19  ;;  %v7653_v19 = vor.u32 %v10147_v22, %v7650_v23  ;;  %v10503_v35 = vld [vmem:[#allocation11 + $0x9e8] sm:$0xff]  ;;  %v860_v1 = vsub.f32 %v11679_v39, %v11768_v58  ;;  %v861_v22 = vsub.f32 %v11683_v47, %v11768_v58 }
 0x154   :  { %5470 = vmatpush.bf16.msra.mxu2 %v10460_v52  ;;  %v817_v52 = vmul.f32 %v803_v49, %v774_v7  ;;  %v10505_v24 = vld [vmem:[#allocation11 + $0x9f8] sm:$0xff]  ;;  %v7641_v7 = vor.u32 %v10174_v46, %v7640_v26  ;;  %v10488_v49 = vld [vmem:[#allocation11 + $0x970] sm:$0xff]  ;;  %v10494_v46 = vld [vmem:[#allocation11 + $0x9a0] sm:$0xff]  ;;  %v868_v23 = vsub.f32 %v11691_v27, %v11768_v58 }
 0x155   :  { %5484 = vmatpush.bf16.msra.mxu3 %v10468_v45  ;;  %v818_v45 = vmul.f32 %v804_v32, %v775_v10  ;;  %v839_v21 = vmul.f32 %v825_v60, %v825_v60  ;;  %v7649_v10 = vor.u32 %v10175_v41, %v7648_v55  ;;  %v10504_v32 = vld [vmem:[#allocation11 + $0x9f0] sm:$0xff]  ;;  %v10502_v55 = vld [vmem:[#allocation11 + $0x9e0] sm:$0xff]  ;;  %v11770_v60 = vstv %s7507_s1  ;;  %s12102_s1 = sld [smem:[#allocation21 + $0x5]] }
 0x156   :  { %5443 = vmatpush.bf16.msra.mxu0 %v10443_v4  ;;  %v831_v18 = vmul.f32 %v817_v52, %v817_v52  ;;  %v10486_v52 = vld [vmem:[#allocation11 + $0x960] sm:$0xff] }
 0x157   :  { %5457 = vmatpush.bf16.msra.mxu1 %v10451_v59  ;;  %v832_v4 = vmul.f32 %v818_v45, %v818_v45  ;;  %v10497_v59 = vld [vmem:[#allocation11 + $0x9b8] sm:$0xff]  ;;  %v847_v51 = vpack.c.bf16 %v839_v21, %v838_v5  ;;  %v896_v5 = vsub.f32 %v11770_v60, %v11687_v6 }
 0x158   :  { %5471 = vmatpush.bf16.msra.mxu2 %v10459_v43  ;;  %v10493_v21 = vld [vmem:[#allocation11 + $0x998] sm:$0xff] }
 0x159   :  { %5485 = vmatpush.bf16.msra.mxu3 %v10467_v20  ;;  %v843_v43 = vpack.c.bf16 %v832_v4, %v831_v18  ;;  %v11759_v20 = vpop.f32.mrf.mxu0  ;;  %855 = vst [vmem:[#allocation2 + $0x17c] sm:$0xff] %v847_v51  ;;  %v10477_v18 = vld [vmem:[#allocation11 + $0x918] sm:$0xff]  ;;  %v897_v51 = vsub.f32 %v11770_v60, %v11691_v27 }
 0x15a   :  { %5444 = vmatpush.bf16.msra.mxu0 %v10442_v56  ;;  %v10496_v56 = vld [vmem:[#allocation11 + $0x9b0] sm:$0xff]  ;;  %v10485_v4 = vld [vmem:[#allocation11 + $0x958] sm:$0xff] }
 0x15b   :  { %5458 = vmatpush.bf16.msra.mxu1 %v10450_v62  ;;  %851 = vst [vmem:[#allocation2 + $0x9c] sm:$0xff] %v843_v43  ;;  %v10479_v62 = vld [vmem:[#allocation11 + $0x928] sm:$0xff]  ;;  %v5236_v45 = vpop.f32.mrf.mxu1  ;;  %v874_v43 = vmax.f32 %v860_v1, 0.0 }
 0x15c   :  { %5472 = vmatpush.bf16.msra.mxu2 %v10458_v53  ;;  %v10487_v53 = vld [vmem:[#allocation11 + $0x968] sm:$0xff] }
 0x15d   :  { %5486 = vmatpush.bf16.msra.mxu3 %v10466_v63  ;;  %5445 = vmatmul.bf16.vlgmr.msra.gmra.mxu0 %v7641_v7  ;;  %v11763_v63 = vpop.f32.mrf.mxu2  ;;  %v10501_v7 = vld [vmem:[#allocation11 + $0x9d8] sm:$0xff] }
 0x15e   :  { %5493 = vmatpush.bf16.msrb.mxu0 %v10481_v38  ;;  %5459 = vmatmul.bf16.vlgmr.msra.gmra.mxu1 %v7645_v15  ;;  %v11765_v38 = vpop.f32.mrf.mxu3  ;;  %v875_v15 = vmax.f32 %v861_v22, 0.0 }
 0x15f   :  { %5507 = vmatpush.bf16.msrb.mxu1 %v10489_v54  ;;  %5473 = vmatmul.bf16.vlgmr.msra.gmra.mxu2 %v7649_v10 }
 0x160   :  { %5521 = vmatpush.bf16.msrb.mxu2 %v10497_v59  ;;  %5487 = vmatmul.bf16.vlgmr.msra.gmra.mxu3 %v7653_v19  ;;  %v889_v59 = vsub.f32 %v11770_v60, %v11679_v39  ;;  %v882_v39 = vmax.f32 %v868_v23, 0.0 }
 0x161   :  { %5535 = vmatpush.bf16.msrb.mxu3 %v10505_v24  ;;  %v5222_v54 = vpop.f32.mrf.mxu0  ;;  %v890_v24 = vsub.f32 %v11770_v60, %v11683_v47  ;;  %v910_v47 = vmax.f32 %v896_v5, 0.0  ;;  %v10475_v5 = vld [vmem:[#allocation11 + $0x908] sm:$0xff] }
 0x162   :  { %5494 = vmatpush.bf16.msrb.mxu0 %v10480_v42  ;;  %v5223_v26 = vadd.f32 %v5222_v54, %v11737_v36  ;;  %v867_v36 = vsub.f32 %v11687_v6, %v11768_v58 }
 0x163   :  { %5508 = vmatpush.bf16.msrb.mxu1 %v10488_v49 }
 0x164   :  { %5522 = vmatpush.bf16.msrb.mxu2 %v10496_v56  ;;  %v5237_v41 = vadd.f32 %v5236_v45, %v5223_v26  ;;  %v881_v19 = vmax.f32 %v867_v36, 0.0  ;;  %v903_v56 = vmax.f32 %v889_v59, 0.0  ;;  %v10476_v26 = vld [vmem:[#allocation11 + $0x910] sm:$0xff] }
 0x165   :  { %5536 = vmatpush.bf16.msrb.mxu3 %v10504_v32  ;;  %v5250_v10 = vpop.f32.mrf.mxu2  ;;  %v904_v32 = vmax.f32 %v890_v24, 0.0  ;;  %v10492_v45 = vld [vmem:[#allocation11 + $0x990] sm:$0xff] }
 0x166   :  { %5495 = vmatpush.bf16.msrb.mxu0 %v10479_v62  ;;  %v5251_v42 = vadd.f32 %v5250_v10, %v5237_v41  ;;  %v5264_v49 = vpop.f32.mrf.mxu3  ;;  %v911_v62 = vmax.f32 %v897_v51, 0.0  ;;  %v924_v41 = vmul.f32 %v910_v47, %v881_v19  ;;  %v10491_v10 = vld [vmem:[#allocation11 + $0x988] sm:$0xff] }
 0x167   :  { %5509 = vmatpush.bf16.msrb.mxu1 %v10487_v53  ;;  %v11788_v53 = vld [vmem:[#allocation4 + $0x30] sm:$0xff] }
 0x168   :  { %5523 = vmatpush.bf16.msrb.mxu2 %v10495_v0  ;;  %v762_v0 = vsub.f32 %v11788_v53, %v11652_v2  ;;  %v11796_v27 = vadd.f32 %v5264_v49, %v5251_v42  ;;  %v925_v1 = vmul.f32 %v911_v62, %v882_v39  ;;  %v10474_v42 = vld [vmem:[#allocation11 + $0x900] sm:$0xff]  ;;  %v10521_v62 = vld [vmem:[#allocation11 + $0xa78] sm:$0xff] }
 0x169   :  { %5537 = vmatpush.bf16.msrb.mxu3 %v10503_v35  ;;  %v11792_v35 = vld [vmem:[#allocation4 + $0x68] sm:$0xff]  ;;  %v10482_v39 = vld [vmem:[#allocation11 + $0x940] sm:$0xff] }
 0x16a   :  { %5496 = vmatpush.bf16.msrb.mxu0 %v10478_v48  ;;  %v769_v54 = vsub.f32 %v11792_v35, %v11652_v2  ;;  %v10484_v48 = vld [vmem:[#allocation11 + $0x950] sm:$0xff]  ;;  %v776_v36 = vmax.f32 %v762_v0, 0.0  ;;  %v791_v2 = vsub.f32 %v11655_v16, %v11788_v53  ;;  %v939_v59 = vmul.f32 %v925_v1, %v925_v1  ;;  %v7656_v0 = vld [vmem:[#allocation2 + $0x90] sm:$0xf]  ;;  %v7666_v1 = vld [vmem:[#allocation2 + $0x178] sm:$0xf0] }
 0x16b   :  { %5510 = vmatpush.bf16.msrb.mxu1 %v10486_v52  ;;  %v917_v52 = vmul.f32 %v903_v56, %v874_v43  ;;  %v798_v24 = vsub.f32 %v11655_v16, %v11792_v35  ;;  %v10499_v43 = vld [vmem:[#allocation11 + $0x9c8] sm:$0xff]  ;;  %v10490_v56 = vld [vmem:[#allocation11 + $0x980] sm:$0xff]  ;;  %v10513_v16 = vld [vmem:[#allocation11 + $0xa38] sm:$0xff] }
 0x16c   :  { %5524 = vmatpush.bf16.msrb.mxu2 %v10494_v46  ;;  %v10500_v46 = vld [vmem:[#allocation11 + $0x9d0] sm:$0xff]  ;;  %v783_v23 = vmax.f32 %v769_v54, 0.0  ;;  %v10176_v54 = vld [vmem:[#allocation2 + $0x16c] sm:$0xf0] }
 0x16d   :  { %5538 = vmatpush.bf16.msrb.mxu3 %v10502_v55  ;;  %v918_v55 = vmul.f32 %v904_v32, %v875_v15  ;;  %v931_v22 = vmul.f32 %v917_v52, %v917_v52  ;;  %v812_v51 = vmax.f32 %v798_v24, 0.0  ;;  %v10498_v32 = vld [vmem:[#allocation11 + $0x9c0] sm:$0xff]  ;;  %v10177_v52 = vld [vmem:[#allocation2 + $0x174] sm:$0xf0] }
 0x16e   :  { %5497 = vmatpush.bf16.msrb.mxu0 %v10477_v18 }
 0x16f   :  { %5511 = vmatpush.bf16.msrb.mxu1 %v10485_v4  ;;  %v932_v18 = vmul.f32 %v918_v55, %v918_v55  ;;  %v938_v4 = vmul.f32 %v924_v41, %v924_v41  ;;  %v826_v47 = vmul.f32 %v812_v51, %v783_v23  ;;  %v7658_v55 = vld [vmem:[#allocation2 + $0x170] sm:$0xf0]  ;;  %v10149_v41 = vld [vmem:[#allocation2 + $0x9c] sm:$0xf]  ;;  %v10537_v23 = vld [vmem:[#allocation11 + $0xaf8] sm:$0xff] }
 0x170   :  { %5525 = vmatpush.bf16.msrb.mxu2 %v10493_v21  ;;  %v10483_v21 = vld [vmem:[#allocation11 + $0x948] sm:$0xff] }
 0x171   :  { %5539 = vmatpush.bf16.msrb.mxu3 %v10501_v7  ;;  %v805_v7 = vmax.f32 %v791_v2, 0.0  ;;  %v945_v15 = vpack.c.bf16 %v932_v18, %v931_v22  ;;  %v949_v19 = vpack.c.bf16 %v939_v59, %v938_v4  ;;  %v7657_v18 = vor.u32 %v10176_v54, %v7656_v0  ;;  %v11802_v59 = vpop.f32.mrf.mxu0  ;;  %v10519_v51 = vld [vmem:[#allocation11 + $0xa68] sm:$0xff]  ;;  %v10526_v54 = vld [vmem:[#allocation11 + $0xaa0] sm:$0xff] }
 0x172   :  { %5498 = vmatpush.bf16.msrb.mxu0 %v10476_v26 }
 0x173   :  { %5512 = vmatpush.bf16.msrb.mxu1 %v10484_v48  ;;  %v819_v49 = vmul.f32 %v805_v7, %v776_v36  ;;  %953 = vst [vmem:[#allocation2 + $0xa8] sm:$0xff] %v945_v15  ;;  %v7664_v48 = vld [vmem:[#allocation2 + $0x98] sm:$0xf]  ;;  %v10529_v36 = vld [vmem:[#allocation11 + $0xab8] sm:$0xff]  ;;  %v10512_v7 = vld [vmem:[#allocation11 + $0xa30] sm:$0xff] }
 0x174   :  { %5526 = vmatpush.bf16.msrb.mxu2 %v10492_v45  ;;  %957 = vst [vmem:[#allocation2 + $0x188] sm:$0xff] %v949_v19  ;;  %v10148_v45 = vld [vmem:[#allocation2 + $0x94] sm:$0xf]  ;;  %v7665_v4 = vor.u32 %v10177_v52, %v7664_v48  ;;  %v10536_v15 = vld [vmem:[#allocation11 + $0xaf0] sm:$0xff]  ;;  %v10511_v19 = vld [vmem:[#allocation11 + $0xa28] sm:$0xff]  ;;  %v862_v52 = vsub.f32 %v11709_v8, %v11768_v58 }
 0x175   :  { %5540 = vmatpush.bf16.msrb.mxu3 %v10500_v46  ;;  %v833_v26 = vmul.f32 %v819_v49, %v819_v49  ;;  %v840_v46 = vmul.f32 %v826_v47, %v826_v47  ;;  %v7661_v24 = vor.u32 %v10148_v45, %v7658_v55  ;;  %v10527_v49 = vld [vmem:[#allocation11 + $0xaa8] sm:$0xff]  ;;  %v863_v45 = vsub.f32 %v11713_v12, %v11768_v58  ;;  %v10509_v55 = vld [vmem:[#allocation11 + $0xa18] sm:$0xff] }
 0x176   :  { %5499 = vmatpush.bf16.msrb.mxu0 %v10475_v5  ;;  %v7669_v5 = vor.u32 %v10149_v41, %v7666_v1  ;;  %v10517_v41 = vld [vmem:[#allocation11 + $0xa58] sm:$0xff]  ;;  %v891_v1 = vsub.f32 %v11770_v60, %v11709_v8 }
 0x177   :  { %5513 = vmatpush.bf16.msrb.mxu1 %v10483_v21  ;;  %v844_v22 = vpack.c.bf16 %v833_v26, %v833_v26  ;;  %v848_v2 = vpack.c.bf16 %v840_v46, %v840_v46  ;;  %v11804_v21 = vpop.f32.mrf.mxu1  ;;  %v10534_v26 = vld [vmem:[#allocation11 + $0xae0] sm:$0xff]  ;;  %v869_v46 = vsub.f32 %v11717_v13, %v11768_v58 }
 0x178   :  { %5527 = vmatpush.bf16.msrb.mxu2 %v10491_v10  ;;  %v10520_v10 = vld [vmem:[#allocation11 + $0xa70] sm:$0xff] }
 0x179   :  { %5541 = vmatpush.bf16.msrb.mxu3 %v10499_v43  ;;  %852 = vst [vmem:[#allocation2 + $0xa4] sm:$0xf] %v844_v22  ;;  %v10528_v43 = vld [vmem:[#allocation11 + $0xab0] sm:$0xff]  ;;  %v892_v22 = vsub.f32 %v11770_v60, %v11713_v12 }
 0x17a   :  { %5500 = vmatpush.bf16.msrb.mxu0 %v10474_v42  ;;  %856 = vst [vmem:[#allocation2 + $0x184] sm:$0xf] %v848_v2  ;;  %v11806_v42 = vpop.f32.mrf.mxu2  ;;  %v10533_v2 = vld [vmem:[#allocation11 + $0xad8] sm:$0xff] }
 0x17b   :  { %5514 = vmatpush.bf16.msrb.mxu1 %v10482_v39  ;;  %v10535_v39 = vld [vmem:[#allocation11 + $0xae8] sm:$0xff] }
 0x17c   :  { %5528 = vmatpush.bf16.msrb.mxu2 %v10490_v56  ;;  %v11808_v56 = vpop.f32.mrf.mxu3 }
 0x17d   :  { %5542 = vmatpush.bf16.msrb.mxu3 %v10498_v32  ;;  %5501 = vmatmul.bf16.vlgmr.msrb.gmra.mxu0 %v7657_v18  ;;  %v5278_v32 = vpop.f32.mrf.mxu0 }
 0x17e   :  { %5549 = vmatpush.bf16.msra.mxu0 %v10513_v16  ;;  %5515 = vmatmul.bf16.vlgmr.msrb.gmra.mxu1 %v7661_v24  ;;  %v5279_v47 = vadd.f32 %v5278_v32, %v11796_v27  ;;  %v10510_v16 = vld [vmem:[#allocation11 + $0xa20] sm:$0xff]  ;;  %v870_v27 = vsub.f32 %v11721_v14, %v11768_v58  ;;  %v877_v24 = vmax.f32 %v863_v45, 0.0  ;;  %v864_v32 = vsub.f32 %v11743_v17, %v11768_v58 }
 0x17f   :  { %5563 = vmatpush.bf16.msra.mxu1 %v10521_v62  ;;  %5529 = vmatmul.bf16.vlgmr.msrb.gmra.mxu2 %v7665_v4  ;;  %v10518_v62 = vld [vmem:[#allocation11 + $0xa60] sm:$0xff]  ;;  %v5292_v0 = vpop.f32.mrf.mxu1  ;;  %v876_v4 = vmax.f32 %v862_v52, 0.0 }
 0x180   :  { %5577 = vmatpush.bf16.msra.mxu2 %v10529_v36  ;;  %5543 = vmatmul.bf16.vlgmr.msrb.gmra.mxu3 %v7669_v5  ;;  %v5293_v48 = vadd.f32 %v5292_v0, %v5279_v47  ;;  %v898_v36 = vsub.f32 %v11770_v60, %v11717_v13  ;;  %v883_v5 = vmax.f32 %v869_v46, 0.0 }
 0x181   :  { %5591 = vmatpush.bf16.msra.mxu3 %v10537_v23  ;;  %v10525_v23 = vld [vmem:[#allocation11 + $0xa98] sm:$0xff] }
 0x182   :  { %5550 = vmatpush.bf16.msra.mxu0 %v10512_v7  ;;  %v5306_v18 = vpop.f32.mrf.mxu2  ;;  %v899_v7 = vsub.f32 %v11770_v60, %v11721_v14 }
 0x183   :  { %5564 = vmatpush.bf16.msra.mxu1 %v10520_v10  ;;  %v5307_v10 = vadd.f32 %v5306_v18, %v5293_v48  ;;  %v10532_v48 = vld [vmem:[#allocation11 + $0xad0] sm:$0xff]  ;;  %v10507_v18 = vld [vmem:[#allocation11 + $0xa08] sm:$0xff] }
 0x184   :  { %5578 = vmatpush.bf16.msra.mxu2 %v10528_v43  ;;  %v5320_v43 = vpop.f32.mrf.mxu3 }
 0x185   :  { %5592 = vmatpush.bf16.msra.mxu3 %v10536_v15  ;;  %v884_v15 = vmax.f32 %v870_v27, 0.0  ;;  %v11829_v47 = vadd.f32 %v5320_v43, %v5307_v10  ;;  %v10531_v10 = vld [vmem:[#allocation11 + $0xac8] sm:$0xff] }
 0x186   :  { %5551 = vmatpush.bf16.msra.mxu0 %v10511_v19  ;;  %v905_v19 = vmax.f32 %v891_v1, 0.0 }
 0x187   :  { %5565 = vmatpush.bf16.msra.mxu1 %v10519_v51  ;;  %v906_v51 = vmax.f32 %v892_v22, 0.0  ;;  %12253 = vst [vmem:[#allocation38_spill] sm:$0xff] %v11829_v47 }
 0x188   :  { %5579 = vmatpush.bf16.msra.mxu2 %v10527_v49  ;;  %v912_v49 = vmax.f32 %v898_v36, 0.0  ;;  %v919_v0 = vmul.f32 %v905_v19, %v876_v4 }
 0x189   :  { %5593 = vmatpush.bf16.msra.mxu3 %v10535_v39  ;;  %v913_v39 = vmax.f32 %v899_v7, 0.0  ;;  %v920_v52 = vmul.f32 %v906_v51, %v877_v24  ;;  %v893_v24 = vsub.f32 %v11770_v60, %v11743_v17  ;;  %v10523_v7 = vld [vmem:[#allocation11 + $0xa88] sm:$0xff]  ;;  %v900_v51 = vsub.f32 %v11770_v60, %v11751_v25 }
 0x18a   :  { %5552 = vmatpush.bf16.msra.mxu0 %v10510_v16  ;;  %v10508_v16 = vld [vmem:[#allocation11 + $0xa10] sm:$0xff]  ;;  %v926_v45 = vmul.f32 %v912_v49, %v883_v5  ;;  %v933_v27 = vmul.f32 %v919_v0, %v919_v0  ;;  %v894_v5 = vsub.f32 %v11770_v60, %v11747_v33  ;;  %v10506_v49 = vld [vmem:[#allocation11 + $0xa00] sm:$0xff] }
 0x18b   :  { %5566 = vmatpush.bf16.msra.mxu1 %v10518_v62  ;;  %v10516_v62 = vld [vmem:[#allocation11 + $0xa50] sm:$0xff]  ;;  %v927_v46 = vmul.f32 %v913_v39, %v884_v15  ;;  %v934_v1 = vmul.f32 %v920_v52, %v920_v52  ;;  %v10522_v0 = vld [vmem:[#allocation11 + $0xa80] sm:$0xff] }
 0x18c   :  { %5580 = vmatpush.bf16.msra.mxu2 %v10526_v54  ;;  %v865_v54 = vsub.f32 %v11747_v33, %v11768_v58  ;;  %v940_v22 = vmul.f32 %v926_v45, %v926_v45  ;;  %v908_v17 = vmax.f32 %v894_v5, 0.0  ;;  %v10530_v33 = vld [vmem:[#allocation11 + $0xac0] sm:$0xff]  ;;  %v7672_v52 = vld [vmem:[#allocation2 + $0xa0] sm:$0xf] }
 0x18d   :  { %5594 = vmatpush.bf16.msra.mxu3 %v10534_v26  ;;  %v10524_v26 = vld [vmem:[#allocation11 + $0xa90] sm:$0xff]  ;;  %v941_v36 = vmul.f32 %v927_v46, %v927_v46  ;;  %v946_v43 = vpack.c.bf16 %v934_v1, %v933_v27  ;;  %v7680_v27 = vld [vmem:[#allocation2 + $0xa8] sm:$0xf] }
 0x18e   :  { %5553 = vmatpush.bf16.msra.mxu0 %v10509_v55  ;;  %v871_v55 = vsub.f32 %v11751_v25, %v11768_v58  ;;  %v879_v4 = vmax.f32 %v865_v54, 0.0  ;;  %v914_v54 = vmax.f32 %v900_v51, 0.0  ;;  %v10178_v45 = vld [vmem:[#allocation2 + $0x17c] sm:$0xf0] }
 0x18f   :  { %5567 = vmatpush.bf16.msra.mxu1 %v10517_v41  ;;  %v872_v41 = vsub.f32 %v11755_v28, %v11768_v58  ;;  %v950_v15 = vpack.c.bf16 %v941_v36, %v940_v22  ;;  %954 = vst [vmem:[#allocation2 + $0xb0] sm:$0xff] %v946_v43  ;;  %v10150_v22 = vld [vmem:[#allocation2 + $0xa4] sm:$0xf]  ;;  %v10569_v43 = vld [vmem:[#allocation11 + $0xbf8] sm:$0xff] }
 0x190   :  { %5581 = vmatpush.bf16.msra.mxu2 %v10525_v23  ;;  %v10515_v23 = vld [vmem:[#allocation11 + $0xa48] sm:$0xff]  ;;  %v885_v19 = vmax.f32 %v871_v55, 0.0  ;;  %v10151_v55 = vld [vmem:[#allocation2 + $0xac] sm:$0xf]  ;;  %v7674_v36 = vld [vmem:[#allocation2 + $0x180] sm:$0xf0] }
 0x191   :  { %5595 = vmatpush.bf16.msra.mxu3 %v10533_v2  ;;  %v878_v2 = vmax.f32 %v864_v32, 0.0  ;;  %v886_v39 = vmax.f32 %v872_v41, 0.0  ;;  %v901_v32 = vsub.f32 %v11770_v60, %v11755_v28  ;;  %958 = vst [vmem:[#allocation2 + $0x190] sm:$0xff] %v950_v15  ;;  %v10179_v28 = vld [vmem:[#allocation2 + $0x184] sm:$0xf0]  ;;  %v922_v41 = vmul.f32 %v908_v17, %v879_v4  ;;  %v10560_v17 = vld [vmem:[#allocation11 + $0xbb0] sm:$0xff] }
 0x192   :  { %5554 = vmatpush.bf16.msra.mxu0 %v10508_v16  ;;  %v907_v16 = vmax.f32 %v893_v24, 0.0  ;;  %v928_v1 = vmul.f32 %v914_v54, %v885_v19  ;;  %v7682_v24 = vld [vmem:[#allocation2 + $0x188] sm:$0xf0]  ;;  %v7673_v15 = vor.u32 %v10178_v45, %v7672_v52  ;;  %v10544_v19 = vld [vmem:[#allocation11 + $0xb30] sm:$0xff]  ;;  %v10566_v52 = vld [vmem:[#allocation11 + $0xbe0] sm:$0xff]  ;;  %v11845_v45 = vstv %s7508_s29  ;;  %s12104_s29 = sld [smem:[#allocation20 + $0x6]] }
 0x193   :  { %5568 = vmatpush.bf16.msra.mxu1 %v10516_v62  ;;  %v10514_v62 = vld [vmem:[#allocation11 + $0xa40] sm:$0xff]  ;;  %v915_v25 = vmax.f32 %v901_v32, 0.0  ;;  %v936_v51 = vmul.f32 %v922_v41, %v922_v41  ;;  %v7685_v32 = vor.u32 %v10151_v55, %v7682_v24  ;;  %v10568_v54 = vld [vmem:[#allocation11 + $0xbf0] sm:$0xff]  ;;  %v10541_v55 = vld [vmem:[#allocation11 + $0xb18] sm:$0xff] }
 0x194   :  { %5582 = vmatpush.bf16.msra.mxu2 %v10524_v26  ;;  %v10545_v26 = vld [vmem:[#allocation11 + $0xb38] sm:$0xff]  ;;  %v921_v46 = vmul.f32 %v907_v16, %v878_v2  ;;  %v942_v47 = vmul.f32 %v928_v1, %v928_v1  ;;  %v7681_v2 = vor.u32 %v10179_v28, %v7680_v27  ;;  %v10552_v16 = vld [vmem:[#allocation11 + $0xb70] sm:$0xff]  ;;  %v895_v27 = vsub.f32 %v11770_v60, %v11788_v53 }
 0x195   :  { %5596 = vmatpush.bf16.msra.mxu3 %v10532_v48  ;;  %v10553_v48 = vld [vmem:[#allocation11 + $0xb78] sm:$0xff]  ;;  %v929_v5 = vmul.f32 %v915_v25, %v886_v39  ;;  %v866_v25 = vsub.f32 %v11788_v53, %v11768_v58  ;;  %v902_v28 = vsub.f32 %v11770_v60, %v11792_v35  ;;  %v10837_v1 = vld [vmem:[#allocation4] sm:$0xff] }
 0x196   :  { %5555 = vmatpush.bf16.msra.mxu0 %v10507_v18  ;;  %v935_v18 = vmul.f32 %v921_v46, %v921_v46  ;;  %v873_v46 = vsub.f32 %v11792_v35, %v11768_v58  ;;  %v10549_v41 = vld [vmem:[#allocation11 + $0xb58] sm:$0xff]  ;;  %v11859_v58 = vstv %s7509_s4  ;;  %s12106_s4 = sld [smem:[#allocation21 + $0x6]] }
 0x197   :  { %5569 = vmatpush.bf16.msra.mxu1 %v10515_v23  ;;  %v10561_v23 = vld [vmem:[#allocation11 + $0xbb8] sm:$0xff]  ;;  %v880_v60 = vmax.f32 %v866_v25, 0.0 }
 0x198   :  { %5583 = vmatpush.bf16.msra.mxu2 %v10523_v7  ;;  %v943_v7 = vmul.f32 %v929_v5, %v929_v5  ;;  %v947_v4 = vpack.c.bf16 %v936_v51, %v935_v18  ;;  %v971_v5 = vsub.f32 %v11687_v6, %v11845_v45  ;;  %v10557_v18 = vld [vmem:[#allocation11 + $0xb98] sm:$0xff]  ;;  %v909_v51 = vmax.f32 %v895_v27, 0.0  ;;  %v10540_v6 = vld [vmem:[#allocation11 + $0xb10] sm:$0xff] }
 0x199   :  { %5597 = vmatpush.bf16.msra.mxu3 %v10531_v10  ;;  %v7677_v10 = vor.u32 %v10150_v22, %v7674_v36  ;;  %v964_v22 = vsub.f32 %v10837_v1, %v11845_v45  ;;  %v10838_v36 = vld [vmem:[#allocation4 + $0x8] sm:$0xff] }
 0x19a   :  { %5556 = vmatpush.bf16.msra.mxu0 %v10506_v49  ;;  %v951_v39 = vpack.c.bf16 %v943_v7, %v942_v47  ;;  %955 = vst [vmem:[#allocation2 + $0xb8] sm:$0xff] %v947_v4  ;;  %v10543_v49 = vld [vmem:[#allocation11 + $0xb28] sm:$0xff]  ;;  %v965_v24 = vsub.f32 %v10838_v36, %v11845_v45  ;;  %v993_v4 = vsub.f32 %v11859_v58, %v10837_v1 }
 0x19b   :  { %5570 = vmatpush.bf16.msra.mxu1 %v10514_v62  ;;  %v10551_v62 = vld [vmem:[#allocation11 + $0xb68] sm:$0xff] }
 0x19c   :  { %5584 = vmatpush.bf16.msra.mxu2 %v10522_v0  ;;  %959 = vst [vmem:[#allocation2 + $0x198] sm:$0xff] %v951_v39  ;;  %v10559_v0 = vld [vmem:[#allocation11 + $0xba8] sm:$0xff]  ;;  %v979_v39 = vmax.f32 %v965_v24, 0.0 }
 0x19d   :  { %5598 = vmatpush.bf16.msra.mxu3 %v10530_v33  ;;  %5557 = vmatmul.bf16.vlgmr.msra.gmra.mxu0 %v7673_v15  ;;  %v10567_v47 = vld [vmem:[#allocation11 + $0xbe8] sm:$0xff]  ;;  %v10542_v33 = vld [vmem:[#allocation11 + $0xb20] sm:$0xff]  ;;  %v916_v15 = vmax.f32 %v902_v28, 0.0 }
 0x19e   :  { %5605 = vmatpush.bf16.msrb.mxu0 %v10545_v26  ;;  %5571 = vmatmul.bf16.vlgmr.msra.gmra.mxu1 %v7677_v10  ;;  %v10550_v26 = vld [vmem:[#allocation11 + $0xb60] sm:$0xff]  ;;  %v923_v10 = vmul.f32 %v909_v51, %v880_v60  ;;  %v10539_v1 = vld [vmem:[#allocation11 + $0xb08] sm:$0xff] }
 0x19f   :  { %5619 = vmatpush.bf16.msrb.mxu1 %v10553_v48  ;;  %5585 = vmatmul.bf16.vlgmr.msra.gmra.mxu2 %v7681_v2  ;;  %v10558_v48 = vld [vmem:[#allocation11 + $0xba0] sm:$0xff]  ;;  %v10839_v2 = vld [vmem:[#allocation4 + $0x40] sm:$0xff] }
 0x1a0   :  { %5633 = vmatpush.bf16.msrb.mxu2 %v10561_v23  ;;  %5599 = vmatmul.bf16.vlgmr.msra.gmra.mxu3 %v7685_v32  ;;  %v10565_v23 = vld [vmem:[#allocation11 + $0xbd8] sm:$0xff]  ;;  %v972_v7 = vsub.f32 %v10839_v2, %v11845_v45  ;;  %v978_v32 = vmax.f32 %v964_v22, 0.0  ;;  %v1001_v25 = vsub.f32 %v11859_v58, %v10839_v2  ;;  %v10547_v22 = vld [vmem:[#allocation11 + $0xb48] sm:$0xff]  ;;  %v10546_v2 = vld [vmem:[#allocation11 + $0xb40] sm:$0xff] }
 0x1a1   :  { %5647 = vmatpush.bf16.msrb.mxu3 %v10569_v43  ;;  %v887_v43 = vmax.f32 %v873_v46, 0.0  ;;  %v966_v46 = vsub.f32 %v11709_v8, %v11845_v45  ;;  %v10563_v8 = vld [vmem:[#allocation11 + $0xbc8] sm:$0xff] }
 0x1a2   :  { %5606 = vmatpush.bf16.msrb.mxu0 %v10544_v19  ;;  %v10548_v19 = vld [vmem:[#allocation11 + $0xb50] sm:$0xff]  ;;  %v1015_v24 = vmax.f32 %v1001_v25, 0.0  ;;  %v10842_v25 = vld [vmem:[#allocation4 + $0x18] sm:$0xff] }
 0x1a3   :  { %5620 = vmatpush.bf16.msrb.mxu1 %v10552_v16  ;;  %v930_v16 = vmul.f32 %v916_v15, %v887_v43  ;;  %v10538_v15 = vld [vmem:[#allocation11 + $0xb00] sm:$0xff] }
 0x1a4   :  { %5634 = vmatpush.bf16.msrb.mxu2 %v10560_v17  ;;  %v985_v17 = vmax.f32 %v971_v5, 0.0  ;;  %v967_v5 = vsub.f32 %v11713_v12, %v11845_v45  ;;  %v10562_v12 = vld [vmem:[#allocation11 + $0xbc0] sm:$0xff] }
 0x1a5   :  { %5648 = vmatpush.bf16.msrb.mxu3 %v10568_v54  ;;  %v10556_v54 = vld [vmem:[#allocation11 + $0xb90] sm:$0xff] }
 0x1a6   :  { %5607 = vmatpush.bf16.msrb.mxu0 %v10543_v49  ;;  %v10564_v49 = vld [vmem:[#allocation11 + $0xbd0] sm:$0xff] }
 0x1a7   :  { %5621 = vmatpush.bf16.msrb.mxu1 %v10551_v62  ;;  %v937_v62 = vmul.f32 %v923_v10, %v923_v10  ;;  %v974_v10 = vsub.f32 %v11721_v14, %v11845_v45  ;;  %v10585_v14 = vld [vmem:[#allocation11 + $0xc78] sm:$0xff] }
 0x1a8   :  { %5635 = vmatpush.bf16.msrb.mxu2 %v10559_v0  ;;  %v994_v0 = vsub.f32 %v11859_v58, %v10838_v36 }
 0x1a9   :  { %5649 = vmatpush.bf16.msrb.mxu3 %v10567_v47  ;;  %v10840_v47 = vld [vmem:[#allocation4 + $0x38] sm:$0xff]  ;;  %v948_v27 = vpack.c.bf16 %v937_v62, %v937_v62  ;;  %v981_v62 = vmax.f32 %v967_v5, 0.0 }
 0x1aa   :  { %5608 = vmatpush.bf16.msrb.mxu0 %v10542_v33  ;;  %v1000_v33 = vsub.f32 %v11859_v58, %v10840_v47  ;;  %v1008_v28 = vmax.f32 %v994_v0, 0.0  ;;  %v10841_v0 = vld [vmem:[#allocation4 + $0x10] sm:$0xff] }
 0x1ab   :  { %5622 = vmatpush.bf16.msrb.mxu1 %v10550_v26  ;;  %v1007_v26 = vmax.f32 %v993_v4, 0.0  ;;  %956 = vst [vmem:[#allocation2 + $0xc0] sm:$0xf] %v948_v27  ;;  %v7688_v4 = vld [vmem:[#allocation2 + $0xb0] sm:$0xf]  ;;  %v995_v47 = vsub.f32 %v11859_v58, %v10841_v0  ;;  %v996_v27 = vsub.f32 %v11859_v58, %v10842_v25 }
 0x1ac   :  { %5636 = vmatpush.bf16.msrb.mxu2 %v10558_v48  ;;  %v944_v48 = vmul.f32 %v930_v16, %v930_v16  ;;  %v1022_v60 = vmul.f32 %v1008_v28, %v979_v39  ;;  %v10577_v16 = vld [vmem:[#allocation11 + $0xc38] sm:$0xff]  ;;  %v10180_v39 = vld [vmem:[#allocation2 + $0x18c] sm:$0xf0] }
 0x1ad   :  { %5650 = vmatpush.bf16.msrb.mxu3 %v10566_v52  ;;  %v986_v52 = vmax.f32 %v972_v7, 0.0  ;;  %v10843_v28 = vld [vmem:[#allocation4 + $0x48] sm:$0xff]  ;;  %v1009_v5 = vmax.f32 %v995_v47, 0.0  ;;  %v10576_v47 = vld [vmem:[#allocation11 + $0xc30] sm:$0xff]  ;;  %v10590_v25 = vld [vmem:[#allocation11 + $0xca0] sm:$0xff] }
 0x1ae   :  { %5609 = vmatpush.bf16.msrb.mxu0 %v10541_v55  ;;  %v1014_v55 = vmax.f32 %v1000_v33, 0.0  ;;  %v952_v36 = vpack.c.bf16 %v944_v48, %v944_v48  ;;  %v7696_v33 = vld [vmem:[#allocation2 + $0xb8] sm:$0xf] }
 0x1af   :  { %5623 = vmatpush.bf16.msrb.mxu1 %v10549_v41  ;;  %v1021_v41 = vmul.f32 %v1007_v26, %v978_v32  ;;  %v1029_v7 = vmul.f32 %v1015_v24, %v986_v52  ;;  %v10554_v32 = vld [vmem:[#allocation11 + $0xb80] sm:$0xff]  ;;  %v10181_v26 = vld [vmem:[#allocation2 + $0x194] sm:$0xf0] }
 0x1b0   :  { %5637 = vmatpush.bf16.msrb.mxu2 %v10557_v18  ;;  %v973_v18 = vsub.f32 %v11717_v13, %v11845_v45  ;;  %v1028_v43 = vmul.f32 %v1014_v55, %v985_v17  ;;  %960 = vst [vmem:[#allocation2 + $0x1a0] sm:$0xf] %v952_v36  ;;  %v1036_v13 = vmul.f32 %v1022_v60, %v1022_v60  ;;  %v7690_v17 = vld [vmem:[#allocation2 + $0x190] sm:$0xf0] }
 0x1b1   :  { %5651 = vmatpush.bf16.msrb.mxu3 %v10565_v23  ;;  %v10555_v23 = vld [vmem:[#allocation11 + $0xb88] sm:$0xff]  ;;  %v1035_v51 = vmul.f32 %v1021_v41, %v1021_v41  ;;  %v1002_v55 = vsub.f32 %v11859_v58, %v10843_v28  ;;  %v10844_v36 = vld [vmem:[#allocation4 + $0x50] sm:$0xff]  ;;  %v7689_v60 = vor.u32 %v10180_v39, %v7688_v4  ;;  %v10584_v4 = vld [vmem:[#allocation11 + $0xc70] sm:$0xff] }
 0x1b2   :  { %5610 = vmatpush.bf16.msrb.mxu0 %v10540_v6  ;;  %v11874_v6 = vld [vmem:[#allocation2 + $0xb4] sm:$0xf]  ;;  %v987_v52 = vmax.f32 %v973_v18, 0.0  ;;  %v10153_v41 = vld [vmem:[#allocation2 + $0xbc] sm:$0xf]  ;;  %v1003_v24 = vsub.f32 %v11859_v58, %v10844_v36  ;;  %v1010_v18 = vmax.f32 %v996_v27, 0.0 }
 0x1b3   :  { %5624 = vmatpush.bf16.msrb.mxu1 %v10548_v19  ;;  %v1042_v19 = vmul.f32 %v1028_v43, %v1028_v43  ;;  %v1049_v48 = vpack.c.bf16 %v1036_v13, %v1035_v51  ;;  %v7693_v43 = vor.u32 %v11874_v6, %v7690_v17  ;;  %v1016_v51 = vmax.f32 %v1002_v55, 0.0  ;;  %v10592_v17 = vld [vmem:[#allocation11 + $0xcb0] sm:$0xff]  ;;  %v10598_v27 = vld [vmem:[#allocation11 + $0xce0] sm:$0xff] }
 0x1b4   :  { %5638 = vmatpush.bf16.msrb.mxu2 %v10556_v54  ;;  %v1043_v54 = vmul.f32 %v1029_v7, %v1029_v7  ;;  %v7697_v7 = vor.u32 %v10181_v26, %v7696_v33  ;;  %v1017_v13 = vmax.f32 %v1003_v24, 0.0  ;;  %v10599_v26 = vld [vmem:[#allocation11 + $0xce8] sm:$0xff]  ;;  %v10845_v28 = vld [vmem:[#allocation4 + $0x20] sm:$0xff] }
 0x1b5   :  { %5652 = vmatpush.bf16.msrb.mxu3 %v10564_v49  ;;  %v980_v49 = vmax.f32 %v966_v46, 0.0  ;;  %1057 = vst [vmem:[#allocation2 + $0xc4] sm:$0xff] %v1049_v48  ;;  %v10574_v48 = vld [vmem:[#allocation11 + $0xc20] sm:$0xff]  ;;  %v968_v55 = vsub.f32 %v10845_v28, %v11845_v45  ;;  %v10848_v36 = vld [vmem:[#allocation4 + $0x60] sm:$0xff] }
 0x1b6   :  { %5611 = vmatpush.bf16.msrb.mxu0 %v10539_v1  ;;  %v7698_v1 = vld [vmem:[#allocation2 + $0x198] sm:$0xf0]  ;;  %v1053_v46 = vpack.c.bf16 %v1043_v54, %v1042_v19  ;;  %v1024_v19 = vmul.f32 %v1010_v18, %v981_v62  ;;  %v1030_v54 = vmul.f32 %v1016_v51, %v987_v52  ;;  %v10582_v52 = vld [vmem:[#allocation11 + $0xc60] sm:$0xff]  ;;  %v976_v24 = vsub.f32 %v10848_v36, %v11845_v45 }
 0x1b7   :  { %5625 = vmatpush.bf16.msrb.mxu1 %v10547_v22  ;;  %v988_v22 = vmax.f32 %v974_v10, 0.0  ;;  %v1023_v0 = vmul.f32 %v1009_v5, %v980_v49  ;;  %v7701_v10 = vor.u32 %v10153_v41, %v7698_v1  ;;  %v10846_v41 = vld [vmem:[#allocation4 + $0x28] sm:$0xff]  ;;  %v997_v5 = vsub.f32 %v11859_v58, %v10845_v28 }
 0x1b8   :  { %5639 = vmatpush.bf16.msrb.mxu2 %v10555_v23  ;;  %v10593_v23 = vld [vmem:[#allocation11 + $0xcb8] sm:$0xff]  ;;  %1061 = vst [vmem:[#allocation2 + $0x1a4] sm:$0xff] %v1053_v46  ;;  %v1044_v33 = vmul.f32 %v1030_v54, %v1030_v54  ;;  %v969_v1 = vsub.f32 %v10846_v41, %v11845_v45  ;;  %v10847_v46 = vld [vmem:[#allocation4 + $0x58] sm:$0xff]  ;;  %v982_v18 = vmax.f32 %v968_v55, 0.0 }
 0x1b9   :  { %5653 = vmatpush.bf16.msrb.mxu3 %v10563_v8  ;;  %v10601_v8 = vld [vmem:[#allocation11 + $0xcf8] sm:$0xff]  ;;  %v1031_v39 = vmul.f32 %v1017_v13, %v988_v22  ;;  %v1037_v6 = vmul.f32 %v1023_v0, %v1023_v0  ;;  %v975_v22 = vsub.f32 %v10847_v46, %v11845_v45  ;;  %v1011_v54 = vmax.f32 %v997_v5, 0.0  ;;  %v10571_v55 = vld [vmem:[#allocation11 + $0xc08] sm:$0xff] }
 0x1ba   :  { %5612 = vmatpush.bf16.msrb.mxu0 %v10538_v15  ;;  %v10600_v15 = vld [vmem:[#allocation11 + $0xcf0] sm:$0xff]  ;;  %v983_v51 = vmax.f32 %v969_v1, 0.0  ;;  %v10589_v13 = vld [vmem:[#allocation11 + $0xc98] sm:$0xff] }
 0x1bb   :  { %5626 = vmatpush.bf16.msrb.mxu1 %v10546_v2  ;;  %v1038_v2 = vmul.f32 %v1024_v19, %v1024_v19  ;;  %v1045_v49 = vmul.f32 %v1031_v39, %v1031_v39  ;;  %v10597_v0 = vld [vmem:[#allocation11 + $0xcd8] sm:$0xff]  ;;  %v990_v19 = vmax.f32 %v976_v24, 0.0  ;;  %v10595_v24 = vld [vmem:[#allocation11 + $0xcc8] sm:$0xff] }
 0x1bc   :  { %5640 = vmatpush.bf16.msrb.mxu2 %v10554_v32 }
 0x1bd   :  { %5654 = vmatpush.bf16.msrb.mxu3 %v10562_v12  ;;  %5613 = vmatmul.bf16.vlgmr.msrb.gmra.mxu0 %v7689_v60  ;;  %v1050_v32 = vpack.c.bf16 %v1038_v2, %v1037_v6  ;;  %v10575_v12 = vld [vmem:[#allocation11 + $0xc28] sm:$0xff]  ;;  %v1054_v62 = vpack.c.bf16 %v1045_v49, %v1044_v33  ;;  %v10573_v60 = vld [vmem:[#allocation11 + $0xc18] sm:$0xff]  ;;  %v977_v6 = vsub.f32 %v11792_v35, %v11845_v45  ;;  %v10572_v2 = vld [vmem:[#allocation11 + $0xc10] sm:$0xff] }
 0x1be   :  { %5661 = vmatpush.bf16.msra.mxu0 %v10577_v16  ;;  %5627 = vmatmul.bf16.vlgmr.msrb.gmra.mxu1 %v7693_v43  ;;  %v10583_v16 = vld [vmem:[#allocation11 + $0xc68] sm:$0xff]  ;;  %v10581_v43 = vld [vmem:[#allocation11 + $0xc58] sm:$0xff]  ;;  %v10580_v33 = vld [vmem:[#allocation11 + $0xc50] sm:$0xff] }
 0x1bf   :  { %5675 = vmatpush.bf16.msra.mxu1 %v10585_v14  ;;  %5641 = vmatmul.bf16.vlgmr.msrb.gmra.mxu2 %v7697_v7  ;;  %v10591_v14 = vld [vmem:[#allocation11 + $0xca8] sm:$0xff]  ;;  %1058 = vst [vmem:[#allocation2 + $0xcc] sm:$0xff] %v1050_v32  ;;  %v1005_v7 = vsub.f32 %v11859_v58, %v10848_v36  ;;  %v10588_v32 = vld [vmem:[#allocation11 + $0xc90] sm:$0xff] }
 0x1c0   :  { %5689 = vmatpush.bf16.msra.mxu2 %v10593_v23  ;;  %5655 = vmatmul.bf16.vlgmr.msrb.gmra.mxu3 %v7701_v10  ;;  %1062 = vst [vmem:[#allocation2 + $0x1ac] sm:$0xff] %v1054_v62  ;;  %v998_v23 = vsub.f32 %v11859_v58, %v10846_v41  ;;  %v989_v10 = vmax.f32 %v975_v22, 0.0  ;;  %v10579_v41 = vld [vmem:[#allocation11 + $0xc48] sm:$0xff] }
 0x1c1   :  { %5703 = vmatpush.bf16.msra.mxu3 %v10601_v8  ;;  %v1004_v8 = vsub.f32 %v11859_v58, %v10847_v46  ;;  %v10587_v36 = vld [vmem:[#allocation11 + $0xc88] sm:$0xff] }
 0x1c2   :  { %5662 = vmatpush.bf16.msra.mxu0 %v10576_v47  ;;  %v970_v47 = vsub.f32 %v11788_v53, %v11845_v45  ;;  %v999_v45 = vsub.f32 %v11859_v58, %v11788_v53 }
 0x1c3   :  { %5676 = vmatpush.bf16.msra.mxu1 %v10584_v4  ;;  %v1012_v4 = vmax.f32 %v998_v23, 0.0  ;;  %v1018_v39 = vmax.f32 %v1004_v8, 0.0  ;;  %v10570_v23 = vld [vmem:[#allocation11 + $0xc00] sm:$0xff] }
 0x1c4   :  { %5690 = vmatpush.bf16.msra.mxu2 %v10592_v17  ;;  %v1019_v17 = vmax.f32 %v1005_v7, 0.0  ;;  %v1013_v46 = vmax.f32 %v999_v45, 0.0  ;;  %v10182_v7 = vld [vmem:[#allocation2 + $0x19c] sm:$0xf0]  ;;  %v10849_v45 = vld [vmem:[#allocation13] ss:$0 sm:$0xff] }
 0x1c5   :  { %5704 = vmatpush.bf16.msra.mxu3 %v10600_v15  ;;  %v1025_v15 = vmul.f32 %v1011_v54, %v982_v18  ;;  %v1026_v49 = vmul.f32 %v1012_v4, %v983_v51  ;;  %v10617_v18 = vld [vmem:[#allocation11 + $0xd78] sm:$0xff]  ;;  %v7704_v51 = vld [vmem:[#allocation2 + $0xc0] sm:$0xf]  ;;  %v10154_v54 = vld [vmem:[#allocation2 + $0xc4] sm:$0xf] }
 0x1c6   :  { %5663 = vmatpush.bf16.msra.mxu0 %v10575_v12  ;;  %v10596_v12 = vld [vmem:[#allocation11 + $0xcd0] sm:$0xff]  ;;  %v1033_v62 = vmul.f32 %v1019_v17, %v990_v19  ;;  %v10183_v19 = vld [vmem:[#allocation2 + $0x1a4] sm:$0xf0]  ;;  %v10155_v4 = vld [vmem:[#allocation2 + $0xcc] sm:$0xf] }
 0x1c7   :  { %5677 = vmatpush.bf16.msra.mxu1 %v10583_v16  ;;  %v1032_v16 = vmul.f32 %v1018_v39, %v989_v10  ;;  %v7712_v10 = vld [vmem:[#allocation2 + $0xc8] sm:$0xf]  ;;  %v7714_v39 = vld [vmem:[#allocation2 + $0x1a8] sm:$0xf0] }
 0x1c8   :  { %5691 = vmatpush.bf16.msra.mxu2 %v10591_v14  ;;  %v1039_v14 = vmul.f32 %v1025_v15, %v1025_v15  ;;  %v1047_v28 = vmul.f32 %v1033_v62, %v1033_v62  ;;  %v10625_v15 = vld [vmem:[#allocation11 + $0xdb8] sm:$0xff]  ;;  %v10616_v62 = vld [vmem:[#allocation11 + $0xd70] sm:$0xff] }
 0x1c9   :  { %5705 = vmatpush.bf16.msra.mxu3 %v10599_v26  ;;  %v984_v26 = vmax.f32 %v970_v47, 0.0  ;;  %v7706_v47 = vld [vmem:[#allocation2 + $0x1a0] sm:$0xf0] }
 0x1ca   :  { %5664 = vmatpush.bf16.msra.mxu0 %v10574_v48  ;;  %v1040_v48 = vmul.f32 %v1026_v49, %v1026_v49  ;;  %v7713_v49 = vor.u32 %v10183_v19, %v7712_v10  ;;  %v10618_v10 = vld [vmem:[#allocation11 + $0xd80] sm:$0xff] }
 0x1cb   :  { %5678 = vmatpush.bf16.msra.mxu1 %v10582_v52  ;;  %v991_v52 = vmax.f32 %v977_v6, 0.0  ;;  %v1027_v53 = vmul.f32 %v1013_v46, %v984_v26  ;;  %v10632_v26 = vld [vmem:[#allocation11 + $0xdf0] sm:$0xff]  ;;  %v10622_v46 = vld [vmem:[#allocation11 + $0xda0] sm:$0xff] }
 0x1cc   :  { %5692 = vmatpush.bf16.msra.mxu2 %v10590_v25  ;;  %v1006_v25 = vsub.f32 %v11859_v58, %v11792_v35  ;;  %v1051_v1 = vpack.c.bf16 %v1040_v48, %v1039_v14  ;;  %v10586_v35 = vld [vmem:[#allocation11 + $0xc80] sm:$0xff]  ;;  %v10624_v14 = vld [vmem:[#allocation11 + $0xdb0] sm:$0xff]  ;;  %v10607_v48 = vld [vmem:[#allocation11 + $0xd28] sm:$0xff] }
 0x1cd   :  { %5706 = vmatpush.bf16.msra.mxu3 %v10598_v27  ;;  %v1046_v27 = vmul.f32 %v1032_v16, %v1032_v16  ;;  %v10594_v58 = vld [vmem:[#allocation11 + $0xcc0] sm:$0xff]  ;;  %v10608_v16 = vld [vmem:[#allocation11 + $0xd30] sm:$0xff] }
 0x1ce   :  { %5665 = vmatpush.bf16.msra.mxu0 %v10573_v60  ;;  %v1020_v22 = vmax.f32 %v1006_v25, 0.0  ;;  %1059 = vst [vmem:[#allocation2 + $0xd4] sm:$0xff] %v1051_v1  ;;  %v10578_v60 = vld [vmem:[#allocation11 + $0xc40] sm:$0xff]  ;;  %v5001_v25 = vadd.f32 %v10849_v45, %v11570_v34 }
 0x1cf   :  { %5679 = vmatpush.bf16.msra.mxu1 %v10581_v43  ;;  %v1055_v5 = vpack.c.bf16 %v1047_v28, %v1046_v27  ;;  %v10609_v43 = vld [vmem:[#allocation11 + $0xd38] sm:$0xff]  ;;  %v10623_v27 = vld [vmem:[#allocation11 + $0xda8] sm:$0xff]  ;;  %v10626_v19 = vld [vmem:[#allocation11 + $0xdc0] sm:$0xff] }
 0x1d0   :  { %5693 = vmatpush.bf16.msra.mxu2 %v10589_v13  ;;  %v1034_v8 = vmul.f32 %v1020_v22, %v991_v52  ;;  %v1041_v13 = vmul.f32 %v1027_v53, %v1027_v53  ;;  %v10615_v52 = vld [vmem:[#allocation11 + $0xd68] sm:$0xff]  ;;  %v5015_v1 = vadd.f32 %v11572_v29, %v5001_v25  ;;  %v10630_v22 = vld [vmem:[#allocation11 + $0xde0] sm:$0xff]  ;;  %v10604_v53 = vld [vmem:[#allocation11 + $0xd10] sm:$0xff] }
 0x1d1   :  { %5707 = vmatpush.bf16.msra.mxu3 %v10597_v0  ;;  %1063 = vst [vmem:[#allocation2 + $0x1b4] sm:$0xff] %v1055_v5  ;;  %v10631_v28 = vld [vmem:[#allocation11 + $0xde8] sm:$0xff]  ;;  %v10621_v5 = vld [vmem:[#allocation11 + $0xd98] sm:$0xff] }
 0x1d2   :  { %5666 = vmatpush.bf16.msra.mxu0 %v10572_v2  ;;  %v1048_v0 = vmul.f32 %v1034_v8, %v1034_v8  ;;  %v1052_v6 = vpack.c.bf16 %v1041_v13, %v1041_v13  ;;  %v10633_v2 = vld [vmem:[#allocation11 + $0xdf8] sm:$0xff]  ;;  %v5029_v34 = vadd.f32 %v11574_v40, %v5015_v1  ;;  %v10612_v8 = vld [vmem:[#allocation11 + $0xd50] sm:$0xff]  ;;  %v11904_v13 = vpop.f32.mrf.mxu1 }
 0x1d3   :  { %5680 = vmatpush.bf16.msra.mxu1 %v10580_v33  ;;  %v7705_v33 = vor.u32 %v10182_v7, %v7704_v51  ;;  %v10627_v51 = vld [vmem:[#allocation11 + $0xdc8] sm:$0xff]  ;;  %v11902_v7 = vpop.f32.mrf.mxu0 }
 0x1d4   :  { %5694 = vmatpush.bf16.msra.mxu2 %v10588_v32  ;;  %v1056_v17 = vpack.c.bf16 %v1048_v0, %v1048_v0  ;;  %1060 = vst [vmem:[#allocation2 + $0xdc] sm:$0xf] %v1052_v6  ;;  %v7709_v32 = vor.u32 %v10154_v54, %v7706_v47  ;;  %v5043_v29 = vadd.f32 %v11576_v50, %v5029_v34  ;;  %v10602_v0 = vld [vmem:[#allocation11 + $0xd00] sm:$0xff] }
 0x1d5   :  { %5708 = vmatpush.bf16.msra.mxu3 %v10596_v12  ;;  %v7717_v12 = vor.u32 %v10155_v4, %v7714_v39  ;;  %v10610_v50 = vld [vmem:[#allocation11 + $0xd40] sm:$0xff]  ;;  %v7728_v6 = vld [vmem:[#allocation2 + $0xd8] sm:$0xf] }
 0x1d6   :  { %5667 = vmatpush.bf16.msra.mxu0 %v10571_v55  ;;  %1064 = vst [vmem:[#allocation2 + $0x1bc] sm:$0xf] %v1056_v17  ;;  %v10606_v55 = vld [vmem:[#allocation11 + $0xd20] sm:$0xff]  ;;  %v5057_v40 = vadd.f32 %v11616_v57, %v5043_v29 }
 0x1d7   :  { %5681 = vmatpush.bf16.msra.mxu1 %v10579_v41  ;;  %v10614_v41 = vld [vmem:[#allocation11 + $0xd60] sm:$0xff] }
 0x1d8   :  { %5695 = vmatpush.bf16.msra.mxu2 %v10587_v36  ;;  %v10605_v36 = vld [vmem:[#allocation11 + $0xd18] sm:$0xff]  ;;  %v7720_v54 = vld [vmem:[#allocation2 + $0xd0] sm:$0xf]  ;;  %v10156_v4 = vld [vmem:[#allocation2 + $0xd4] sm:$0xf]  ;;  %v5071_v57 = vadd.f32 %v11618_v61, %v5057_v40 }
 0x1d9   :  { %5709 = vmatpush.bf16.msra.mxu3 %v10595_v24  ;;  %v10613_v24 = vld [vmem:[#allocation11 + $0xd58] sm:$0xff]  ;;  %v10184_v47 = vld [vmem:[#allocation2 + $0x1ac] sm:$0xf0]  ;;  %v7722_v39 = vld [vmem:[#allocation2 + $0x1b0] sm:$0xf0] }
 0x1da   :  { %5668 = vmatpush.bf16.msra.mxu0 %v10570_v23  ;;  %v10629_v23 = vld [vmem:[#allocation11 + $0xdd8] sm:$0xff]  ;;  %v10185_v17 = vld [vmem:[#allocation2 + $0x1b4] sm:$0xf0] }
 0x1db   :  { %5682 = vmatpush.bf16.msra.mxu1 %v10578_v60  ;;  %v10620_v60 = vld [vmem:[#allocation11 + $0xd90] sm:$0xff] }
 0x1dc   :  { %5696 = vmatpush.bf16.msra.mxu2 %v10586_v35  ;;  %v10628_v35 = vld [vmem:[#allocation11 + $0xdd0] sm:$0xff] }
 0x1dd   :  { %5710 = vmatpush.bf16.msra.mxu3 %v10594_v58  ;;  %5669 = vmatmul.bf16.vlgmr.msra.gmra.mxu0 %v7705_v33  ;;  %v10603_v58 = vld [vmem:[#allocation11 + $0xd08] sm:$0xff]  ;;  %v5085_v33 = vadd.f32 %v11620_v9, %v5071_v57  ;;  %v12254_v40 = vld [vmem:[#allocation38_spill] sm:$0xff] }
 0x1de   :  { %5717 = vmatpush.bf16.msrb.mxu0 %v10609_v43  ;;  %5683 = vmatmul.bf16.vlgmr.msra.gmra.mxu1 %v7709_v32  ;;  %v10611_v43 = vld [vmem:[#allocation11 + $0xd48] sm:$0xff]  ;;  %v7725_v32 = vor.u32 %v10156_v4, %v7722_v39 }
 0x1df   :  { %5731 = vmatpush.bf16.msrb.mxu1 %v10617_v18  ;;  %5697 = vmatmul.bf16.vlgmr.msra.gmra.mxu2 %v7713_v49  ;;  %v10619_v18 = vld [vmem:[#allocation11 + $0xd88] sm:$0xff]  ;;  %v7721_v49 = vor.u32 %v10184_v47, %v7720_v54  ;;  %v5099_v61 = vadd.f32 %v11622_v11, %v5085_v33 }
 0x1e0   :  { %5745 = vmatpush.bf16.msrb.mxu2 %v10625_v15  ;;  %5711 = vmatmul.bf16.vlgmr.msra.gmra.mxu3 %v7717_v12  ;;  %v10157_v15 = vld [vmem:[#allocation2 + $0xdc] sm:$0xf]  ;;  %v7729_v12 = vor.u32 %v10185_v17, %v7728_v6 }
 0x1e1   :  { %5759 = vmatpush.bf16.msrb.mxu3 %v10633_v2  ;;  %v7730_v2 = vld [vmem:[#allocation2 + $0x1b8] sm:$0xf0]  ;;  %v5113_v9 = vadd.f32 %v11700_v37, %v5099_v61 }
 0x1e2   :  { %5718 = vmatpush.bf16.msrb.mxu0 %v10608_v16  ;;  %v7733_v16 = vor.u32 %v10157_v15, %v7730_v2 }
 0x1e3   :  { %5732 = vmatpush.bf16.msrb.mxu1 %v10616_v62  ;;  %v5308_v62 = vpop.f32.mrf.mxu2 }
 0x1e4   :  { %5746 = vmatpush.bf16.msrb.mxu2 %v10624_v14  ;;  %v5322_v14 = vpop.f32.mrf.mxu3 }
 0x1e5   :  { %5760 = vmatpush.bf16.msrb.mxu3 %v10632_v26  ;;  %v5334_v26 = vpop.f32.mrf.mxu0 }
 0x1e6   :  { %5719 = vmatpush.bf16.msrb.mxu0 %v10607_v48  ;;  %v5348_v48 = vpop.f32.mrf.mxu1 }
 0x1e7   :  { %5733 = vmatpush.bf16.msrb.mxu1 %v10615_v52  ;;  %v5127_v52 = vadd.f32 %v11702_v31, %v5113_v9 }
 0x1e8   :  { %5747 = vmatpush.bf16.msrb.mxu2 %v10623_v27 }
 0x1e9   :  { %5761 = vmatpush.bf16.msrb.mxu3 %v10631_v28  ;;  %v5141_v27 = vadd.f32 %v11704_v3, %v5127_v52 }
 0x1ea   :  { %5720 = vmatpush.bf16.msrb.mxu0 %v10606_v55 }
 0x1eb   :  { %5734 = vmatpush.bf16.msrb.mxu1 %v10614_v41  ;;  %v5362_v45 = vpop.f32.mrf.mxu2  ;;  %v5155_v41 = vadd.f32 %v11706_v44, %v5141_v27 }
 0x1ec   :  { %5748 = vmatpush.bf16.msrb.mxu2 %v10622_v46  ;;  %v5376_v25 = vpop.f32.mrf.mxu3 }
 0x1ed   :  { %5762 = vmatpush.bf16.msrb.mxu3 %v10630_v22  ;;  %v5336_v28 = vpop.f32.mrf.mxu0  ;;  %v5169_v1 = vadd.f32 %v11759_v20, %v5155_v41 }
 0x1ee   :  { %5721 = vmatpush.bf16.msrb.mxu0 %v10605_v36  ;;  %v5350_v55 = vpop.f32.mrf.mxu1 }
 0x1ef   :  { %5735 = vmatpush.bf16.msrb.mxu1 %v10613_v24  ;;  %v5183_v24 = vadd.f32 %v11761_v30, %v5169_v1 }
 0x1f0   :  { %5749 = vmatpush.bf16.msrb.mxu2 %v10621_v5 }
 0x1f1   :  { %5763 = vmatpush.bf16.msrb.mxu3 %v10629_v23  ;;  %v5197_v37 = vadd.f32 %v11763_v63, %v5183_v24  ;;  %v10649_v24 = vld [vmem:[#allocation17 + $0x38] sm:$0xff] }
 0x1f2   :  { %5722 = vmatpush.bf16.msrb.mxu0 %v10604_v53 }
 0x1f3   :  { %5736 = vmatpush.bf16.msrb.mxu1 %v10612_v8  ;;  %v5364_v46 = vpop.f32.mrf.mxu2  ;;  %v5211_v31 = vadd.f32 %v11765_v38, %v5197_v37  ;;  %v10657_v37 = vld [vmem:[#allocation17 + $0x78] sm:$0xff] }
 0x1f4   :  { %5750 = vmatpush.bf16.msrb.mxu2 %v10620_v60  ;;  %v5378_v11 = vpop.f32.mrf.mxu3 }
 0x1f5   :  { %5764 = vmatpush.bf16.msrb.mxu3 %v10628_v35  ;;  %v5390_v22 = vpop.f32.mrf.mxu0  ;;  %v5225_v3 = vadd.f32 %v11802_v59, %v5211_v31  ;;  %v5335_v59 = vadd.f32 %v5334_v26, %v12254_v40  ;;  %v10665_v31 = vld [vmem:[#allocation17 + $0xb8] sm:$0xff] }
 0x1f6   :  { %5723 = vmatpush.bf16.msrb.mxu0 %v10603_v58  ;;  %v5404_v36 = vpop.f32.mrf.mxu1 }
 0x1f7   :  { %5737 = vmatpush.bf16.msrb.mxu1 %v10611_v43  ;;  %v5239_v44 = vadd.f32 %v11804_v21, %v5225_v3  ;;  %v5349_v21 = vadd.f32 %v5348_v48, %v5335_v59  ;;  %v10648_v3 = vld [vmem:[#allocation17 + $0x30] sm:$0xff] }
 0x1f8   :  { %5751 = vmatpush.bf16.msrb.mxu2 %v10619_v18 }
 0x1f9   :  { %5765 = vmatpush.bf16.msrb.mxu3 %v10627_v51  ;;  %v5253_v20 = vadd.f32 %v11806_v42, %v5239_v44  ;;  %v5363_v42 = vadd.f32 %v5362_v45, %v5349_v21  ;;  %v10664_v44 = vld [vmem:[#allocation17 + $0xb0] sm:$0xff] }
 0x1fa   :  { %5724 = vmatpush.bf16.msrb.mxu0 %v10602_v0 }
 0x1fb   :  { %5738 = vmatpush.bf16.msrb.mxu1 %v10610_v50  ;;  %v5418_v34 = vpop.f32.mrf.mxu2  ;;  %v5267_v30 = vadd.f32 %v11808_v56, %v5253_v20  ;;  %v5377_v47 = vadd.f32 %v5376_v25, %v5363_v42  ;;  %v10672_v20 = vld [vmem:[#allocation17 + $0xf0] sm:$0xff] }
 0x1fc   :  { %5752 = vmatpush.bf16.msrb.mxu2 %v10618_v10  ;;  %v5432_v5 = vpop.f32.mrf.mxu3 }
 0x1fd   :  { %5766 = vmatpush.bf16.msrb.mxu3 %v10626_v19  ;;  %5725 = vmatmul.bf16.vlgmr.msrb.gmra.mxu0 %v7721_v49  ;;  %v5392_v23 = vpop.f32.mrf.mxu0  ;;  %v5281_v63 = vadd.f32 %v11902_v7, %v5267_v30  ;;  %v5391_v7 = vadd.f32 %v5390_v22, %v5377_v47 }
 0x1fe   :  { %5739 = vmatmul.bf16.vlgmr.msrb.gmra.mxu1 %v7725_v32  ;;  %v5406_v53 = vpop.f32.mrf.mxu1  ;;  %6497 = vmatpush.bf16.msra.mxu0 %v10649_v24 }
 0x1ff   :  { %5753 = vmatmul.bf16.vlgmr.msrb.gmra.mxu2 %v7729_v12  ;;  %v5295_v38 = vadd.f32 %v11904_v13, %v5281_v63  ;;  %v5405_v13 = vadd.f32 %v5404_v36, %v5391_v7  ;;  %6511 = vmatpush.bf16.msra.mxu1 %v10657_v37  ;;  %v10662_v7 = vld [vmem:[#allocation17 + $0xa0] sm:$0xff] }
 0x200   :  { %5767 = vmatmul.bf16.vlgmr.msrb.gmra.mxu3 %v7733_v16  ;;  %6525 = vmatpush.bf16.msra.mxu2 %v10665_v31  ;;  %v10658_v31 = vld [vmem:[#allocation17 + $0x80] sm:$0xff] }
 0x201   :  { %v5309_v18 = vadd.f32 %v5308_v62, %v5295_v38  ;;  %v5419_v2 = vadd.f32 %v5418_v34, %v5405_v13  ;;  %v10673_v34 = vld [vmem:[#allocation17 + $0xf8] sm:$0xff] }
 0x202   :  { %6539 = vmatpush.bf16.msra.mxu3 %v10673_v34  ;;  %6498 = vmatpush.bf16.msra.mxu0 %v10648_v3  ;;  %v10666_v34 = vld [vmem:[#allocation17 + $0xc0] sm:$0xff]  ;;  %v10681_v3 = vld [vmem:[#allocation17 + $0x138] sm:$0xff] }
 0x203   :  { %v5420_v8 = vpop.f32.mrf.mxu2  ;;  %v5323_v50 = vadd.f32 %v5322_v14, %v5309_v18  ;;  %v5433_v12 = vadd.f32 %v5432_v5, %v5419_v2  ;;  %v10647_v18 = vld [vmem:[#allocation17 + $0x28] sm:$0xff]  ;;  %v10653_v2 = vld [vmem:[#allocation17 + $0x58] sm:$0xff] }
 0x204   :  { %v5434_v29 = vpop.f32.mrf.mxu3  ;;  %6526 = vmatpush.bf16.msra.mxu2 %v10664_v44  ;;  %v10697_v44 = vld [vmem:[#allocation17 + $0x1b8] sm:$0xff] }
 0x205   :  { %v5446_v60 = vpop.f32.mrf.mxu0  ;;  %v5337_v10 = vadd.f32 %v5336_v28, %v5323_v50 }
 0x206   :  { %v5460_v35 = vpop.f32.mrf.mxu1  ;;  %v5447_v62 = vadd.f32 %v5446_v60, %v5433_v12  ;;  %6540 = vmatpush.bf16.msra.mxu3 %v10672_v20  ;;  %6499 = vmatpush.bf16.msra.mxu0 %v10647_v18  ;;  %v10705_v20 = vld [vmem:[#allocation17 + $0x1f8] sm:$0xff]  ;;  %v10687_v18 = vld [vmem:[#allocation17 + $0x168] sm:$0xff] }
 0x207   :  { %v5351_v39 = vadd.f32 %v5350_v55, %v5337_v10  ;;  %v10671_v10 = vld [vmem:[#allocation17 + $0xe8] sm:$0xff] }
 0x208   :  { %v5461_v61 = vadd.f32 %v5460_v35, %v5447_v62 }
 0x209   :  { %v5365_v6 = vadd.f32 %v5364_v46, %v5351_v39  ;;  %v10654_v39 = vld [vmem:[#allocation17 + $0x60] sm:$0xff] }
 0x20a   :  { %6541 = vmatpush.bf16.msra.mxu3 %v10671_v10 }
 0x20b   :  { %v5474_v58 = vpop.f32.mrf.mxu2  ;;  %v5379_v57 = vadd.f32 %v5378_v11, %v5365_v6  ;;  %v10670_v6 = vld [vmem:[#allocation17 + $0xe0] sm:$0xff] }
 0x20c   :  { %v5488_v43 = vpop.f32.mrf.mxu3  ;;  %v5475_v25 = vadd.f32 %v5474_v58, %v5461_v61  ;;  %v10652_v61 = vld [vmem:[#allocation17 + $0x50] sm:$0xff] }
 0x20d   :  { %v5448_v51 = vpop.f32.mrf.mxu0  ;;  %v5393_v33 = vadd.f32 %v5392_v23, %v5379_v57  ;;  %v10656_v23 = vld [vmem:[#allocation17 + $0x70] sm:$0xff] }
 0x20e   :  { %v5462_v0 = vpop.f32.mrf.mxu1  ;;  %v5489_v28 = vadd.f32 %v5488_v43, %v5475_v25  ;;  %6512 = vmatpush.bf16.msra.mxu1 %v10656_v23  ;;  %6542 = vmatpush.bf16.msra.mxu3 %v10670_v6  ;;  %v10689_v23 = vld [vmem:[#allocation17 + $0x178] sm:$0xff]  ;;  %v10702_v6 = vld [vmem:[#allocation17 + $0x1e0] sm:$0xff] }
 0x20f   :  { %v5407_v16 = vadd.f32 %v5406_v53, %v5393_v33  ;;  %v10661_v33 = vld [vmem:[#allocation17 + $0x98] sm:$0xff] }
 0x211   :  { %v5421_v14 = vadd.f32 %v5420_v8, %v5407_v16 }
 0x213   :  { %v5476_v19 = vpop.f32.mrf.mxu2  ;;  %v5435_v45 = vadd.f32 %v5434_v29, %v5421_v14 }
 0x214   :  { %v5490_v54 = vpop.f32.mrf.mxu3 }
 0x215   :  { %v5502_v4 = vpop.f32.mrf.mxu0  ;;  %v5449_v27 = vadd.f32 %v5448_v51, %v5435_v45  ;;  %v10655_v51 = vld [vmem:[#allocation17 + $0x68] sm:$0xff]  ;;  %v10668_v45 = vld [vmem:[#allocation17 + $0xd0] sm:$0xff] }
 0x216   :  { %v5516_v56 = vpop.f32.mrf.mxu1  ;;  %v5503_v46 = vadd.f32 %v5502_v4, %v5489_v28  ;;  %6513 = vmatpush.bf16.msra.mxu1 %v10655_v51  ;;  %v10643_v28 = vld [vmem:[#allocation17 + $0x8] sm:$0xff] }
 0x217   :  { %v5463_v55 = vadd.f32 %v5462_v0, %v5449_v27  ;;  %v10663_v0 = vld [vmem:[#allocation17 + $0xa8] sm:$0xff] }
 0x218   :  { %v5517_v5 = vadd.f32 %v5516_v56, %v5503_v46  ;;  %6527 = vmatpush.bf16.msra.mxu2 %v10663_v0  ;;  %v10646_v56 = vld [vmem:[#allocation17 + $0x20] sm:$0xff] }
 0x219   :  { %v5477_v11 = vadd.f32 %v5476_v19, %v5463_v55  ;;  %6500 = vmatpush.bf16.msra.mxu0 %v10646_v56  ;;  %v10651_v55 = vld [vmem:[#allocation17 + $0x48] sm:$0xff]  ;;  %v10686_v56 = vld [vmem:[#allocation17 + $0x160] sm:$0xff] }
 0x21a   :  { %6514 = vmatpush.bf16.msra.mxu1 %v10654_v39 }
 0x21b   :  { %v5530_v17 = vpop.f32.mrf.mxu2  ;;  %v5491_v53 = vadd.f32 %v5490_v54, %v5477_v11  ;;  %v10642_v11 = vld [vmem:[#allocation17] sm:$0xff] }
 0x21c   :  { %v5544_v15 = vpop.f32.mrf.mxu3  ;;  %v5531_v8 = vadd.f32 %v5530_v17, %v5517_v5  ;;  %6528 = vmatpush.bf16.msra.mxu2 %v10662_v7  ;;  %v10694_v7 = vld [vmem:[#allocation17 + $0x1a0] sm:$0xff] }
 0x21d   :  { %v5504_v49 = vpop.f32.mrf.mxu0 }
 0x21e   :  { %v5518_v32 = vpop.f32.mrf.mxu1  ;;  %v5505_v29 = vadd.f32 %v5504_v49, %v5491_v53  ;;  %v5545_v30 = vadd.f32 %v5544_v15, %v5531_v8  ;;  %v10645_v15 = vld [vmem:[#allocation17 + $0x18] sm:$0xff]  ;;  %6515 = vmatpush.bf16.msra.mxu1 %v10653_v2 }
 0x21f   :  { %6501 = vmatpush.bf16.msra.mxu0 %v10645_v15 }
 0x220   :  { %v5519_v58 = vadd.f32 %v5518_v32, %v5505_v29  ;;  %v10669_v32 = vld [vmem:[#allocation17 + $0xd8] sm:$0xff]  ;;  %6529 = vmatpush.bf16.msra.mxu2 %v10661_v33  ;;  %v5780_v33 = vstv %s11926_s6  ;;  %s12110_s6 = sld [smem:[#allocation21 + $0x7]] }
 0x221   :  { %6543 = vmatpush.bf16.msra.mxu3 %v10669_v32  ;;  %v5800_v32 = vstv %s11930_s15 }
 0x222   :  { %6516 = vmatpush.bf16.msra.mxu1 %v10652_v61  ;;  %v5840_v61 = vstv %s11938_s19  ;;  %s11154_s19 = smov 128  }
 0x223   :  { %v5532_v26 = vpop.f32.mrf.mxu2 }
 0x224   :  { %v5546_v48 = vpop.f32.mrf.mxu3  ;;  %v5533_v40 = vadd.f32 %v5532_v26, %v5519_v58  ;;  %v10704_v58 = vld [vmem:[#allocation17 + $0x1f0] sm:$0xff] }
 0x225   :  { %v5558_v9 = vpop.f32.mrf.mxu0  ;;  %6544 = vmatpush.bf16.msra.mxu3 %v10668_v45 }
 0x226   :  { %v5572_v52 = vpop.f32.mrf.mxu1  ;;  %v5559_v43 = vadd.f32 %v5558_v9, %v5545_v30  ;;  %v5547_v21 = vadd.f32 %v5546_v48, %v5533_v40  ;;  %v10644_v48 = vld [vmem:[#allocation17 + $0x10] sm:$0xff]  ;;  %6517 = vmatpush.bf16.msra.mxu1 %v10651_v55  ;;  %v5895_v55 = vstv %s11948_s2 }
 0x227   :  { %v10660_v9 = vld [vmem:[#allocation17 + $0x90] sm:$0xff]  ;;  %6502 = vmatpush.bf16.msra.mxu0 %v10644_v48 }
 0x228   :  { %v5573_v59 = vadd.f32 %v5572_v52, %v5559_v43  ;;  %6530 = vmatpush.bf16.msra.mxu2 %v10660_v9  ;;  %v10688_v30 = vld [vmem:[#allocation17 + $0x170] sm:$0xff]  ;;  %v5855_v9 = vstv %s11940_s8  ;;  %s11155_s8 = smov 8  }
 0x22b   :  { %v5586_v41 = vpop.f32.mrf.mxu2  ;;  %6503 = vmatpush.bf16.msra.mxu0 %v10643_v28  ;;  %v5880_v28 = vstv %s11946_s11 }
 0x22c   :  { %v5600_v1 = vpop.f32.mrf.mxu3  ;;  %v5587_v19 = vadd.f32 %v5586_v41, %v5573_v59  ;;  %v10659_v41 = vld [vmem:[#allocation17 + $0x88] sm:$0xff] }
 0x22d   :  { %v5560_v22 = vpop.f32.mrf.mxu0  ;;  %6531 = vmatpush.bf16.msra.mxu2 %v10659_v41  ;;  %v10679_v59 = vld [vmem:[#allocation17 + $0x128] sm:$0xff] }
 0x22e   :  { %v5574_v36 = vpop.f32.mrf.mxu1  ;;  %v5561_v54 = vadd.f32 %v5560_v22, %v5547_v21  ;;  %v5601_v13 = vadd.f32 %v5600_v1, %v5587_v19  ;;  %v10667_v1 = vld [vmem:[#allocation17 + $0xc8] sm:$0xff]  ;;  %v10650_v22 = vld [vmem:[#allocation17 + $0x40] sm:$0xff] }
 0x22f   :  { %6545 = vmatpush.bf16.msra.mxu3 %v10667_v1  ;;  %6504 = vmatpush.bf16.msra.mxu0 %v10642_v11  ;;  %v10695_v21 = vld [vmem:[#allocation17 + $0x1a8] sm:$0xff]  ;;  %v10677_v1 = vld [vmem:[#allocation17 + $0x118] sm:$0xff] }
 0x230   :  { %v5575_v57 = vadd.f32 %v5574_v36, %v5561_v54  ;;  %6518 = vmatpush.bf16.msra.mxu1 %v10650_v22  ;;  %v10693_v11 = vld [vmem:[#allocation17 + $0x198] sm:$0xff]  ;;  %v5900_v22 = vstv %s11950_s22 }
 0x231   :  { %6532 = vmatpush.bf16.msra.mxu2 %v10658_v31 }
 0x233   :  { %v5588_v60 = vpop.f32.mrf.mxu2  ;;  %6546 = vmatpush.bf16.msra.mxu3 %v10666_v34  ;;  %6553 = vmatpush.bf16.msrb.mxu0 %v10681_v3  ;;  %v10701_v3 = vld [vmem:[#allocation17 + $0x1d8] sm:$0xff] }
 0x234   :  { %v5602_v35 = vpop.f32.mrf.mxu3  ;;  %v5589_v49 = vadd.f32 %v5588_v60, %v5575_v57  ;;  %6567 = vmatpush.bf16.msrb.mxu1 %v10689_v23  ;;  %v5775_v57 = vstv %s11924_s30  ;;  %s12108_s30 = sld [smem:[#allocation20 + $0x7]] }
 0x235   :  { %6581 = vmatpush.bf16.msrb.mxu2 %v10697_v44 }
 0x236   :  { %v5603_v52 = vadd.f32 %v5602_v35, %v5589_v49  ;;  %v10680_v35 = vld [vmem:[#allocation17 + $0x130] sm:$0xff]  ;;  %v5795_v49 = vstv %s11928_s14  ;;  %s11153_s14 = smov [#allocation26]  }
 0x237   :  { %6595 = vmatpush.bf16.msrb.mxu3 %v10705_v20  ;;  %6554 = vmatpush.bf16.msrb.mxu0 %v10680_v35  ;;  %s7474_s15 = sshll.u32 %s11153_s14, 4  ;;  %s7475_s15 = int_to_ptr.vmem [resolvable:$true] %s7474_s15 }
 0x238   :  { %6568 = vmatpush.bf16.msrb.mxu1 %v10688_v30 }
 0x23a   :  { %v5614_v63 = vpop.f32.mrf.mxu0 }
 0x23b   :  { %v5628_v38 = vpop.f32.mrf.mxu1  ;;  %v5615_v17 = vadd.f32 %v5614_v63, %v5601_v13  ;;  %6596 = vmatpush.bf16.msrb.mxu3 %v10704_v58  ;;  %6555 = vmatpush.bf16.msrb.mxu0 %v10679_v59 }
 0x23c   :  { %6569 = vmatpush.bf16.msrb.mxu1 %v10687_v18 }
 0x23d   :  { %v5629_v62 = vadd.f32 %v5628_v38, %v5615_v17  ;;  %v10696_v38 = vld [vmem:[#allocation17 + $0x1b0] sm:$0xff] }
 0x23e   :  { %6582 = vmatpush.bf16.msrb.mxu2 %v10696_v38  ;;  %v10692_v38 = vld [vmem:[#allocation17 + $0x190] sm:$0xff] }
 0x240   :  { %6570 = vmatpush.bf16.msrb.mxu1 %v10686_v56 }
 0x242   :  { %v5642_v50 = vpop.f32.mrf.mxu2  ;;  %v5616_v47 = vpop.f32.mrf.mxu0  ;;  %6583 = vmatpush.bf16.msrb.mxu2 %v10695_v21 }
 0x243   :  { %v5656_v42 = vpop.f32.mrf.mxu3  ;;  %v5630_v4 = vpop.f32.mrf.mxu1  ;;  %v5643_v25 = vadd.f32 %v5642_v50, %v5629_v62  ;;  %v5617_v27 = vadd.f32 %v5616_v47, %v5603_v52  ;;  %v10703_v50 = vld [vmem:[#allocation17 + $0x1e8] sm:$0xff]  ;;  %v5815_v62 = vstv %s11932_s5  ;;  %v5860_v52 = vstv %s11942_s20 }
 0x244   :  { %6597 = vmatpush.bf16.msrb.mxu3 %v10703_v50 }
 0x245   :  { %v5657_v46 = vadd.f32 %v5656_v42, %v5643_v25  ;;  %v5631_v36 = vadd.f32 %v5630_v4, %v5617_v27  ;;  %v10678_v4 = vld [vmem:[#allocation17 + $0x120] sm:$0xff]  ;;  %v5875_v27 = vstv %s11944_s21 }
 0x246   :  { %6556 = vmatpush.bf16.msrb.mxu0 %v10678_v4  ;;  %6584 = vmatpush.bf16.msrb.mxu2 %v10694_v7 }
 0x248   :  { %6598 = vmatpush.bf16.msrb.mxu3 %v10702_v6 }
 0x24a   :  { %v5644_v12 = vpop.f32.mrf.mxu2  ;;  %6557 = vmatpush.bf16.msrb.mxu0 %v10677_v1  ;;  %6585 = vmatpush.bf16.msrb.mxu2 %v10693_v11 }
 0x24b   :  { %v5658_v16 = vpop.f32.mrf.mxu3  ;;  %v5645_v53 = vadd.f32 %v5644_v12, %v5631_v36  ;;  %v5915_v36 = vstv %s11952_s9 }
 0x24c   :  { %6599 = vmatpush.bf16.msrb.mxu3 %v10701_v3  ;;  %v10682_v3 = vld [vmem:[#allocation17 + $0x140] sm:$0xff] }
 0x24d   :  { %v5659_v63 = vadd.f32 %v5658_v16, %v5645_v53 }
 0x24e   :  { %6586 = vmatpush.bf16.msrb.mxu2 %v10692_v38 }
 0x25a   :  { %v5670_v14 = vpop.f32.mrf.mxu0 }
 0x25b   :  { %v5684_v26 = vpop.f32.mrf.mxu1  ;;  %v5671_v5 = vadd.f32 %v5670_v14, %v5657_v46  ;;  %v5820_v14 = vstv %s11934_s7  ;;  %v10685_v46 = vld [vmem:[#allocation17 + $0x158] sm:$0xff] }
 0x25c   :  { %6571 = vmatpush.bf16.msrb.mxu1 %v10685_v46 }
 0x25d   :  { %v5685_v60 = vadd.f32 %v5684_v26, %v5671_v5  ;;  %v5835_v26 = vstv %s11936_s16  ;;  %s7476_s16 = sshll.u32 %s12252_s13, 4  ;;  %s7477_s16 = int_to_ptr.hbm [resolvable:$true] %s7476_s16 }
 0x262   :  { %v5698_v24 = vpop.f32.mrf.mxu2  ;;  %v5672_v8 = vpop.f32.mrf.mxu0 }
 0x263   :  { %v5712_v37 = vpop.f32.mrf.mxu3  ;;  %v5686_v29 = vpop.f32.mrf.mxu1  ;;  %v5699_v43 = vadd.f32 %v5698_v24, %v5685_v60  ;;  %v5673_v40 = vadd.f32 %v5672_v8, %v5659_v63  ;;  %v5920_v24 = vstv %s11954_s10  ;;  %v10676_v8 = vld [vmem:[#allocation17 + $0x110] sm:$0xff] }
 0x264   :  { %v10684_v63 = vld [vmem:[#allocation17 + $0x150] sm:$0xff]  ;;  %6558 = vmatpush.bf16.msrb.mxu0 %v10676_v8  ;;  %v10698_v8 = vld [vmem:[#allocation17 + $0x1c0] sm:$0xff] }
 0x265   :  { %v5713_v42 = vadd.f32 %v5712_v37, %v5699_v43  ;;  %v5687_v54 = vadd.f32 %v5686_v29, %v5673_v40  ;;  %6572 = vmatpush.bf16.msrb.mxu1 %v10684_v63 }
 0x26a   :  { %v5700_v51 = vpop.f32.mrf.mxu2 }
 0x26b   :  { %v5714_v0 = vpop.f32.mrf.mxu3  ;;  %v5701_v39 = vadd.f32 %v5700_v51, %v5687_v54  ;;  %v10700_v51 = vld [vmem:[#allocation17 + $0x1d0] sm:$0xff] }
 0x26c   :  { %6600 = vmatpush.bf16.msrb.mxu3 %v10700_v51 }
 0x26d   :  { %v5715_v17 = vadd.f32 %v5714_v0, %v5701_v39 }
 0x27a   :  { %v5726_v10 = vpop.f32.mrf.mxu0 }
 0x27b   :  { %v5740_v19 = vpop.f32.mrf.mxu1  ;;  %v5727_v47 = vadd.f32 %v5726_v10, %v5713_v42 }
 0x27d   :  { %v5741_v13 = vadd.f32 %v5740_v19, %v5727_v47  ;;  %v10675_v47 = vld [vmem:[#allocation17 + $0x108] sm:$0xff] }
 0x27e   :  { %6559 = vmatpush.bf16.msrb.mxu0 %v10675_v47 }
 0x282   :  { %v5754_v15 = vpop.f32.mrf.mxu2  ;;  %v5728_v16 = vpop.f32.mrf.mxu0 }
 0x283   :  { %v5768_v2 = vpop.f32.mrf.mxu3  ;;  %v5755_v12 = vadd.f32 %v5754_v15, %v5741_v13  ;;  %v5729_v48 = vadd.f32 %v5728_v16, %v5715_v17  ;;  %v5742_v25 = vpop.f32.mrf.mxu1  ;;  %v10683_v13 = vld [vmem:[#allocation17 + $0x148] sm:$0xff] }
 0x284   :  { %v10691_v17 = vld [vmem:[#allocation17 + $0x188] sm:$0xff]  ;;  %6573 = vmatpush.bf16.msrb.mxu1 %v10683_v13 }
 0x285   :  { %v11966_v45 = vadd.f32 %v5768_v2, %v5755_v12  ;;  %v5743_v41 = vadd.f32 %v5742_v25, %v5729_v48  ;;  %v10699_v16 = vld [vmem:[#allocation17 + $0x1c8] sm:$0xff]  ;;  %6587 = vmatpush.bf16.msrb.mxu2 %v10691_v17 }
 0x286   :  { %6601 = vmatpush.bf16.msrb.mxu3 %v10699_v16 }
 0x287   :  { %v5776_v37 = vsub.f32 %v11966_v45, %v5775_v57  ;;  %v5781_v31 = vsub.f32 %v5780_v33, %v11966_v45  ;;  %v5796_v34 = vsub.f32 %v11966_v45, %v5795_v49  ;;  %v5801_v5 = vsub.f32 %v5800_v32, %v11966_v45 }
 0x288   :  { %v5816_v23 = vsub.f32 %v11966_v45, %v5815_v62  ;;  %v5821_v53 = vsub.f32 %v5820_v14, %v11966_v45  ;;  %v5836_v44 = vsub.f32 %v11966_v45, %v5835_v26  ;;  %v5841_v20 = vsub.f32 %v5840_v61, %v11966_v45  ;;  %6574 = vmatpush.bf16.msrb.mxu1 %v10682_v3 }
 0x289   :  { %v5778_v29 = vmax.f32 %v5776_v37, 0.0  ;;  %v5783_v60 = vmax.f32 %v5781_v31, 0.0  ;;  %v5798_v35 = vmax.f32 %v5796_v34, 0.0  ;;  %v5803_v30 = vmax.f32 %v5801_v5, 0.0 }
 0x28a   :  { %v5756_v58 = vpop.f32.mrf.mxu2  ;;  %v5818_v43 = vmax.f32 %v5816_v23, 0.0  ;;  %v5823_v40 = vmax.f32 %v5821_v53, 0.0  ;;  %v5838_v59 = vmax.f32 %v5836_v44, 0.0  ;;  %v5843_v18 = vmax.f32 %v5841_v20, 0.0  ;;  %6602 = vmatpush.bf16.msrb.mxu3 %v10698_v8 }
 0x28b   :  { %v5757_v0 = vadd.f32 %v5756_v58, %v5743_v41  ;;  %v5785_v21 = vmul.f32 %v5783_v60, %v5778_v29  ;;  %v5805_v50 = vmul.f32 %v5803_v30, %v5798_v35  ;;  %v12001_v42 = vsub.f32 %v11966_v45, %v5855_v9  ;;  %v5770_v10 = vpop.f32.mrf.mxu3 }
 0x28c   :  { %v5825_v19 = vmul.f32 %v5823_v40, %v5818_v43  ;;  %v5845_v54 = vmul.f32 %v5843_v18, %v5838_v59  ;;  %v5861_v4 = vsub.f32 %v5860_v52, %v11966_v45  ;;  %v12009_v56 = vsub.f32 %v11966_v45, %v5875_v27 }
 0x28d   :  { %v12011_v39 = vadd.f32 %v5770_v10, %v5757_v0  ;;  %v5787_v7 = vmul.f32 %v5785_v21, %v5785_v21  ;;  %v5807_v6 = vmul.f32 %v5805_v50, %v5805_v50  ;;  %v5858_v15 = vmax.f32 %v12001_v42, 0.0 }
 0x28e   :  { %v5827_v2 = vmul.f32 %v5825_v19, %v5825_v19  ;;  %v5847_v12 = vmul.f32 %v5845_v54, %v5845_v54  ;;  %v5863_v48 = vmax.f32 %v5861_v4, 0.0  ;;  %v5878_v25 = vmax.f32 %v12009_v56, 0.0 }
 0x28f   :  { %v5777_v41 = vsub.f32 %v12011_v39, %v5775_v57  ;;  %v5782_v1 = vsub.f32 %v5780_v33, %v12011_v39  ;;  %v5789_v46 = vpack.c.bf16 %v5787_v7, %v5787_v7  ;;  %v5797_v11 = vsub.f32 %v12011_v39, %v5795_v49  ;;  %v10674_v57 = vld [vmem:[#allocation17 + $0x100] sm:$0xff] }
 0x290   :  { %v5802_v37 = vsub.f32 %v5800_v32, %v12011_v39  ;;  %v5809_v31 = vpack.c.bf16 %v5807_v6, %v5807_v6  ;;  %v5817_v34 = vsub.f32 %v12011_v39, %v5815_v62  ;;  %v5822_v5 = vsub.f32 %v5820_v14, %v12011_v39  ;;  %v10690_v32 = vld [vmem:[#allocation17 + $0x180] sm:$0xff]  ;;  %6560 = vmatpush.bf16.msrb.mxu0 %v10674_v57 }
 0x291   :  { %v5779_v23 = vmax.f32 %v5777_v41, 0.0  ;;  %v5784_v33 = vmax.f32 %v5782_v1, 0.0  ;;  %5791 = vst [vmem:[#allocation3] sm:$0xf] %v5789_v46  ;;  %v5799_v53 = vmax.f32 %v5797_v11, 0.0  ;;  %v5829_v49 = vpack.c.bf16 %v5827_v2, %v5827_v2  ;;  %6588 = vmatpush.bf16.msrb.mxu2 %v10690_v32 }
 0x292   :  { %v5804_v44 = vmax.f32 %v5802_v37, 0.0  ;;  %5811 = vst [vmem:[#allocation3 + $0x4] sm:$0xf] %v5809_v31  ;;  %v5819_v62 = vmax.f32 %v5817_v34, 0.0  ;;  %v5824_v20 = vmax.f32 %v5822_v5, 0.0  ;;  %v5837_v14 = vsub.f32 %v12011_v39, %v5835_v26 }
 0x293   :  { %v5786_v29 = vmul.f32 %v5784_v33, %v5779_v23  ;;  %5831 = vst [vmem:[#allocation3 + $0x8] sm:$0xf] %v5829_v49  ;;  %v5842_v60 = vsub.f32 %v5840_v61, %v12011_v39  ;;  %v5849_v35 = vpack.c.bf16 %v5847_v12, %v5847_v12  ;;  %v5857_v30 = vsub.f32 %v12011_v39, %v5855_v9 }
 0x294   :  { %v5806_v63 = vmul.f32 %v5804_v44, %v5799_v53  ;;  %v5826_v38 = vmul.f32 %v5824_v20, %v5819_v62  ;;  %v5839_v58 = vmax.f32 %v5837_v14, 0.0  ;;  %v5862_v43 = vsub.f32 %v5860_v52, %v12011_v39 }
 0x295   :  { %v5788_v26 = vmul.f32 %v5786_v29, %v5786_v29  ;;  %v5844_v40 = vmax.f32 %v5842_v60, 0.0  ;;  %5851 = vst [vmem:[#allocation3 + $0xc] sm:$0xf] %v5849_v35  ;;  %v5859_v59 = vmax.f32 %v5857_v30, 0.0  ;;  %v5865_v61 = vmul.f32 %v5863_v48, %v5858_v15 }
 0x296   :  { %v5808_v18 = vmul.f32 %v5806_v63, %v5806_v63  ;;  %v5828_v51 = vmul.f32 %v5826_v38, %v5826_v38  ;;  %v5864_v9 = vmax.f32 %v5862_v43, 0.0  ;;  %v5877_v0 = vsub.f32 %v12011_v39, %v5875_v27 }
 0x297   :  { %v5790_v21 = vpack.c.bf16 %v5788_v26, %v5788_v26  ;;  %v5846_v52 = vmul.f32 %v5844_v40, %v5839_v58  ;;  %v5867_v50 = vmul.f32 %v5865_v61, %v5865_v61  ;;  %v5881_v42 = vsub.f32 %v5880_v28, %v11966_v45 }
 0x298   :  { %v5810_v10 = vpack.c.bf16 %v5808_v18, %v5808_v18  ;;  %v5830_v19 = vpack.c.bf16 %v5828_v51, %v5828_v51  ;;  %v5866_v54 = vmul.f32 %v5864_v9, %v5859_v59  ;;  %v5879_v47 = vmax.f32 %v5877_v0, 0.0  ;;  %v9542_v57 = vld [vmem:[#allocation3] sm:$0xf] }
 0x299   :  { %5792 = vst [vmem:[#allocation3 + $0x20] sm:$0xf] %v5790_v21  ;;  %v5848_v4 = vmul.f32 %v5846_v52, %v5846_v52  ;;  %v5869_v7 = vpack.c.bf16 %v5867_v50, %v5867_v50  ;;  %v5882_v27 = vsub.f32 %v5880_v28, %v12011_v39  ;;  %v5883_v6 = vmax.f32 %v5881_v42, 0.0  ;;  %v10634_v14 = vld [vmem:[#allocation3 + $0x4] sm:$0xf] }
 0x29a   :  { %5812 = vst [vmem:[#allocation3 + $0x24] sm:$0xf] %v5810_v10  ;;  %v5868_v13 = vmul.f32 %v5866_v54, %v5866_v54  ;;  %v5896_v17 = vsub.f32 %v11966_v45, %v5895_v55  ;;  %v5897_v15 = vsub.f32 %v12011_v39, %v5895_v55  ;;  %v5901_v2 = vsub.f32 %v5900_v22, %v11966_v45  ;;  %v9550_v35 = vld [vmem:[#allocation3 + $0x8] sm:$0xf] }
 0x29b   :  { %5832 = vst [vmem:[#allocation3 + $0x28] sm:$0xf] %v5830_v19  ;;  %v5850_v12 = vpack.c.bf16 %v5848_v4, %v5848_v4  ;;  %v5884_v16 = vmax.f32 %v5882_v27, 0.0  ;;  %v5885_v28 = vmul.f32 %v5883_v6, %v5878_v25  ;;  %v5902_v48 = vsub.f32 %v5900_v22, %v12011_v39  ;;  %v10721_v27 = vld [vmem:[#allocation23 + $0x38] sm:$0xff] }
 0x29c   :  { %v5870_v41 = vpack.c.bf16 %v5868_v13, %v5868_v13  ;;  %5871 = vst [vmem:[#allocation3 + $0x10] sm:$0xf] %v5869_v7  ;;  %v5898_v1 = vmax.f32 %v5896_v17, 0.0  ;;  %v5899_v46 = vmax.f32 %v5897_v15, 0.0  ;;  %v5916_v55 = vsub.f32 %v11966_v45, %v5915_v36  ;;  %v10635_v43 = vld [vmem:[#allocation3 + $0xc] sm:$0xf] }
 0x29d   :  { %5852 = vst [vmem:[#allocation3 + $0x2c] sm:$0xf] %v5850_v12  ;;  %v5886_v11 = vmul.f32 %v5884_v16, %v5879_v47  ;;  %v5887_v37 = vmul.f32 %v5885_v28, %v5885_v28  ;;  %v5903_v31 = vmax.f32 %v5901_v2, 0.0  ;;  %v5904_v34 = vmax.f32 %v5902_v48, 0.0  ;;  %v10729_v6 = vld [vmem:[#allocation23 + $0x78] sm:$0xff]  ;;  %v10720_v15 = vld [vmem:[#allocation23 + $0x30] sm:$0xff] }
 0x29e   :  { %5872 = vst [vmem:[#allocation3 + $0x30] sm:$0xf] %v5870_v41  ;;  %v5917_v56 = vsub.f32 %v12011_v39, %v5915_v36  ;;  %v5918_v25 = vmax.f32 %v5916_v55, 0.0  ;;  %v5921_v22 = vsub.f32 %v5920_v24, %v11966_v45  ;;  %v5922_v5 = vsub.f32 %v5920_v24, %v12011_v39  ;;  %v10737_v13 = vld [vmem:[#allocation23 + $0xb8] sm:$0xff]  ;;  %v10728_v2 = vld [vmem:[#allocation23 + $0x70] sm:$0xff]  ;;  %v10719_v28 = vld [vmem:[#allocation23 + $0x28] sm:$0xff] }
 0x29f   :  { %v5888_v3 = vmul.f32 %v5886_v11, %v5886_v11  ;;  %v5889_v23 = vpack.c.bf16 %v5887_v37, %v5887_v37  ;;  %v5905_v33 = vmul.f32 %v5903_v31, %v5898_v1  ;;  %v5906_v53 = vmul.f32 %v5904_v34, %v5899_v46  ;;  %v10745_v17 = vld [vmem:[#allocation23 + $0xf8] sm:$0xff]  ;;  %v10736_v12 = vld [vmem:[#allocation23 + $0xb0] sm:$0xff]  ;;  %v10727_v48 = vld [vmem:[#allocation23 + $0x68] sm:$0xff] }
 0x2a0   :  { %v10638_v49 = vld [vmem:[#allocation3 + $0x1c] sm:$0xf0]  ;;  %v5919_v32 = vmax.f32 %v5917_v56, 0.0  ;;  %v5923_v44 = vmax.f32 %v5921_v22, 0.0  ;;  %v5924_v62 = vmax.f32 %v5922_v5, 0.0  ;;  %v10744_v16 = vld [vmem:[#allocation23 + $0xf0] sm:$0xff] }
 0x2a1   :  { %v9543_v20 = vor.u32 %v10638_v49, %v9542_v57  ;;  %v9544_v8 = vld [vmem:[#allocation3 + $0x20] sm:$0xf0]  ;;  %v5890_v36 = vpack.c.bf16 %v5888_v3, %v5888_v3  ;;  %5891 = vst [vmem:[#allocation3 + $0x14] sm:$0xf] %v5889_v23  ;;  %v5907_v29 = vmul.f32 %v5905_v33, %v5905_v33  ;;  %v5908_v60 = vmul.f32 %v5906_v53, %v5906_v53  ;;  %v10735_v41 = vld [vmem:[#allocation23 + $0xa8] sm:$0xff]  ;;  %v10718_v46 = vld [vmem:[#allocation23 + $0x20] sm:$0xff] }
 0x2a2   :  { %v9547_v45 = vor.u32 %v10634_v14, %v9544_v8  ;;  %v10639_v30 = vld [vmem:[#allocation3 + $0x24] sm:$0xf0]  ;;  %v5925_v24 = vmul.f32 %v5923_v44, %v5918_v25  ;;  %v5926_v39 = vmul.f32 %v5924_v62, %v5919_v32  ;;  %v10743_v1 = vld [vmem:[#allocation23 + $0xe8] sm:$0xff]  ;;  %v10726_v55 = vld [vmem:[#allocation23 + $0x60] sm:$0xff] }
 0x2a3   :  { %6505 = vmatmul.bf16.vlgmr.msra.gmra.mxu0 %v9543_v20  ;;  %v9551_v63 = vor.u32 %v10639_v30, %v9550_v35  ;;  %5892 = vst [vmem:[#allocation3 + $0x34] sm:$0xf] %v5890_v36  ;;  %v5909_v38 = vpack.c.bf16 %v5907_v29, %v5907_v29  ;;  %v5910_v58 = vpack.c.bf16 %v5908_v60, %v5908_v60  ;;  %v9558_v21 = vld [vmem:[#allocation3 + $0x10] sm:$0xf]  ;;  %v10734_v11 = vld [vmem:[#allocation23 + $0xa0] sm:$0xff]  ;;  %v10716_v3 = vld [vmem:[#allocation23 + $0x10] sm:$0xff] }
 0x2a4   :  { %6519 = vmatmul.bf16.vlgmr.msra.gmra.mxu1 %v9547_v45  ;;  %v9552_v26 = vld [vmem:[#allocation3 + $0x28] sm:$0xf0]  ;;  %v5927_v40 = vmul.f32 %v5925_v24, %v5925_v24  ;;  %v5928_v59 = vmul.f32 %v5926_v39, %v5926_v39  ;;  %7333 = vmatpush.bf16.msra.mxu0 %v10721_v27  ;;  %v10742_v37 = vld [vmem:[#allocation23 + $0xe0] sm:$0xff]  ;;  %v10799_v57 = vld [vmem:[#allocation19] ss:$0 sm:$0xff] }
 0x2a5   :  { %6533 = vmatmul.bf16.vlgmr.msra.gmra.mxu2 %v9551_v63  ;;  %v9555_v61 = vor.u32 %v10635_v43, %v9552_v26  ;;  %5911 = vst [vmem:[#allocation3 + $0x18] sm:$0xf] %v5909_v38  ;;  %v10640_v9 = vld [vmem:[#allocation3 + $0x2c] sm:$0xf0]  ;;  %7347 = vmatpush.bf16.msra.mxu1 %v10729_v6  ;;  %v10724_v23 = vld [vmem:[#allocation23 + $0x50] sm:$0xff]  ;;  %v10715_v49 = vld [vmem:[#allocation23 + $0x8] sm:$0xff] }
 0x2a6   :  { %5912 = vst [vmem:[#allocation3 + $0x38] sm:$0xf] %v5910_v58  ;;  %v5929_v18 = vpack.c.bf16 %v5927_v40, %v5927_v40  ;;  %v5930_v51 = vpack.c.bf16 %v5928_v59, %v5928_v59  ;;  %v9559_v50 = vor.u32 %v10640_v9, %v9558_v21  ;;  %7361 = vmatpush.bf16.msra.mxu2 %v10737_v13  ;;  %v10717_v31 = vld [vmem:[#allocation23 + $0x18] sm:$0xff]  ;;  %v10732_v33 = vld [vmem:[#allocation23 + $0x90] sm:$0xff]  ;;  %v10723_v32 = vld [vmem:[#allocation23 + $0x48] sm:$0xff] }
 0x2a7   :  { %6547 = vmatmul.bf16.vlgmr.msra.gmra.mxu3 %v9555_v61  ;;  %v10725_v34 = vld [vmem:[#allocation23 + $0x58] sm:$0xff]  ;;  %v10740_v53 = vld [vmem:[#allocation23 + $0xd0] sm:$0xff]  ;;  %v10731_v44 = vld [vmem:[#allocation23 + $0x88] sm:$0xff] }
 0x2a8   :  { %5931 = vst [vmem:[#allocation3 + $0x1c] sm:$0xf] %v5929_v18  ;;  %v10636_v42 = vld [vmem:[#allocation3 + $0x14] sm:$0xf]  ;;  %7375 = vmatpush.bf16.msra.mxu3 %v10745_v17  ;;  %7334 = vmatpush.bf16.msra.mxu0 %v10720_v15  ;;  %v10733_v56 = vld [vmem:[#allocation23 + $0x98] sm:$0xff]  ;;  %v10739_v62 = vld [vmem:[#allocation23 + $0xc8] sm:$0xff] }
 0x2a9   :  { %5932 = vst [vmem:[#allocation3 + $0x3c] sm:$0xf] %v5930_v51  ;;  %7348 = vmatpush.bf16.msra.mxu1 %v10728_v2  ;;  %v10741_v25 = vld [vmem:[#allocation23 + $0xd8] sm:$0xff]  ;;  %v10714_v29 = vld [vmem:[#allocation23] sm:$0xff]  ;;  %v10752_v40 = vld [vmem:[#allocation23 + $0x130] sm:$0xff] }
 0x2aa   :  { %v9560_v0 = vld [vmem:[#allocation3 + $0x30] sm:$0xf0]  ;;  %7362 = vmatpush.bf16.msra.mxu2 %v10736_v12  ;;  %v10753_v39 = vld [vmem:[#allocation23 + $0x138] sm:$0xff]  ;;  %v10760_v59 = vld [vmem:[#allocation23 + $0x170] sm:$0xff] }
 0x2ab   :  { %v9563_v10 = vor.u32 %v10636_v42, %v9560_v0  ;;  %v10722_v60 = vld [vmem:[#allocation23 + $0x40] sm:$0xff]  ;;  %v10761_v63 = vld [vmem:[#allocation23 + $0x178] sm:$0xff]  ;;  %v10768_v51 = vld [vmem:[#allocation23 + $0x1b0] sm:$0xff] }
 0x2ac   :  { %v9566_v19 = vld [vmem:[#allocation3 + $0x18] sm:$0xf]  ;;  %7376 = vmatpush.bf16.msra.mxu3 %v10744_v16  ;;  %7335 = vmatpush.bf16.msra.mxu0 %v10719_v28  ;;  %v10769_v38 = vld [vmem:[#allocation23 + $0x1b8] sm:$0xff]  ;;  %v10776_v9 = vld [vmem:[#allocation23 + $0x1f0] sm:$0xff]  ;;  %v6611_v16 = vstv %s12080_s12  ;;  %v6616_v28 = vstv %s12082_s23 }
 0x2ad   :  { %v10641_v52 = vld [vmem:[#allocation3 + $0x34] sm:$0xf0]  ;;  %7349 = vmatpush.bf16.msra.mxu1 %v10727_v48  ;;  %v10777_v58 = vld [vmem:[#allocation23 + $0x1f8] sm:$0xff]  ;;  %v6631_v48 = vstv %s12084_s0 }
 0x2ae   :  { %v9567_v47 = vor.u32 %v10641_v52, %v9566_v19  ;;  %7363 = vmatpush.bf16.msra.mxu2 %v10735_v41  ;;  %v10730_v35 = vld [vmem:[#allocation23 + $0x80] sm:$0xff]  ;;  %v10751_v19 = vld [vmem:[#allocation23 + $0x128] sm:$0xff]  ;;  %v6636_v41 = vstv %s12086_s24 }
 0x2af   :  { %v10637_v4 = vld [vmem:[#allocation3 + $0x1c] sm:$0xf]  ;;  %v10738_v30 = vld [vmem:[#allocation23 + $0xc0] sm:$0xff] }
 0x2b0   :  { %v9568_v54 = vld [vmem:[#allocation3 + $0x38] sm:$0xf0]  ;;  %7377 = vmatpush.bf16.msra.mxu3 %v10743_v1  ;;  %7336 = vmatpush.bf16.msra.mxu0 %v10718_v46  ;;  %v10750_v6 = vld [vmem:[#allocation23 + $0x120] sm:$0xff] }
 0x2b1   :  { %v9571_v7 = vor.u32 %v10637_v4, %v9568_v54  ;;  %7350 = vmatpush.bf16.msra.mxu1 %v10726_v55  ;;  %v10759_v54 = vld [vmem:[#allocation23 + $0x168] sm:$0xff]  ;;  %v10758_v13 = vld [vmem:[#allocation23 + $0x160] sm:$0xff]  ;;  %v6651_v55 = vstv %s12088_s3 }
 0x2b2   :  { %7364 = vmatpush.bf16.msra.mxu2 %v10734_v11  ;;  %v10775_v4 = vld [vmem:[#allocation23 + $0x1e8] sm:$0xff]  ;;  %v10766_v2 = vld [vmem:[#allocation23 + $0x1a0] sm:$0xff]  ;;  %v6656_v11 = vstv %s12090_s17 }
 0x2b3   :  { %6561 = vmatmul.bf16.vlgmr.msrb.gmra.mxu0 %v9559_v50  ;;  %v10774_v12 = vld [vmem:[#allocation23 + $0x1e0] sm:$0xff] }
 0x2b4   :  { %6575 = vmatmul.bf16.vlgmr.msrb.gmra.mxu1 %v9563_v10  ;;  %7378 = vmatpush.bf16.msra.mxu3 %v10742_v37 }
 0x2b5   :  { %6589 = vmatmul.bf16.vlgmr.msrb.gmra.mxu2 %v9567_v47  ;;  %7337 = vmatpush.bf16.msra.mxu0 %v10717_v31  ;;  %v10767_v47 = vld [vmem:[#allocation23 + $0x1a8] sm:$0xff]  ;;  %v6671_v31 = vstv %s12092_s18 }
 0x2b6   :  { %7351 = vmatpush.bf16.msra.mxu1 %v10725_v34  ;;  %7365 = vmatpush.bf16.msra.mxu2 %v10733_v56  ;;  %v6676_v34 = vstv %s12094_s25  ;;  %v6691_v56 = vstv %s12096_s26 }
 0x2b7   :  { %6603 = vmatmul.bf16.vlgmr.msrb.gmra.mxu3 %v9571_v7 }
 0x2b8   :  { %7379 = vmatpush.bf16.msra.mxu3 %v10741_v25  ;;  %v6696_v25 = vstv %s12098_s27 }
 0x2b9   :  { %7338 = vmatpush.bf16.msra.mxu0 %v10716_v3  ;;  %v6716_v3 = vstv %s12102_s1 }
 0x2ba   :  { %7352 = vmatpush.bf16.msra.mxu1 %v10724_v23  ;;  %7366 = vmatpush.bf16.msra.mxu2 %v10732_v33  ;;  %v6731_v23 = vstv %s12104_s29 }
 0x2bc   :  { %7380 = vmatpush.bf16.msra.mxu3 %v10740_v53  ;;  %v6736_v53 = vstv %s12106_s4 }
 0x2bd   :  { %7339 = vmatpush.bf16.msra.mxu0 %v10715_v49  ;;  %v6751_v49 = vstv %s12108_s30 }
 0x2be   :  { %7353 = vmatpush.bf16.msra.mxu1 %v10723_v32  ;;  %7367 = vmatpush.bf16.msra.mxu2 %v10731_v44  ;;  %v6756_v32 = vstv %s12110_s6 }
 0x2c0   :  { %7381 = vmatpush.bf16.msra.mxu3 %v10739_v62 }
 0x2c1   :  { %7340 = vmatpush.bf16.msra.mxu0 %v10714_v29  ;;  %v10765_v29 = vld [vmem:[#allocation23 + $0x198] sm:$0xff] }
 0x2c2   :  { %7354 = vmatpush.bf16.msra.mxu1 %v10722_v60  ;;  %7368 = vmatpush.bf16.msra.mxu2 %v10730_v35 }
 0x2c4   :  { %7382 = vmatpush.bf16.msra.mxu3 %v10738_v30 }
 0x2c5   :  { %7389 = vmatpush.bf16.msrb.mxu0 %v10753_v39 }
 0x2c6   :  { %7403 = vmatpush.bf16.msrb.mxu1 %v10761_v63  ;;  %7417 = vmatpush.bf16.msrb.mxu2 %v10769_v38 }
 0x2c8   :  { %7431 = vmatpush.bf16.msrb.mxu3 %v10777_v58 }
 0x2c9   :  { %7390 = vmatpush.bf16.msrb.mxu0 %v10752_v40 }
 0x2ca   :  { %7404 = vmatpush.bf16.msrb.mxu1 %v10760_v59  ;;  %7418 = vmatpush.bf16.msrb.mxu2 %v10768_v51 }
 0x2cc   :  { %7432 = vmatpush.bf16.msrb.mxu3 %v10776_v9  ;;  %v10764_v9 = vld [vmem:[#allocation23 + $0x190] sm:$0xff] }
 0x2cd   :  { %7391 = vmatpush.bf16.msrb.mxu0 %v10751_v19 }
 0x2ce   :  { %7405 = vmatpush.bf16.msrb.mxu1 %v10759_v54  ;;  %7419 = vmatpush.bf16.msrb.mxu2 %v10767_v47 }
 0x2d0   :  { %7433 = vmatpush.bf16.msrb.mxu3 %v10775_v4 }
 0x2d1   :  { %7392 = vmatpush.bf16.msrb.mxu0 %v10750_v6 }
 0x2d2   :  { %7406 = vmatpush.bf16.msrb.mxu1 %v10758_v13  ;;  %7420 = vmatpush.bf16.msrb.mxu2 %v10766_v2  ;;  %v10747_v13 = vld [vmem:[#allocation23 + $0x108] sm:$0xff] }
 0x2d4   :  { %7434 = vmatpush.bf16.msrb.mxu3 %v10774_v12 }
 0x2d6   :  { %7421 = vmatpush.bf16.msrb.mxu2 %v10765_v29 }
 0x2da   :  { %7422 = vmatpush.bf16.msrb.mxu2 %v10764_v9 }
 0x320   :  { %v6506_v22 = vpop.f32.mrf.mxu0 }
 0x321   :  { %v6520_v5 = vpop.f32.mrf.mxu1  ;;  %v6507_v20 = vadd.f32 %v10799_v57, %v6506_v22 }
 0x323   :  { %v6521_v24 = vadd.f32 %v6520_v5, %v6507_v20 }
 0x328   :  { %v6534_v14 = vpop.f32.mrf.mxu2  ;;  %v6508_v8 = vpop.f32.mrf.mxu0 }
 0x329   :  { %v6522_v36 = vpop.f32.mrf.mxu1  ;;  %v6535_v43 = vadd.f32 %v6534_v14, %v6521_v24  ;;  %v6509_v26 = vadd.f32 %v10799_v57, %v6508_v8  ;;  %v6711_v57 = vstv %s12100_s28  ;;  %v10749_v8 = vld [vmem:[#allocation23 + $0x118] sm:$0xff] }
 0x32a   :  { %v6548_v45 = vpop.f32.mrf.mxu3  ;;  %v10773_v24 = vld [vmem:[#allocation23 + $0x1d8] sm:$0xff]  ;;  %7393 = vmatpush.bf16.msrb.mxu0 %v10749_v8 }
 0x32b   :  { %v6549_v0 = vadd.f32 %v6548_v45, %v6535_v43  ;;  %v6523_v21 = vadd.f32 %v6522_v36, %v6509_v26  ;;  %v10757_v36 = vld [vmem:[#allocation23 + $0x158] sm:$0xff]  ;;  %v10748_v43 = vld [vmem:[#allocation23 + $0x110] sm:$0xff]  ;;  %7435 = vmatpush.bf16.msrb.mxu3 %v10773_v24 }
 0x32c   :  { %7407 = vmatpush.bf16.msrb.mxu1 %v10757_v36  ;;  %v10756_v26 = vld [vmem:[#allocation23 + $0x150] sm:$0xff] }
 0x32e   :  { %7394 = vmatpush.bf16.msrb.mxu0 %v10748_v43 }
 0x330   :  { %v6536_v61 = vpop.f32.mrf.mxu2  ;;  %v6562_v18 = vpop.f32.mrf.mxu0  ;;  %7408 = vmatpush.bf16.msrb.mxu1 %v10756_v26 }
 0x331   :  { %v6576_v52 = vpop.f32.mrf.mxu1  ;;  %v6537_v42 = vadd.f32 %v6536_v61, %v6523_v21  ;;  %v6563_v10 = vadd.f32 %v6562_v18, %v6549_v0  ;;  %v10772_v0 = vld [vmem:[#allocation23 + $0x1d0] sm:$0xff] }
 0x332   :  { %v6550_v50 = vpop.f32.mrf.mxu3  ;;  %7436 = vmatpush.bf16.msrb.mxu3 %v10772_v0  ;;  %7395 = vmatpush.bf16.msrb.mxu0 %v10747_v13 }
 0x333   :  { %v6551_v7 = vadd.f32 %v6550_v50, %v6537_v42  ;;  %v6577_v27 = vadd.f32 %v6576_v52, %v6563_v10 }
 0x338   :  { %v6590_v17 = vpop.f32.mrf.mxu2  ;;  %v6564_v15 = vpop.f32.mrf.mxu0 }
 0x339   :  { %v6591_v1 = vadd.f32 %v6590_v17, %v6577_v27  ;;  %v6565_v46 = vadd.f32 %v6564_v15, %v6551_v7  ;;  %v6578_v5 = vpop.f32.mrf.mxu1  ;;  %v10755_v17 = vld [vmem:[#allocation23 + $0x148] sm:$0xff] }
 0x33a   :  { %v6604_v37 = vpop.f32.mrf.mxu3  ;;  %7409 = vmatpush.bf16.msrb.mxu1 %v10755_v17 }
 0x33b   :  { %v12122_v22 = vadd.f32 %v6604_v37, %v6591_v1  ;;  %v6579_v33 = vadd.f32 %v6578_v5, %v6565_v46  ;;  %v10763_v1 = vld [vmem:[#allocation23 + $0x188] sm:$0xff] }
 0x33c   :  { %v10771_v46 = vld [vmem:[#allocation23 + $0x1c8] sm:$0xff]  ;;  %7423 = vmatpush.bf16.msrb.mxu2 %v10763_v1 }
 0x33d   :  { %v6612_v44 = vsub.f32 %v12122_v22, %v6611_v16  ;;  %v6617_v62 = vsub.f32 %v6616_v28, %v12122_v22  ;;  %v6632_v20 = vsub.f32 %v12122_v22, %v6631_v48  ;;  %v6637_v14 = vsub.f32 %v6636_v41, %v12122_v22  ;;  %7437 = vmatpush.bf16.msrb.mxu3 %v10771_v46 }
 0x33e   :  { %v6652_v60 = vsub.f32 %v12122_v22, %v6651_v55  ;;  %v6657_v45 = vsub.f32 %v6656_v11, %v12122_v22  ;;  %v6672_v35 = vsub.f32 %v12122_v22, %v6671_v31  ;;  %v6677_v30 = vsub.f32 %v6676_v34, %v12122_v22 }
 0x33f   :  { %v6614_v39 = vmax.f32 %v6612_v44, 0.0  ;;  %v6619_v63 = vmax.f32 %v6617_v62, 0.0  ;;  %v6634_v38 = vmax.f32 %v6632_v20, 0.0  ;;  %v6639_v58 = vmax.f32 %v6637_v14, 0.0 }
 0x340   :  { %v6592_v40 = vpop.f32.mrf.mxu2  ;;  %v6654_v59 = vmax.f32 %v6652_v60, 0.0  ;;  %v6659_v61 = vmax.f32 %v6657_v45, 0.0  ;;  %v6674_v18 = vmax.f32 %v6672_v35, 0.0  ;;  %v6679_v51 = vmax.f32 %v6677_v30, 0.0  ;;  %v10746_v60 = vld [vmem:[#allocation23 + $0x100] sm:$0xff] }
 0x341   :  { %v6593_v21 = vadd.f32 %v6592_v40, %v6579_v33  ;;  %v6621_v52 = vmul.f32 %v6619_v63, %v6614_v39  ;;  %v6641_v50 = vmul.f32 %v6639_v58, %v6634_v38  ;;  %v12157_v42 = vsub.f32 %v12122_v22, %v6691_v56  ;;  %v10770_v39 = vld [vmem:[#allocation23 + $0x1c0] sm:$0xff]  ;;  %7396 = vmatpush.bf16.msrb.mxu0 %v10746_v60 }
 0x342   :  { %v6606_v10 = vpop.f32.mrf.mxu3  ;;  %v6661_v19 = vmul.f32 %v6659_v61, %v6654_v59  ;;  %v6681_v54 = vmul.f32 %v6679_v51, %v6674_v18  ;;  %v6697_v47 = vsub.f32 %v6696_v25, %v12122_v22  ;;  %v12165_v4 = vsub.f32 %v12122_v22, %v6711_v57  ;;  %7438 = vmatpush.bf16.msrb.mxu3 %v10770_v39 }
 0x343   :  { %v12167_v7 = vadd.f32 %v6606_v10, %v6593_v21  ;;  %v6623_v27 = vmul.f32 %v6621_v52, %v6621_v52  ;;  %v6643_v6 = vmul.f32 %v6641_v50, %v6641_v50  ;;  %v6694_v15 = vmax.f32 %v12157_v42, 0.0 }
 0x344   :  { %v6663_v2 = vmul.f32 %v6661_v19, %v6661_v19  ;;  %v6683_v12 = vmul.f32 %v6681_v54, %v6681_v54  ;;  %v6699_v37 = vmax.f32 %v6697_v47, 0.0  ;;  %v6714_v5 = vmax.f32 %v12165_v4, 0.0 }
 0x345   :  { %v6613_v33 = vsub.f32 %v12167_v7, %v6611_v16  ;;  %v6618_v44 = vsub.f32 %v6616_v28, %v12167_v7  ;;  %v6625_v62 = vpack.c.bf16 %v6623_v27, %v6623_v27  ;;  %v6633_v20 = vsub.f32 %v12167_v7, %v6631_v48  ;;  %v10754_v16 = vld [vmem:[#allocation23 + $0x140] sm:$0xff] }
 0x346   :  { %v6638_v14 = vsub.f32 %v6636_v41, %v12167_v7  ;;  %v6645_v8 = vpack.c.bf16 %v6643_v6, %v6643_v6  ;;  %v6653_v36 = vsub.f32 %v12167_v7, %v6651_v55  ;;  %v6658_v29 = vsub.f32 %v6656_v11, %v12167_v7  ;;  %v10762_v48 = vld [vmem:[#allocation23 + $0x180] sm:$0xff]  ;;  %7410 = vmatpush.bf16.msrb.mxu1 %v10754_v16 }
 0x347   :  { %v6615_v45 = vmax.f32 %v6613_v33, 0.0  ;;  %v6620_v35 = vmax.f32 %v6618_v44, 0.0  ;;  %6627 = vst [vmem:[#allocation3] sm:$0xf] %v6625_v62  ;;  %v6635_v28 = vmax.f32 %v6633_v20, 0.0  ;;  %v6665_v30 = vpack.c.bf16 %v6663_v2, %v6663_v2  ;;  %7424 = vmatpush.bf16.msrb.mxu2 %v10762_v48 }
 0x348   :  { %v6640_v41 = vmax.f32 %v6638_v14, 0.0  ;;  %6647 = vst [vmem:[#allocation3 + $0x4] sm:$0xf] %v6645_v8  ;;  %v6655_v55 = vmax.f32 %v6653_v36, 0.0  ;;  %v6660_v24 = vmax.f32 %v6658_v29, 0.0  ;;  %v6673_v11 = vsub.f32 %v12167_v7, %v6671_v31 }
 0x349   :  { %v6622_v63 = vmul.f32 %v6620_v35, %v6615_v45  ;;  %6667 = vst [vmem:[#allocation3 + $0x8] sm:$0xf] %v6665_v30  ;;  %v6678_v38 = vsub.f32 %v6676_v34, %v12167_v7  ;;  %v6685_v58 = vpack.c.bf16 %v6683_v12, %v6683_v12  ;;  %v6693_v43 = vsub.f32 %v12167_v7, %v6691_v56 }
 0x34a   :  { %v6642_v26 = vmul.f32 %v6640_v41, %v6635_v28  ;;  %v6662_v40 = vmul.f32 %v6660_v24, %v6655_v55  ;;  %v6675_v59 = vmax.f32 %v6673_v11, 0.0  ;;  %v6698_v61 = vsub.f32 %v6696_v25, %v12167_v7 }
 0x34b   :  { %v6624_v31 = vmul.f32 %v6622_v63, %v6622_v63  ;;  %v6680_v18 = vmax.f32 %v6678_v38, 0.0  ;;  %6687 = vst [vmem:[#allocation3 + $0xc] sm:$0xf] %v6685_v58  ;;  %v6695_v51 = vmax.f32 %v6693_v43, 0.0  ;;  %v6701_v9 = vmul.f32 %v6699_v37, %v6694_v15 }
 0x34c   :  { %v6644_v34 = vmul.f32 %v6642_v26, %v6642_v26  ;;  %v6664_v0 = vmul.f32 %v6662_v40, %v6662_v40  ;;  %v6700_v56 = vmax.f32 %v6698_v61, 0.0  ;;  %v6713_v21 = vsub.f32 %v12167_v7, %v6711_v57 }
 0x34d   :  { %v6626_v52 = vpack.c.bf16 %v6624_v31, %v6624_v31  ;;  %v6682_v25 = vmul.f32 %v6680_v18, %v6675_v59  ;;  %v6703_v50 = vmul.f32 %v6701_v9, %v6701_v9  ;;  %v6717_v42 = vsub.f32 %v6716_v3, %v12122_v22 }
 0x34e   :  { %v6646_v10 = vpack.c.bf16 %v6644_v34, %v6644_v34  ;;  %v6666_v19 = vpack.c.bf16 %v6664_v0, %v6664_v0  ;;  %v6702_v54 = vmul.f32 %v6700_v56, %v6695_v51  ;;  %v6715_v47 = vmax.f32 %v6713_v21, 0.0  ;;  %v9844_v60 = vld [vmem:[#allocation3] sm:$0xf] }
 0x34f   :  { %6628 = vst [vmem:[#allocation3 + $0x20] sm:$0xf] %v6626_v52  ;;  %v6684_v27 = vmul.f32 %v6682_v25, %v6682_v25  ;;  %v6705_v6 = vpack.c.bf16 %v6703_v50, %v6703_v50  ;;  %v6718_v57 = vsub.f32 %v6716_v3, %v12167_v7  ;;  %v6719_v13 = vmax.f32 %v6717_v42, 0.0  ;;  %v10706_v11 = vld [vmem:[#allocation3 + $0x4] sm:$0xf] }
 0x350   :  { %6648 = vst [vmem:[#allocation3 + $0x24] sm:$0xf] %v6646_v10  ;;  %v6704_v17 = vmul.f32 %v6702_v54, %v6702_v54  ;;  %v6732_v15 = vsub.f32 %v12122_v22, %v6731_v23  ;;  %v6733_v2 = vsub.f32 %v12167_v7, %v6731_v23  ;;  %v6737_v12 = vsub.f32 %v6736_v53, %v12122_v22  ;;  %v9852_v58 = vld [vmem:[#allocation3 + $0x8] sm:$0xf] }
 0x351   :  { %6668 = vst [vmem:[#allocation3 + $0x28] sm:$0xf] %v6666_v19  ;;  %v6686_v1 = vpack.c.bf16 %v6684_v27, %v6684_v27  ;;  %v6720_v46 = vmax.f32 %v6718_v57, 0.0  ;;  %v6721_v3 = vmul.f32 %v6719_v13, %v6714_v5  ;;  %v6738_v37 = vsub.f32 %v6736_v53, %v12167_v7 }
 0x352   :  { %v6706_v33 = vpack.c.bf16 %v6704_v17, %v6704_v17  ;;  %6707 = vst [vmem:[#allocation3 + $0x10] sm:$0xf] %v6705_v6  ;;  %v6734_v44 = vmax.f32 %v6732_v15, 0.0  ;;  %v6735_v62 = vmax.f32 %v6733_v2, 0.0  ;;  %v6752_v23 = vsub.f32 %v12122_v22, %v6751_v49  ;;  %v10707_v61 = vld [vmem:[#allocation3 + $0xc] sm:$0xf] }
 0x353   :  { %6688 = vst [vmem:[#allocation3 + $0x2c] sm:$0xf] %v6686_v1  ;;  %v6722_v20 = vmul.f32 %v6720_v46, %v6715_v47  ;;  %v6723_v14 = vmul.f32 %v6721_v3, %v6721_v3  ;;  %v6739_v8 = vmax.f32 %v6737_v12, 0.0  ;;  %v6740_v36 = vmax.f32 %v6738_v37, 0.0  ;;  %v10800_v17 = vld [vmem:[#allocation25] ss:$0 sm:$0xff] }
 0x354   :  { %6708 = vst [vmem:[#allocation3 + $0x30] sm:$0xf] %v6706_v33  ;;  %v6753_v4 = vsub.f32 %v12167_v7, %v6751_v49  ;;  %v6754_v5 = vmax.f32 %v6752_v23, 0.0  ;;  %v6757_v53 = vsub.f32 %v6756_v32, %v12122_v22  ;;  %v6758_v29 = vsub.f32 %v6756_v32, %v12167_v7 }
 0x355   :  { %v6724_v16 = vmul.f32 %v6722_v20, %v6722_v20  ;;  %v6725_v45 = vpack.c.bf16 %v6723_v14, %v6723_v14  ;;  %v6741_v35 = vmul.f32 %v6739_v8, %v6734_v44  ;;  %v6742_v28 = vmul.f32 %v6740_v36, %v6735_v62 }
 0x356   :  { %v10710_v30 = vld [vmem:[#allocation3 + $0x1c] sm:$0xf0]  ;;  %v6755_v48 = vmax.f32 %v6753_v4, 0.0  ;;  %v6759_v41 = vmax.f32 %v6757_v53, 0.0  ;;  %v6760_v55 = vmax.f32 %v6758_v29, 0.0  ;;  %v7445_v14 = vlaneseq }
 0x357   :  { %v9845_v24 = vor.u32 %v10710_v30, %v9844_v60  ;;  %v9846_v39 = vld [vmem:[#allocation3 + $0x20] sm:$0xf0]  ;;  %v6726_v49 = vpack.c.bf16 %v6724_v16, %v6724_v16  ;;  %6727 = vst [vmem:[#allocation3 + $0x14] sm:$0xf] %v6725_v45  ;;  %v6743_v63 = vmul.f32 %v6741_v35, %v6741_v35  ;;  %v6744_v38 = vmul.f32 %v6742_v28, %v6742_v28 }
 0x358   :  { %v9849_v22 = vor.u32 %v10706_v11, %v9846_v39  ;;  %v10711_v43 = vld [vmem:[#allocation3 + $0x24] sm:$0xf0]  ;;  %v6761_v32 = vmul.f32 %v6759_v41, %v6754_v5  ;;  %v6762_v7 = vmul.f32 %v6760_v55, %v6755_v48  ;;  %v7446_v53 = vand.u32 127, %v7445_v14 }
 0x359   :  { %7341 = vmatmul.bf16.vlgmr.msra.gmra.mxu0 %v9845_v24  ;;  %v9853_v26 = vor.u32 %v10711_v43, %v9852_v58  ;;  %6728 = vst [vmem:[#allocation3 + $0x34] sm:$0xf] %v6726_v49  ;;  %v6745_v40 = vpack.c.bf16 %v6743_v63, %v6743_v63  ;;  %v6746_v59 = vpack.c.bf16 %v6744_v38, %v6744_v38  ;;  %v9860_v52 = vld [vmem:[#allocation3 + $0x10] sm:$0xf] }
 0x35a   :  { %7355 = vmatmul.bf16.vlgmr.msra.gmra.mxu1 %v9849_v22  ;;  %v9854_v31 = vld [vmem:[#allocation3 + $0x28] sm:$0xf0]  ;;  %v6763_v18 = vmul.f32 %v6761_v32, %v6761_v32  ;;  %v6764_v51 = vmul.f32 %v6762_v7, %v6762_v7  ;;  %vm7447_vm0 = vcmp.lt.s32.totalorder %v7446_v53, 10 }
 0x35b   :  { %7369 = vmatmul.bf16.vlgmr.msra.gmra.mxu2 %v9853_v26  ;;  %v9857_v9 = vor.u32 %v10707_v61, %v9854_v31  ;;  %6747 = vst [vmem:[#allocation3 + $0x18] sm:$0xf] %v6745_v40  ;;  %v10712_v56 = vld [vmem:[#allocation3 + $0x2c] sm:$0xf0] }
 0x35c   :  { %6748 = vst [vmem:[#allocation3 + $0x38] sm:$0xf] %v6746_v59  ;;  %v6765_v34 = vpack.c.bf16 %v6763_v18, %v6763_v18  ;;  %v6766_v0 = vpack.c.bf16 %v6764_v51, %v6764_v51  ;;  %v9861_v50 = vor.u32 %v10712_v56, %v9860_v52 }
 0x35d   :  { %7383 = vmatmul.bf16.vlgmr.msra.gmra.mxu3 %v9857_v9 }
 0x35e   :  { %6767 = vst [vmem:[#allocation3 + $0x1c] sm:$0xf] %v6765_v34  ;;  %v10708_v42 = vld [vmem:[#allocation3 + $0x14] sm:$0xf] }
 0x35f   :  { %6768 = vst [vmem:[#allocation3 + $0x3c] sm:$0xf] %v6766_v0 }
 0x360   :  { %v9862_v21 = vld [vmem:[#allocation3 + $0x30] sm:$0xf0] }
 0x361   :  { %v9865_v10 = vor.u32 %v10708_v42, %v9862_v21 }
 0x362   :  { %v9868_v19 = vld [vmem:[#allocation3 + $0x18] sm:$0xf] }
 0x363   :  { %v10713_v25 = vld [vmem:[#allocation3 + $0x34] sm:$0xf0] }
 0x364   :  { %v9869_v47 = vor.u32 %v10713_v25, %v9868_v19 }
 0x365   :  { %v10709_v27 = vld [vmem:[#allocation3 + $0x1c] sm:$0xf] }
 0x366   :  { %v9870_v54 = vld [vmem:[#allocation3 + $0x38] sm:$0xf0] }
 0x367   :  { %v9873_v6 = vor.u32 %v10709_v27, %v9870_v54 }
 0x369   :  { %7397 = vmatmul.bf16.vlgmr.msrb.gmra.mxu0 %v9861_v50 }
 0x36a   :  { %7411 = vmatmul.bf16.vlgmr.msrb.gmra.mxu1 %v9865_v10 }
 0x36b   :  { %7425 = vmatmul.bf16.vlgmr.msrb.gmra.mxu2 %v9869_v47 }
 0x36d   :  { %7439 = vmatmul.bf16.vlgmr.msrb.gmra.mxu3 %v9873_v6 }
 0x3d6   :  { %v7342_v57 = vpop.f32.mrf.mxu0 }
 0x3d7   :  { %v7356_v13 = vpop.f32.mrf.mxu1  ;;  %v7343_v15 = vadd.f32 %v10800_v17, %v7342_v57 }
 0x3d9   :  { %v7357_v3 = vadd.f32 %v7356_v13, %v7343_v15 }
 0x3de   :  { %v7370_v2 = vpop.f32.mrf.mxu2  ;;  %v7344_v12 = vpop.f32.mrf.mxu0 }
 0x3df   :  { %v7358_v46 = vpop.f32.mrf.mxu1  ;;  %v7371_v37 = vadd.f32 %v7370_v2, %v7357_v3  ;;  %v7345_v33 = vadd.f32 %v10800_v17, %v7344_v12 }
 0x3e0   :  { %v7384_v1 = vpop.f32.mrf.mxu3 }
 0x3e1   :  { %v7385_v23 = vadd.f32 %v7384_v1, %v7371_v37  ;;  %v7359_v8 = vadd.f32 %v7358_v46, %v7345_v33 }
 0x3e6   :  { %v7372_v44 = vpop.f32.mrf.mxu2  ;;  %v7398_v62 = vpop.f32.mrf.mxu0 }
 0x3e7   :  { %v7399_v36 = vadd.f32 %v7398_v62, %v7385_v23  ;;  %v7412_v4 = vpop.f32.mrf.mxu1  ;;  %v7373_v5 = vadd.f32 %v7372_v44, %v7359_v8 }
 0x3e8   :  { %v7386_v20 = vpop.f32.mrf.mxu3 }
 0x3e9   :  { %v7413_v29 = vadd.f32 %v7412_v4, %v7399_v36  ;;  %v7387_v45 = vadd.f32 %v7386_v20, %v7373_v5 }
 0x3ee   :  { %v7426_v60 = vpop.f32.mrf.mxu2  ;;  %v7400_v16 = vpop.f32.mrf.mxu0 }
 0x3ef   :  { %v7427_v35 = vadd.f32 %v7426_v60, %v7413_v29  ;;  %v7401_v48 = vadd.f32 %v7400_v16, %v7387_v45  ;;  %v7414_v55 = vpop.f32.mrf.mxu1 }
 0x3f0   :  { %v7440_v28 = vpop.f32.mrf.mxu3 }
 0x3f1   :  { %v7441_v30 = vadd.f32 %v7440_v28, %v7427_v35  ;;  %v7415_v24 = vadd.f32 %v7414_v55, %v7401_v48 }
 0x3f3   :  { %v7448_v41 = vsel %vm7447_vm0, %v7441_v30, -1e+30 }
 0x3f4   :  { %7450 = vmax.xlane.f32.xlu0 %v7448_v41 }
 0x3f6   :  { %v7428_v11 = vpop.f32.mrf.mxu2 }
 0x3f7   :  { %v7429_v39 = vadd.f32 %v7428_v11, %v7415_v24 }
 0x3f8   :  { %v7442_v49 = vpop.f32.mrf.mxu3 }
 0x3f9   :  { %v7443_v63 = vadd.f32 %v7442_v49, %v7429_v39 }
 0x3fb   :  { %v7449_v38 = vsel %vm7447_vm0, %v7443_v63, -1e+30 }
 0x3fc   :  { %7452 = vmax.xlane.f32.xlu0 %v7449_v38 }
 0x467   :  { %v7451_v22 = vpop.xlane.xlu0 %7450 }
 0x468   :  { %v7454_v58 = vsub.f32 %v7448_v41, %v7451_v22 }
 0x46a   :  { %v7456_v43 = vmul.f32 1.442695, %v7454_v58 }
 0x46c   :  { %10801 = vpow2.f32 %v7456_v43 }
 0x46f   :  { %v7453_v32 = vpop.xlane.xlu0 %7452 }
 0x470   :  { %v7455_v7 = vsub.f32 %v7449_v38, %v7453_v32 }
 0x472   :  { %v10802_v26 = vpop.eup %10801  ;;  %v7458_v40 = vmul.f32 1.442695, %v7455_v7 }
 0x473   :  { %7460 = vadd.xlane.f32.xlu1 %v10802_v26 }
 0x474   :  { %10803 = vpow2.f32 %v7458_v40 }
 0x47a   :  { %v10804_v59 = vpop.eup %10803 }
 0x47b   :  { %7462 = vadd.xlane.f32.xlu1 %v10804_v59 }
 0x4e6   :  { %v7461_v61 = vpop.xlane.xlu1 %7460 }
 0x4e7   :  { %10805 = vrcp.f32 %v7461_v61 }
 0x4ed   :  { %v10806_v31 = vpop.eup %10805 }
 0x4ee   :  { %v7466_v18 = vmul.f32 %v10806_v31, %v10802_v26  ;;  %v7463_v51 = vpop.xlane.xlu1 %7462 }
 0x4ef   :  { %10807 = vrcp.f32 %v7463_v51 }
 0x4f0   :  { %7468 = vst [vmem:[#allocation26] sm:$0xff] %v7466_v18 }
 0x4f5   :  { %v10808_v9 = vpop.eup %10807 }
 0x4f6   :  { %v7467_v34 = vmul.f32 %v10808_v9, %v10804_v59 }
 0x4f8   :  { %7469 = vst [vmem:[#allocation26 + $0x8] sm:$0xff] %v7467_v34 }
 0x4f9   :  { %7482 = dma.vmem_to_hbm [thread:$0]  %s7475_s15, 256, %s7477_s16, [#allocation6], %s11154_s19, %s11154_s19, %s11155_s8  }
 0x4fa   :  { %11134 = dma.done.wait [#allocation6], 256  }
 0x4fb   :  { %11135 = vsyncadd [#allocation6], 4294967040 }
 0x4fc   :  { %7487 = vsyncpa [#allocation5], 1 }
 0x4fd   :  { %7488 = vsyncpa [#allocation12], 1 }
 0x4fe   :  { %7489 = vsyncpa [#allocation18], 1 }
 0x4ff   :  { %7490 = vsyncpa [#allocation24], 1 }
 0x500   :  { %7491 = vsyncpa [#allocation6], 1 }
 0x501   :  { %7492 = vsyncpa [#allocation7], 1 }
 0x502   :  { %7493 = vsyncpa [#allocation10], 1 }
 0x503   :  { %7494 = vsyncpa [#allocation16], 1 }
 0x504   :  { %7495 = vsyncpa [#allocation22], 1 }

</bundles_post_ra>
